<compile_context>
chip_gen: v5e
topology: v5e:2x2
jax: 0.10.0
libtpu: 0.0.40
codegen_flags: <defaults>
</compile_context>

<pallas_src>
import jax
import jax.numpy as jnp
from jax.experimental import pallas as pl
from jax.experimental.pallas import tpu as pltpu

H1 = 128
H2 = 256
H3 = 128
NBLK = 4


def dqn_kernel(x_ref,
               w1_ref, b1_ref,       # (n_obs, 512) bf16, (1, 512) f32
               w2_ref, b2_ref,       # (4, 128, 256) bf16, (4, 1, 256) f32
               w3_ref, b3_ref,       # (4, 256, 128) bf16, (4, 1, 128) f32
               w4f_ref, bff_ref,     # (512, n_act) bf16, (1, n_act) f32
               o_ref,                # (TB, n_act) f32
               h3_scr):              # (TB, 512) bf16 VMEM scratch
    # Layer 1, fused across the 4 blocks: one lane-dense matmul.
    h1 = jnp.dot(x_ref[...], w1_ref[...], preferred_element_type=jnp.float32)
    h1 = jnp.maximum(h1 + b1_ref[...], 0.0).astype(jnp.bfloat16)

    # Layers 2 and 3 per block (static unroll -> 4 independent MXU chains).
    for k in range(NBLK):
        h1k = h1[:, k * H1:(k + 1) * H1]
        h2 = jnp.dot(h1k, w2_ref[k], preferred_element_type=jnp.float32)
        h2 = jnp.maximum(h2 + b2_ref[k], 0.0).astype(jnp.bfloat16)
        h3 = jnp.dot(h2, w3_ref[k], preferred_element_type=jnp.float32)
        h3 = jnp.maximum(h3 + b3_ref[k], 0.0)
        h3_scr[:, k * H3:(k + 1) * H3] = h3.astype(jnp.bfloat16)

    # Layer 4 + fusion precomposed: single K=512 matmul, one bias add.
    acc = jnp.dot(h3_scr[...], w4f_ref[...], preferred_element_type=jnp.float32)
    o_ref[...] = (acc + bff_ref[...]).astype(o_ref.dtype)


def dqn_forward(x, fused_params, *, tb=256):
    """Run the fused DQN forward. x: (B, n_obs) f32 -> (B, n_act) f32."""
    (w1f, b1f, w2, b2, w3, b3, w4f, bff) = fused_params
    B, n_obs = x.shape
    n_act = w4f.shape[-1]

    # Batch tile: multiple of 8 sublanes, capped at `tb` rows.
    TB = min(tb, ((B + 7) // 8) * 8)
    Bp = pl.cdiv(B, TB) * TB
    if Bp != B:
        x = jnp.pad(x, ((0, Bp - B), (0, 0)))

    # bf16 weights/activations, f32 biases + accumulation.
    x_bf = x.astype(jnp.bfloat16)
    w1f_bf = w1f.astype(jnp.bfloat16)
    w2_bf = w2.astype(jnp.bfloat16)
    w3_bf = w3.astype(jnp.bfloat16)
    w4f_bf = w4f.astype(jnp.bfloat16)

    def resident(shape):
        # Full-array block with a constant index_map: fetched once,
        # stays VMEM-resident across the batch grid.
        nd = len(shape)
        return pl.BlockSpec(shape, lambda i, _nd=nd: (0,) * _nd)

    out = pl.pallas_call(
        dqn_kernel,
        out_shape=jax.ShapeDtypeStruct((Bp, n_act), jnp.float32),
        grid=(Bp // TB,),
        in_specs=[
            pl.BlockSpec((TB, n_obs), lambda i: (i, 0)),
            resident(w1f_bf.shape), resident(b1f.shape),
            resident(w2_bf.shape), resident(b2.shape),
            resident(w3_bf.shape), resident(b3.shape),
            resident(w4f_bf.shape), resident(bff.shape),
        ],
        out_specs=pl.BlockSpec((TB, n_act), lambda i: (i, 0)),
        scratch_shapes=[pltpu.VMEM((TB, NBLK * H3), jnp.bfloat16)],
        compiler_params=pltpu.CompilerParams(
            dimension_semantics=("parallel",)),
    )(x_bf, w1f_bf, b1f, w2_bf, b2, w3_bf, b3, w4f_bf, bff)
    return out[:B]


def init_params(key, n_obs, n_act):
    """PyTorch-style nn.Linear init: U(-1/sqrt(fan_in), 1/sqrt(fan_in)).
    Weights stored as (in, out); per-block params stacked on a leading 4."""
    def linear(k, fan_in, fan_out, lead=()):
        kw, kb = jax.random.split(k)
        bound = 1.0 / jnp.sqrt(jnp.float32(fan_in))
        w = jax.random.uniform(kw, lead + (fan_in, fan_out), jnp.float32,
                               -bound, bound)
        b = jax.random.uniform(kb, lead + (1, fan_out), jnp.float32,
                               -bound, bound)
        return w, b

    keys = jax.random.split(key, 5)
    w1, b1 = linear(keys[0], n_obs, H1, (NBLK,))
    w2, b2 = linear(keys[1], H1, H2, (NBLK,))
    w3, b3 = linear(keys[2], H2, H3, (NBLK,))
    w4, b4 = linear(keys[3], H3, n_act, (NBLK,))
    wf_flat, bf = linear(keys[4], NBLK * n_act, n_act)
    wf = wf_flat.reshape(NBLK, n_act, n_act)
    return (w1, b1, w2, b2, w3, b3, w4, b4, wf, bf)


def fuse_params(params):
    """Offline (f32) param prep: fuse layer1 across blocks, precompose
    layer4 with the fusion Linear (exact: no nonlinearity between them)."""
    (w1, b1, w2, b2, w3, b3, w4, b4, wf, bf) = params
    n_obs = w1.shape[1]
    # layer1 fused: columns [k*128:(k+1)*128] == block k.
    w1f = jnp.transpose(w1, (1, 0, 2)).reshape(n_obs, NBLK * H1)
    b1f = b1.reshape(1, NBLK * H1)
    # layer4 @ fusion precomposition.
    w4f = jnp.concatenate([w4[k] @ wf[k] for k in range(NBLK)], axis=0)
    bff = bf + sum(b4[k] @ wf[k] for k in range(NBLK))
    return (w1f, b1f, w2, b2, w3, b3, w4f, bff)


def dqn_reference(x, params):
    """Pure-JAX f32 reference matching the original PyTorch module."""
    (w1, b1, w2, b2, w3, b3, w4, b4, wf, bf) = params
    outs = []
    for k in range(NBLK):
        h = jax.nn.relu(x @ w1[k] + b1[k])
        h = jax.nn.relu(h @ w2[k] + b2[k])
        h = jax.nn.relu(h @ w3[k] + b3[k])
        outs.append(h @ w4[k] + b4[k])
    cat = jnp.concatenate(outs, axis=1)
    return cat @ wf.reshape(NBLK * wf.shape[1], wf.shape[2]) + bf


if __name__ == "__main__":
    key = jax.random.PRNGKey(0)
    kx, kp = jax.random.split(key)

    n_obs, n_act = 16, 8
    params = init_params(kp, n_obs, n_act)
    fused = fuse_params(params)

    # Case 1: batched input exercising the grid (2 tiles of 256 rows).
    B1 = 512
    x1 = jax.random.normal(kx, (B1, n_obs), jnp.float32)
    out1 = jax.block_until_ready(dqn_forward(x1, fused, tb=256))
    ref1 = dqn_reference(x1, params)
    assert out1.shape == (B1, n_act)
    assert jnp.allclose(out1, ref1, atol=5e-2, rtol=5e-2), (
        "mismatch (B=512): max abs err %e"
        % float(jnp.max(jnp.abs(out1 - ref1))))

    # Case 2: tiny batch exercising the padding path (B=5 -> one 8-row tile).
    B2 = 5
    x2 = jax.random.normal(jax.random.PRNGKey(7), (B2, n_obs), jnp.float32)
    out2 = jax.block_until_ready(dqn_forward(x2, fused, tb=256))
    ref2 = dqn_reference(x2, params)
    assert out2.shape == (B2, n_act)
    assert jnp.allclose(out2, ref2, atol=5e-2, rtol=5e-2), (
        "mismatch (B=5): max abs err %e"
        % float(jnp.max(jnp.abs(out2 - ref2))))

    print("KERNEL_OK")
</pallas_src>

<mosaic_0001>
module attributes {stable_mosaic.version = 11 : i64} {
  func.func @dqn_kernel(%arg0: i32, %arg1: memref<256x16xbf16, #tpu.memory_space<vmem>>, %arg2: memref<16x512xbf16, #tpu.memory_space<vmem>>, %arg3: memref<1x512xf32, #tpu.memory_space<vmem>>, %arg4: memref<4x128x256xbf16, #tpu.memory_space<vmem>>, %arg5: memref<4x1x256xf32, #tpu.memory_space<vmem>>, %arg6: memref<4x256x128xbf16, #tpu.memory_space<vmem>>, %arg7: memref<4x1x128xf32, #tpu.memory_space<vmem>>, %arg8: memref<512x8xbf16, #tpu.memory_space<vmem>>, %arg9: memref<1x8xf32, #tpu.memory_space<vmem>>, %arg10: memref<256x8xf32, #tpu.memory_space<vmem>>, %arg11: memref<256x512xbf16, #tpu.memory_space<vmem>>) attributes {dimension_semantics = [#tpu.dimension_semantics<parallel>], iteration_bounds = array<i64: 2>, scalar_prefetch = 0 : i64, scratch_operands = 1 : i64, tpu.core_type = #tpu.core_type<tc>, window_params = [{transform_indices = @transform_0, window_bounds = array<i64: 256, 16>}, {pipeline_mode = #tpu.pipeline_mode<synchronous>, transform_indices = @transform_1, window_bounds = array<i64: 16, 512>}, {pipeline_mode = #tpu.pipeline_mode<synchronous>, transform_indices = @transform_2, window_bounds = array<i64: 1, 512>}, {pipeline_mode = #tpu.pipeline_mode<synchronous>, transform_indices = @transform_3, window_bounds = array<i64: 4, 128, 256>}, {pipeline_mode = #tpu.pipeline_mode<synchronous>, transform_indices = @transform_4, window_bounds = array<i64: 4, 1, 256>}, {pipeline_mode = #tpu.pipeline_mode<synchronous>, transform_indices = @transform_5, window_bounds = array<i64: 4, 256, 128>}, {pipeline_mode = #tpu.pipeline_mode<synchronous>, transform_indices = @transform_6, window_bounds = array<i64: 4, 1, 128>}, {pipeline_mode = #tpu.pipeline_mode<synchronous>, transform_indices = @transform_7, window_bounds = array<i64: 512, 8>}, {pipeline_mode = #tpu.pipeline_mode<synchronous>, transform_indices = @transform_8, window_bounds = array<i64: 1, 8>}, {transform_indices = @transform_9, window_bounds = array<i64: 256, 8>}]} {
    %c0 = arith.constant 0 : index
    %c0_0 = arith.constant 0 : index
    %0 = vector.load %arg1[%c0, %c0_0] : memref<256x16xbf16, #tpu.memory_space<vmem>>, vector<256x16xbf16>
    %c0_1 = arith.constant 0 : index
    %c0_2 = arith.constant 0 : index
    %1 = vector.load %arg2[%c0_1, %c0_2] : memref<16x512xbf16, #tpu.memory_space<vmem>>, vector<16x512xbf16>
    %cst = arith.constant dense<0.000000e+00> : vector<256x512xf32>
    %2 = tpu.matmul %0, %1, %cst {dimension_numbers = #tpu.dot_dimension_numbers<[1], [0], [0], [1], [0, 0, 1, 1], [], []>} : vector<256x16xbf16>, vector<16x512xbf16>, vector<256x512xf32> -> vector<256x512xf32>
    %c0_3 = arith.constant 0 : index
    %c0_4 = arith.constant 0 : index
    %3 = vector.load %arg3[%c0_3, %c0_4] : memref<1x512xf32, #tpu.memory_space<vmem>>, vector<1x512xf32>
    %4 = vector.broadcast %3 : vector<1x512xf32> to vector<256x512xf32>
    %5 = arith.addf %2, %4 : vector<256x512xf32>
    %cst_5 = arith.constant 0.000000e+00 : f32
    %6 = vector.broadcast %cst_5 : f32 to vector<256x512xf32>
    %7 = arith.maximumf %5, %6 : vector<256x512xf32>
    %8 = arith.truncf %7 : vector<256x512xf32> to vector<256x512xbf16>
    %9 = vector.extract_strided_slice %8 {offsets = [0, 0], sizes = [256, 128], strides = [1, 1]} : vector<256x512xbf16> to vector<256x128xbf16>
    %c0_6 = arith.constant 0 : index
    %c0_7 = arith.constant 0 : index
    %c0_8 = arith.constant 0 : index
    %10 = vector.load %arg4[%c0_6, %c0_7, %c0_8] : memref<4x128x256xbf16, #tpu.memory_space<vmem>>, vector<1x128x256xbf16>
    %11 = vector.shape_cast %10 : vector<1x128x256xbf16> to vector<128x256xbf16>
    %cst_9 = arith.constant dense<0.000000e+00> : vector<256x256xf32>
    %12 = tpu.matmul %9, %11, %cst_9 {dimension_numbers = #tpu.dot_dimension_numbers<[1], [0], [0], [1], [0, 0, 1, 1], [], []>} : vector<256x128xbf16>, vector<128x256xbf16>, vector<256x256xf32> -> vector<256x256xf32>
    %c0_10 = arith.constant 0 : index
    %c0_11 = arith.constant 0 : index
    %c0_12 = arith.constant 0 : index
    %13 = vector.load %arg5[%c0_10, %c0_11, %c0_12] : memref<4x1x256xf32, #tpu.memory_space<vmem>>, vector<1x1x256xf32>
    %14 = vector.shape_cast %13 : vector<1x1x256xf32> to vector<1x256xf32>
    %15 = vector.broadcast %14 : vector<1x256xf32> to vector<256x256xf32>
    %16 = arith.addf %12, %15 : vector<256x256xf32>
    %cst_13 = arith.constant 0.000000e+00 : f32
    %17 = vector.broadcast %cst_13 : f32 to vector<256x256xf32>
    %18 = arith.maximumf %16, %17 : vector<256x256xf32>
    %19 = arith.truncf %18 : vector<256x256xf32> to vector<256x256xbf16>
    %c0_14 = arith.constant 0 : index
    %c0_15 = arith.constant 0 : index
    %c0_16 = arith.constant 0 : index
    %20 = vector.load %arg6[%c0_14, %c0_15, %c0_16] : memref<4x256x128xbf16, #tpu.memory_space<vmem>>, vector<1x256x128xbf16>
    %21 = vector.shape_cast %20 : vector<1x256x128xbf16> to vector<256x128xbf16>
    %cst_17 = arith.constant dense<0.000000e+00> : vector<256x128xf32>
    %22 = tpu.matmul %19, %21, %cst_17 {dimension_numbers = #tpu.dot_dimension_numbers<[1], [0], [0], [1], [0, 0, 1, 1], [], []>} : vector<256x256xbf16>, vector<256x128xbf16>, vector<256x128xf32> -> vector<256x128xf32>
    %c0_18 = arith.constant 0 : index
    %c0_19 = arith.constant 0 : index
    %c0_20 = arith.constant 0 : index
    %23 = vector.load %arg7[%c0_18, %c0_19, %c0_20] : memref<4x1x128xf32, #tpu.memory_space<vmem>>, vector<1x1x128xf32>
    %24 = vector.shape_cast %23 : vector<1x1x128xf32> to vector<1x128xf32>
    %25 = vector.broadcast %24 : vector<1x128xf32> to vector<256x128xf32>
    %26 = arith.addf %22, %25 : vector<256x128xf32>
    %cst_21 = arith.constant 0.000000e+00 : f32
    %27 = vector.broadcast %cst_21 : f32 to vector<256x128xf32>
    %28 = arith.maximumf %26, %27 : vector<256x128xf32>
    %29 = arith.truncf %28 : vector<256x128xf32> to vector<256x128xbf16>
    %c0_22 = arith.constant 0 : index
    %c0_23 = arith.constant 0 : index
    %30 = vector.load %arg11[%c0_22, %c0_23] : memref<256x512xbf16, #tpu.memory_space<vmem>>, vector<256x128xbf16>
    tpu.vector_store %arg11[%c0_22, %c0_23], %29 {strides = array<i32>} : memref<256x512xbf16, #tpu.memory_space<vmem>>, vector<256x128xbf16>,
    %31 = vector.extract_strided_slice %8 {offsets = [0, 128], sizes = [256, 128], strides = [1, 1]} : vector<256x512xbf16> to vector<256x128xbf16>
    %c1 = arith.constant 1 : index
    %c0_24 = arith.constant 0 : index
    %c0_25 = arith.constant 0 : index
    %32 = vector.load %arg4[%c1, %c0_24, %c0_25] : memref<4x128x256xbf16, #tpu.memory_space<vmem>>, vector<1x128x256xbf16>
    %33 = vector.shape_cast %32 : vector<1x128x256xbf16> to vector<128x256xbf16>
    %cst_26 = arith.constant dense<0.000000e+00> : vector<256x256xf32>
    %34 = tpu.matmul %31, %33, %cst_26 {dimension_numbers = #tpu.dot_dimension_numbers<[1], [0], [0], [1], [0, 0, 1, 1], [], []>} : vector<256x128xbf16>, vector<128x256xbf16>, vector<256x256xf32> -> vector<256x256xf32>
    %c1_27 = arith.constant 1 : index
    %c0_28 = arith.constant 0 : index
    %c0_29 = arith.constant 0 : index
    %35 = vector.load %arg5[%c1_27, %c0_28, %c0_29] : memref<4x1x256xf32, #tpu.memory_space<vmem>>, vector<1x1x256xf32>
    %36 = vector.shape_cast %35 : vector<1x1x256xf32> to vector<1x256xf32>
    %37 = vector.broadcast %36 : vector<1x256xf32> to vector<256x256xf32>
    %38 = arith.addf %34, %37 : vector<256x256xf32>
    %cst_30 = arith.constant 0.000000e+00 : f32
    %39 = vector.broadcast %cst_30 : f32 to vector<256x256xf32>
    %40 = arith.maximumf %38, %39 : vector<256x256xf32>
    %41 = arith.truncf %40 : vector<256x256xf32> to vector<256x256xbf16>
    %c1_31 = arith.constant 1 : index
    %c0_32 = arith.constant 0 : index
    %c0_33 = arith.constant 0 : index
    %42 = vector.load %arg6[%c1_31, %c0_32, %c0_33] : memref<4x256x128xbf16, #tpu.memory_space<vmem>>, vector<1x256x128xbf16>
    %43 = vector.shape_cast %42 : vector<1x256x128xbf16> to vector<256x128xbf16>
    %cst_34 = arith.constant dense<0.000000e+00> : vector<256x128xf32>
    %44 = tpu.matmul %41, %43, %cst_34 {dimension_numbers = #tpu.dot_dimension_numbers<[1], [0], [0], [1], [0, 0, 1, 1], [], []>} : vector<256x256xbf16>, vector<256x128xbf16>, vector<256x128xf32> -> vector<256x128xf32>
    %c1_35 = arith.constant 1 : index
    %c0_36 = arith.constant 0 : index
    %c0_37 = arith.constant 0 : index
    %45 = vector.load %arg7[%c1_35, %c0_36, %c0_37] : memref<4x1x128xf32, #tpu.memory_space<vmem>>, vector<1x1x128xf32>
    %46 = vector.shape_cast %45 : vector<1x1x128xf32> to vector<1x128xf32>
    %47 = vector.broadcast %46 : vector<1x128xf32> to vector<256x128xf32>
    %48 = arith.addf %44, %47 : vector<256x128xf32>
    %cst_38 = arith.constant 0.000000e+00 : f32
    %49 = vector.broadcast %cst_38 : f32 to vector<256x128xf32>
    %50 = arith.maximumf %48, %49 : vector<256x128xf32>
    %51 = arith.truncf %50 : vector<256x128xf32> to vector<256x128xbf16>
    %c0_39 = arith.constant 0 : index
    %c128 = arith.constant 128 : index
    %52 = vector.load %arg11[%c0_39, %c128] : memref<256x512xbf16, #tpu.memory_space<vmem>>, vector<256x128xbf16>
    tpu.vector_store %arg11[%c0_39, %c128], %51 {strides = array<i32>} : memref<256x512xbf16, #tpu.memory_space<vmem>>, vector<256x128xbf16>,
    %53 = vector.extract_strided_slice %8 {offsets = [0, 256], sizes = [256, 128], strides = [1, 1]} : vector<256x512xbf16> to vector<256x128xbf16>
    %c2 = arith.constant 2 : index
    %c0_40 = arith.constant 0 : index
    %c0_41 = arith.constant 0 : index
    %54 = vector.load %arg4[%c2, %c0_40, %c0_41] : memref<4x128x256xbf16, #tpu.memory_space<vmem>>, vector<1x128x256xbf16>
    %55 = vector.shape_cast %54 : vector<1x128x256xbf16> to vector<128x256xbf16>
    %cst_42 = arith.constant dense<0.000000e+00> : vector<256x256xf32>
    %56 = tpu.matmul %53, %55, %cst_42 {dimension_numbers = #tpu.dot_dimension_numbers<[1], [0], [0], [1], [0, 0, 1, 1], [], []>} : vector<256x128xbf16>, vector<128x256xbf16>, vector<256x256xf32> -> vector<256x256xf32>
    %c2_43 = arith.constant 2 : index
    %c0_44 = arith.constant 0 : index
    %c0_45 = arith.constant 0 : index
    %57 = vector.load %arg5[%c2_43, %c0_44, %c0_45] : memref<4x1x256xf32, #tpu.memory_space<vmem>>, vector<1x1x256xf32>
    %58 = vector.shape_cast %57 : vector<1x1x256xf32> to vector<1x256xf32>
    %59 = vector.broadcast %58 : vector<1x256xf32> to vector<256x256xf32>
    %60 = arith.addf %56, %59 : vector<256x256xf32>
    %cst_46 = arith.constant 0.000000e+00 : f32
    %61 = vector.broadcast %cst_46 : f32 to vector<256x256xf32>
    %62 = arith.maximumf %60, %61 : vector<256x256xf32>
    %63 = arith.truncf %62 : vector<256x256xf32> to vector<256x256xbf16>
    %c2_47 = arith.constant 2 : index
    %c0_48 = arith.constant 0 : index
    %c0_49 = arith.constant 0 : index
    %64 = vector.load %arg6[%c2_47, %c0_48, %c0_49] : memref<4x256x128xbf16, #tpu.memory_space<vmem>>, vector<1x256x128xbf16>
    %65 = vector.shape_cast %64 : vector<1x256x128xbf16> to vector<256x128xbf16>
    %cst_50 = arith.constant dense<0.000000e+00> : vector<256x128xf32>
    %66 = tpu.matmul %63, %65, %cst_50 {dimension_numbers = #tpu.dot_dimension_numbers<[1], [0], [0], [1], [0, 0, 1, 1], [], []>} : vector<256x256xbf16>, vector<256x128xbf16>, vector<256x128xf32> -> vector<256x128xf32>
    %c2_51 = arith.constant 2 : index
    %c0_52 = arith.constant 0 : index
    %c0_53 = arith.constant 0 : index
    %67 = vector.load %arg7[%c2_51, %c0_52, %c0_53] : memref<4x1x128xf32, #tpu.memory_space<vmem>>, vector<1x1x128xf32>
    %68 = vector.shape_cast %67 : vector<1x1x128xf32> to vector<1x128xf32>
    %69 = vector.broadcast %68 : vector<1x128xf32> to vector<256x128xf32>
    %70 = arith.addf %66, %69 : vector<256x128xf32>
    %cst_54 = arith.constant 0.000000e+00 : f32
    %71 = vector.broadcast %cst_54 : f32 to vector<256x128xf32>
    %72 = arith.maximumf %70, %71 : vector<256x128xf32>
    %73 = arith.truncf %72 : vector<256x128xf32> to vector<256x128xbf16>
    %c0_55 = arith.constant 0 : index
    %c256 = arith.constant 256 : index
    %74 = vector.load %arg11[%c0_55, %c256] : memref<256x512xbf16, #tpu.memory_space<vmem>>, vector<256x128xbf16>
    tpu.vector_store %arg11[%c0_55, %c256], %73 {strides = array<i32>} : memref<256x512xbf16, #tpu.memory_space<vmem>>, vector<256x128xbf16>,
    %75 = vector.extract_strided_slice %8 {offsets = [0, 384], sizes = [256, 128], strides = [1, 1]} : vector<256x512xbf16> to vector<256x128xbf16>
    %c3 = arith.constant 3 : index
    %c0_56 = arith.constant 0 : index
    %c0_57 = arith.constant 0 : index
    %76 = vector.load %arg4[%c3, %c0_56, %c0_57] : memref<4x128x256xbf16, #tpu.memory_space<vmem>>, vector<1x128x256xbf16>
    %77 = vector.shape_cast %76 : vector<1x128x256xbf16> to vector<128x256xbf16>
    %cst_58 = arith.constant dense<0.000000e+00> : vector<256x256xf32>
    %78 = tpu.matmul %75, %77, %cst_58 {dimension_numbers = #tpu.dot_dimension_numbers<[1], [0], [0], [1], [0, 0, 1, 1], [], []>} : vector<256x128xbf16>, vector<128x256xbf16>, vector<256x256xf32> -> vector<256x256xf32>
    %c3_59 = arith.constant 3 : index
    %c0_60 = arith.constant 0 : index
    %c0_61 = arith.constant 0 : index
    %79 = vector.load %arg5[%c3_59, %c0_60, %c0_61] : memref<4x1x256xf32, #tpu.memory_space<vmem>>, vector<1x1x256xf32>
    %80 = vector.shape_cast %79 : vector<1x1x256xf32> to vector<1x256xf32>
    %81 = vector.broadcast %80 : vector<1x256xf32> to vector<256x256xf32>
    %82 = arith.addf %78, %81 : vector<256x256xf32>
    %cst_62 = arith.constant 0.000000e+00 : f32
    %83 = vector.broadcast %cst_62 : f32 to vector<256x256xf32>
    %84 = arith.maximumf %82, %83 : vector<256x256xf32>
    %85 = arith.truncf %84 : vector<256x256xf32> to vector<256x256xbf16>
    %c3_63 = arith.constant 3 : index
    %c0_64 = arith.constant 0 : index
    %c0_65 = arith.constant 0 : index
    %86 = vector.load %arg6[%c3_63, %c0_64, %c0_65] : memref<4x256x128xbf16, #tpu.memory_space<vmem>>, vector<1x256x128xbf16>
    %87 = vector.shape_cast %86 : vector<1x256x128xbf16> to vector<256x128xbf16>
    %cst_66 = arith.constant dense<0.000000e+00> : vector<256x128xf32>
    %88 = tpu.matmul %85, %87, %cst_66 {dimension_numbers = #tpu.dot_dimension_numbers<[1], [0], [0], [1], [0, 0, 1, 1], [], []>} : vector<256x256xbf16>, vector<256x128xbf16>, vector<256x128xf32> -> vector<256x128xf32>
    %c3_67 = arith.constant 3 : index
    %c0_68 = arith.constant 0 : index
    %c0_69 = arith.constant 0 : index
    %89 = vector.load %arg7[%c3_67, %c0_68, %c0_69] : memref<4x1x128xf32, #tpu.memory_space<vmem>>, vector<1x1x128xf32>
    %90 = vector.shape_cast %89 : vector<1x1x128xf32> to vector<1x128xf32>
    %91 = vector.broadcast %90 : vector<1x128xf32> to vector<256x128xf32>
    %92 = arith.addf %88, %91 : vector<256x128xf32>
    %cst_70 = arith.constant 0.000000e+00 : f32
    %93 = vector.broadcast %cst_70 : f32 to vector<256x128xf32>
    %94 = arith.maximumf %92, %93 : vector<256x128xf32>
    %95 = arith.truncf %94 : vector<256x128xf32> to vector<256x128xbf16>
    %c0_71 = arith.constant 0 : index
    %c384 = arith.constant 384 : index
    %96 = vector.load %arg11[%c0_71, %c384] : memref<256x512xbf16, #tpu.memory_space<vmem>>, vector<256x128xbf16>
    tpu.vector_store %arg11[%c0_71, %c384], %95 {strides = array<i32>} : memref<256x512xbf16, #tpu.memory_space<vmem>>, vector<256x128xbf16>,
    %c0_72 = arith.constant 0 : index
    %c0_73 = arith.constant 0 : index
    %97 = vector.load %arg11[%c0_72, %c0_73] : memref<256x512xbf16, #tpu.memory_space<vmem>>, vector<256x512xbf16>
    %c0_74 = arith.constant 0 : index
    %c0_75 = arith.constant 0 : index
    %98 = vector.load %arg8[%c0_74, %c0_75] : memref<512x8xbf16, #tpu.memory_space<vmem>>, vector<512x8xbf16>
    %cst_76 = arith.constant dense<0.000000e+00> : vector<256x8xf32>
    %99 = tpu.matmul %97, %98, %cst_76 {dimension_numbers = #tpu.dot_dimension_numbers<[1], [0], [0], [1], [0, 0, 1, 1], [], []>} : vector<256x512xbf16>, vector<512x8xbf16>, vector<256x8xf32> -> vector<256x8xf32>
    %c0_77 = arith.constant 0 : index
    %c0_78 = arith.constant 0 : index
    %100 = vector.load %arg9[%c0_77, %c0_78] : memref<1x8xf32, #tpu.memory_space<vmem>>, vector<1x8xf32>
    %101 = vector.broadcast %100 : vector<1x8xf32> to vector<256x8xf32>
    %102 = arith.addf %99, %101 : vector<256x8xf32>
    %c0_79 = arith.constant 0 : index
    %c0_80 = arith.constant 0 : index
    %103 = vector.load %arg10[%c0_79, %c0_80] : memref<256x8xf32, #tpu.memory_space<vmem>>, vector<256x8xf32>
    tpu.vector_store %arg10[%c0_79, %c0_80], %102 {strides = array<i32>} : memref<256x8xf32, #tpu.memory_space<vmem>>, vector<256x8xf32>,
    return
  }
  func.func @transform_0(%arg0: i32) -> (i32, i32) {
    %c0_i32 = arith.constant 0 : i32
    %c0_i32_0 = arith.constant 0 : i32
    return %arg0, %c0_i32 : i32, i32
  }
  func.func @transform_1(%arg0: i32) -> (i32, i32) {
    %c0_i32 = arith.constant 0 : i32
    %c0_i32_0 = arith.constant 0 : i32
    %c0_i32_1 = arith.constant 0 : i32
    return %c0_i32, %c0_i32_0 : i32, i32
  }
  func.func @transform_2(%arg0: i32) -> (i32, i32) {
    %c0_i32 = arith.constant 0 : i32
    %c0_i32_0 = arith.constant 0 : i32
    %c0_i32_1 = arith.constant 0 : i32
    return %c0_i32, %c0_i32_0 : i32, i32
  }
  func.func @transform_3(%arg0: i32) -> (i32, i32, i32) {
    %c0_i32 = arith.constant 0 : i32
    %c0_i32_0 = arith.constant 0 : i32
    %c0_i32_1 = arith.constant 0 : i32
    %c0_i32_2 = arith.constant 0 : i32
    return %c0_i32, %c0_i32_0, %c0_i32_1 : i32, i32, i32
  }
  func.func @transform_4(%arg0: i32) -> (i32, i32, i32) {
    %c0_i32 = arith.constant 0 : i32
    %c0_i32_0 = arith.constant 0 : i32
    %c0_i32_1 = arith.constant 0 : i32
    %c0_i32_2 = arith.constant 0 : i32
    return %c0_i32, %c0_i32_0, %c0_i32_1 : i32, i32, i32
  }
  func.func @transform_5(%arg0: i32) -> (i32, i32, i32) {
    %c0_i32 = arith.constant 0 : i32
    %c0_i32_0 = arith.constant 0 : i32
    %c0_i32_1 = arith.constant 0 : i32
    %c0_i32_2 = arith.constant 0 : i32
    return %c0_i32, %c0_i32_0, %c0_i32_1 : i32, i32, i32
  }
  func.func @transform_6(%arg0: i32) -> (i32, i32, i32) {
    %c0_i32 = arith.constant 0 : i32
    %c0_i32_0 = arith.constant 0 : i32
    %c0_i32_1 = arith.constant 0 : i32
    %c0_i32_2 = arith.constant 0 : i32
    return %c0_i32, %c0_i32_0, %c0_i32_1 : i32, i32, i32
  }
  func.func @transform_7(%arg0: i32) -> (i32, i32) {
    %c0_i32 = arith.constant 0 : i32
    %c0_i32_0 = arith.constant 0 : i32
    %c0_i32_1 = arith.constant 0 : i32
    return %c0_i32, %c0_i32_0 : i32, i32
  }
  func.func @transform_8(%arg0: i32) -> (i32, i32) {
    %c0_i32 = arith.constant 0 : i32
    %c0_i32_0 = arith.constant 0 : i32
    %c0_i32_1 = arith.constant 0 : i32
    return %c0_i32, %c0_i32_0 : i32, i32
  }
  func.func @transform_9(%arg0: i32) -> (i32, i32) {
    %c0_i32 = arith.constant 0 : i32
    %c0_i32_0 = arith.constant 0 : i32
    return %arg0, %c0_i32 : i32, i32
  }
}

</mosaic_0001>

<bundles_post_ra>
// kernel: tpu_custom_call.1
= control target key start
LH: loop header
LB: loop body
LE: loop exit
PB: predicated region body
PF: predicated region fallthrough
CT: control target
= control target key end

     0   :  { %14 = vsyncpa [#allocation4], 0  ;;  %s9042_s0 = inlined_call_operand.vmem [shape: bf16[512,16], index: 0, kind: input, shape index: {}]   ;;  %s9043_s1 = inlined_call_operand.vmem [shape: bf16[16,512], index: 1, kind: input, shape index: {}]   ;;  %s9044_s2 = inlined_call_operand.hbm [shape: f32[1,512], index: 2, kind: input, shape index: {}]   ;;  %s9045_s3 = inlined_call_operand.vmem [shape: bf16[4,128,256], index: 3, kind: input, shape index: {}]   ;;  %s9046_s4 = inlined_call_operand.hbm [shape: f32[4,1,256], index: 4, kind: input, shape index: {}]   ;;  %s9047_s5 = inlined_call_operand.hbm [shape: bf16[4,256,128], index: 5, kind: input, shape index: {}]   ;;  %s9048_s6 = inlined_call_operand.vmem [shape: f32[4,1,128], index: 6, kind: input, shape index: {}]   ;;  %s9049_s7 = inlined_call_operand.vmem [shape: bf16[512,8], index: 7, kind: input, shape index: {}]   ;;  %s9050_s8 = inlined_call_operand.vmem [shape: f32[1,8], index: 8, kind: input, shape index: {}]   ;;  %s9051_s9 = inlined_call_operand.vmem [shape: f32[512,8], index: 9, kind: output, shape index: {}]  }
   0x1   :  { %15 = vsyncpa [#allocation6], 0  ;;  %s7276_s30 = smov 0  }
   0x2 LB: > { %s275_s12 = sshll.u32 %s9046_s4, 4  ;;  %s5708_s13 = sadd.s32 4294967295, %s7217_s30   ;;  %s7217_s30 = sphi %s7276_s30, %s21_s30   ;;  %s276_s12 = int_to_ptr.hbm [resolvable:$true] %s275_s12 }
   0x3   : > { %p5710_p0 = scmp.ge.s32.totalorder %s7217_s30, 1  ;;  %p246_p1 = scmp.lt.s32.totalorder %s7217_s30, 3 }
   0x4   : > { %p7289_p2 = scmp.eq.s32.totalorder %s5708_s13, 0  ;;  %s7219_s16 = smov [#allocation5]  }
   0x5   : > { %p7293_p3 = pnand %p5710_p0, %p246_p1  ;;  %s277_s17 = sshll.u32 %s7219_s16, 4  ;;  %s278_s17 = int_to_ptr.vmem [resolvable:$true] %s277_s17 }
   0x6   : > { %s261_s20 = sshll.u32 %s9044_s2, 4  ;;  %s7220_s22 = smov [#allocation3]   ;;  %s262_s20 = int_to_ptr.hbm [resolvable:$true] %s261_s20 }
   0x7   : > { %p7072_p4 = pneg %p7293_p3  ;;  %s263_s23 = sshll.u32 %s7220_s22, 4  ;;  %s264_s23 = int_to_ptr.vmem [resolvable:$true] %s263_s23 }
   0x8   : > { %s289_s26 = sshll.u32 %s9047_s5, 4  ;;  %s7221_s27 = smov 32   ;;  %s290_s26 = int_to_ptr.hbm [resolvable:$true] %s289_s26 }
   0x9   : > { %p7304_p5 = pnand %p7289_p2, %p7072_p4  ;;  %s7222_s28 = smov 2  }
   0xa   : > { %s7223_s29 = smov [#allocation7]   ;;  %s7224_s11 = smov 64  }
   0xb   : > { %7078 = dma.hbm_to_vmem [thread:$0]  (!%p7304_p5), %s276_s12, 128, %s278_s17, [#allocation6], %s7221_s27, %s7221_s27, %s7222_s28  }
   0xc   : > { %7075 = dma.hbm_to_vmem [thread:$0]  (!%p7304_p5), %s262_s20, 64, %s264_s23, [#allocation4]  }
   0xd   : > { %s291_s10 = sshll.u32 %s7223_s29, 4  ;;  %s7225_s16 = smov 4   ;;  %s292_s10 = int_to_ptr.vmem [resolvable:$true] %s291_s10 }
   0xe   : > { %7081 = dma.hbm_to_vmem [thread:$0]  (!%p7304_p5), %s290_s26, 8192, %s292_s10, [#allocation6], %s7224_s11, %s7224_s11, %s7225_s16  }
   0xf   : > { %325 = sbr.rel (%p7293_p3) target bundleno = 1835 (0x72b), region = 56 }
  0x14   : > { %7208 = dma.done.wait (%p7289_p2), [#allocation4], 64  }
  0x15   : > { %7210 = vsyncadd (%p7289_p2), [#allocation4], 4294967232 }
  0x16   : > { %7212 = dma.done.wait (%p7289_p2), [#allocation6], 8320  }
  0x17   : > { %7214 = vsyncadd (%p7289_p2), [#allocation6], 4294958976  ;;  %s5719_s12 = sshll.u32 %s5708_s13, 5  ;;  %v5789_v0 = vld [vmem:[%s9043_s1] sm:$0xf]  ;;  %vm531_vm0 = vcmask 130048  }
  0x18   : > { %p373_p6 = scmp.lt.s32.totalorder %s5719_s12, 63  ;;  %v6834_v1 = vld [vmem:[%s9043_s1 + $0xc] sm:$0xf0]  ;;  %v6832_v2 = vld [vmem:[%s9043_s1 + $0x4] sm:$0xf]  ;;  %vm5588_vm1 = vcmask 64512  }
  0x19   : > { %v5790_v3 = vor.u32 %v6834_v1, %v5789_v0  ;;  %v5791_v4 = vld [vmem:[%s9043_s1 + $0x10] sm:$0xf0]  ;;  %v5925_v6 = vld [vmem:[%s9045_s3 + $0x70] sm:$0xf]  ;;  %v6851_v8 = vld [vmem:[%s9045_s3 + $0x74] sm:$0xf0] }
  0x1a   : > { %s9110_s12 = smov (!%p373_p6, %s5719_s12), 63  ;;  %v5794_v7 = vor.u32 %v6832_v2, %v5791_v4  ;;  %v6850_v9 = vld [vmem:[%s9045_s3 + $0x74] sm:$0xf]  ;;  %v5927_v10 = vld [vmem:[%s9045_s3 + $0x78] sm:$0xf0]  ;;  %v5926_v11 = vor.u32 %v6851_v8, %v5925_v6  ;;  %v6859_v50 = vld [vmem:[#allocation7 + $0x38] sm:$0xff] }
  0x1b   : > { %s5720_s15 = sshll.u32 %s9110_s12, 2  ;;  %587 = vmatpush.bf16.msra.mxu0 %v5790_v3  ;;  %v5930_v12 = vor.u32 %v6850_v9, %v5927_v10  ;;  %v5917_v13 = vld [vmem:[%s9045_s3 + $0x60] sm:$0xf]  ;;  %v6849_v14 = vld [vmem:[%s9045_s3 + $0x64] sm:$0xf0] }
  0x1c   : > { %s7335_s19 = scalar_lea.vmem %s9042_s0, %s5720_s15  ;;  %676 = vmatpush.bf16.msra.mxu1 %v5794_v7  ;;  %v6848_v15 = vld [vmem:[%s9045_s3 + $0x64] sm:$0xf]  ;;  %v5918_v16 = vor.u32 %v6849_v14, %v5917_v13  ;;  %v5919_v17 = vld [vmem:[%s9045_s3 + $0x68] sm:$0xf0]  ;;  %v5909_v21 = vld [vmem:[%s9045_s3 + $0x50] sm:$0xf] }
  0x1d   : > { %v7350_v5 = vld [vmem:[%s7335_s19] sm:$0xff]  ;;  %v5922_v18 = vor.u32 %v6848_v15, %v5919_v17  ;;  %v6817_v19 = vld [vmem:[%s7335_s19 + $0x8] sm:$0xff]  ;;  %v7384_v20 = vld [vmem:[%s7335_s19 + $0x10] sm:$0xff] }
  0x1e   : > { %5803 = vmatmul.msk.bf16.vlgmr.msra.gmra.mxu0 %vm531_vm0, %v7350_v5  ;;  %v6847_v22 = vld [vmem:[%s9045_s3 + $0x54] sm:$0xf0]  ;;  %v6846_v23 = vld [vmem:[%s9045_s3 + $0x54] sm:$0xf]  ;;  %v5911_v25 = vld [vmem:[%s9045_s3 + $0x58] sm:$0xf0] }
  0x1f   : > { %1326 = vmatpush.bf16.msrb.mxu0 %v5926_v11  ;;  %5819 = vmatmul.msk.bf16.vlgmr.msra.gmra.mxu1 %vm531_vm0, %v7350_v5  ;;  %v5910_v24 = vor.u32 %v6847_v22, %v5909_v21  ;;  %v5914_v26 = vor.u32 %v6846_v23, %v5911_v25  ;;  %v7403_v27 = vld [vmem:[%s7335_s19 + $0x18] sm:$0xff]  ;;  %v7410_v28 = vld [vmem:[%s7335_s19 + $0x20] sm:$0xff]  ;;  %v6845_v30 = vld [vmem:[%s9045_s3 + $0x44] sm:$0xf0] }
  0x20   : > { %1415 = vmatpush.bf16.msrb.mxu1 %v5930_v12  ;;  %v5901_v29 = vld [vmem:[%s9045_s3 + $0x40] sm:$0xf]  ;;  %v6844_v31 = vld [vmem:[%s9045_s3 + $0x44] sm:$0xf]  ;;  %v5903_v33 = vld [vmem:[%s9045_s3 + $0x48] sm:$0xf0] }
  0x21   : > { %v5902_v32 = vor.u32 %v6845_v30, %v5901_v29  ;;  %v5906_v34 = vor.u32 %v6844_v31, %v5903_v33  ;;  %v7429_v35 = vld [vmem:[%s7335_s19 + $0x28] sm:$0xff]  ;;  %v7436_v36 = vld [vmem:[%s7335_s19 + $0x30] sm:$0xff]  ;;  %v6835_v38 = vld [vmem:[%s9043_s1 + $0x14] sm:$0xf0] }
  0x22   : > { %v5797_v37 = vld [vmem:[%s9043_s1 + $0x8] sm:$0xf]  ;;  %v6833_v40 = vld [vmem:[%s9043_s1 + $0xc] sm:$0xf]  ;;  %v5799_v41 = vld [vmem:[%s9043_s1 + $0x18] sm:$0xf0] }
  0x23   : > { %1327 = vmatpush.bf16.msrb.mxu0 %v5918_v16  ;;  %v5798_v39 = vor.u32 %v6835_v38, %v5797_v37  ;;  %v5802_v42 = vor.u32 %v6833_v40, %v5799_v41  ;;  %v5893_v43 = vld [vmem:[%s9045_s3 + $0x30] sm:$0xf]  ;;  %v6843_v44 = vld [vmem:[%s9045_s3 + $0x34] sm:$0xf0]  ;;  %v6842_v45 = vld [vmem:[%s9045_s3 + $0x34] sm:$0xf] }
  0x24   : > { %1416 = vmatpush.bf16.msrb.mxu1 %v5922_v18  ;;  %v5894_v46 = vor.u32 %v6843_v44, %v5893_v43  ;;  %v5895_v47 = vld [vmem:[%s9045_s3 + $0x38] sm:$0xf0]  ;;  %v6867_v51 = vld [vmem:[#allocation7 + $0x78] sm:$0xff]  ;;  %v7479_v52 = vld [vmem:[#allocation3] sm:$0xf] }
  0x25   : > { %765 = vmatpush.bf16.msra.mxu2 %v5798_v39  ;;  %854 = vmatpush.bf16.msra.mxu3 %v5802_v42  ;;  %v5898_v48 = vor.u32 %v6842_v45, %v5895_v47  ;;  %v7471_v49 = vld [vmem:[%s7335_s19 + $0x38] sm:$0xff]  ;;  %v7482_v53 = vperm.slane %v7479_v52, 0  ;;  %v7485_v54 = vperm.slane %v7479_v52, 1  ;;  %v7488_v55 = vld [vmem:[%s7335_s19 + $0x40] sm:$0xff]  ;;  %v6841_v1 = vld [vmem:[%s9045_s3 + $0x24] sm:$0xf0] }
  0x26   : > { %v5885_v0 = vld [vmem:[%s9045_s3 + $0x20] sm:$0xf]  ;;  %v6840_v2 = vld [vmem:[%s9045_s3 + $0x24] sm:$0xf]  ;;  %v5887_v6 = vld [vmem:[%s9045_s3 + $0x28] sm:$0xf0] }
  0x27   : > { %1328 = vmatpush.bf16.msrb.mxu0 %v5910_v24  ;;  %v5890_v8 = vor.u32 %v6840_v2, %v5887_v6  ;;  %v6858_v12 = vld [vmem:[#allocation7 + $0x30] sm:$0xff]  ;;  %v7515_v13 = vld [vmem:[%s7335_s19 + $0x48] sm:$0xff]  ;;  %v7534_v39 = vld [vmem:[%s7335_s19 + $0x50] sm:$0xff] }
  0x28   : > { %1417 = vmatpush.bf16.msrb.mxu1 %v5914_v26  ;;  %5835 = vmatmul.msk.bf16.vlgmr.msra.gmra.mxu2 %vm531_vm0, %v7350_v5  ;;  %v6866_v30 = vld [vmem:[#allocation7 + $0x70] sm:$0xff]  ;;  %v6857_v6 = vld [vmem:[#allocation7 + $0x28] sm:$0xff] }
  0x29   : > { %5851 = vmatmul.msk.bf16.vlgmr.msra.gmra.mxu3 %vm531_vm0, %v7350_v5  ;;  %1732 = vmatpush.bf16.msrb.mxu2 %v6859_v50  ;;  %v5886_v5 = vor.u32 %v6841_v1, %v5885_v0  ;;  %v5879_v0 = vld [vmem:[%s9045_s3 + $0x18] sm:$0xf0] }
  0x2a   : > { %1821 = vmatpush.bf16.msrb.mxu3 %v6867_v51 }
  0x2b   : > { %1329 = vmatpush.bf16.msrb.mxu0 %v5902_v32 }
  0x2c   : > { %1418 = vmatpush.bf16.msrb.mxu1 %v5906_v34 }
  0x2d   : > { %1733 = vmatpush.bf16.msrb.mxu2 %v6858_v12 }
  0x2e   : > { %5804 = vmatmul.msk.bf16.gmra.mxu0 %vm531_vm0, %v6817_v19  ;;  %1822 = vmatpush.bf16.msrb.mxu3 %v6866_v30 }
  0x2f   : > { %5820 = vmatmul.msk.bf16.gmra.mxu1 %vm531_vm0, %v6817_v19  ;;  %1330 = vmatpush.bf16.msrb.mxu0 %v5894_v46 }
  0x30   : > { %1419 = vmatpush.bf16.msrb.mxu1 %v5898_v48 }
  0x31   : > { %1734 = vmatpush.bf16.msrb.mxu2 %v6857_v6 }
  0x33   : > { %1331 = vmatpush.bf16.msrb.mxu0 %v5886_v5 }
  0x34   : > { %1420 = vmatpush.bf16.msrb.mxu1 %v5890_v8 }
  0x38   : > { %5836 = vmatmul.msk.bf16.gmra.mxu2 %vm531_vm0, %v6817_v19 }
  0x39   : > { %5852 = vmatmul.msk.bf16.gmra.mxu3 %vm531_vm0, %v6817_v19 }
  0x3e   : > { %5805 = vmatmul.msk.bf16.gmra.mxu0 %vm531_vm0, %v7384_v20 }
  0x3f   : > { %5821 = vmatmul.msk.bf16.gmra.mxu1 %vm531_vm0, %v7384_v20 }
  0x48   : > { %5837 = vmatmul.msk.bf16.gmra.mxu2 %vm531_vm0, %v7384_v20 }
  0x49   : > { %5853 = vmatmul.msk.bf16.gmra.mxu3 %vm531_vm0, %v7384_v20 }
  0x4e   : > { %5806 = vmatmul.msk.bf16.gmra.mxu0 %vm531_vm0, %v7403_v27 }
  0x4f   : > { %5822 = vmatmul.msk.bf16.gmra.mxu1 %vm531_vm0, %v7403_v27 }
  0x58   : > { %5838 = vmatmul.msk.bf16.gmra.mxu2 %vm531_vm0, %v7403_v27 }
  0x59   : > { %5854 = vmatmul.msk.bf16.gmra.mxu3 %vm531_vm0, %v7403_v27 }
  0x5e   : > { %5807 = vmatmul.msk.bf16.gmra.mxu0 %vm531_vm0, %v7410_v28 }
  0x5f   : > { %5823 = vmatmul.msk.bf16.gmra.mxu1 %vm531_vm0, %v7410_v28 }
  0x68   : > { %5839 = vmatmul.msk.bf16.gmra.mxu2 %vm531_vm0, %v7410_v28 }
  0x69   : > { %5855 = vmatmul.msk.bf16.gmra.mxu3 %vm531_vm0, %v7410_v28 }
  0x6e   : > { %5808 = vmatmul.msk.bf16.gmra.mxu0 %vm531_vm0, %v7429_v35 }
  0x6f   : > { %5824 = vmatmul.msk.bf16.gmra.mxu1 %vm531_vm0, %v7429_v35 }
  0x78   : > { %5840 = vmatmul.msk.bf16.gmra.mxu2 %vm531_vm0, %v7429_v35 }
  0x79   : > { %5856 = vmatmul.msk.bf16.gmra.mxu3 %vm531_vm0, %v7429_v35 }
  0x7e   : > { %5809 = vmatmul.msk.bf16.gmra.mxu0 %vm531_vm0, %v7436_v36 }
  0x7f   : > { %5825 = vmatmul.msk.bf16.gmra.mxu1 %vm531_vm0, %v7436_v36 }
  0x88   : > { %5841 = vmatmul.msk.bf16.gmra.mxu2 %vm531_vm0, %v7436_v36 }
  0x89   : > { %5857 = vmatmul.msk.bf16.gmra.mxu3 %vm531_vm0, %v7436_v36 }
  0x8e   : > { %5810 = vmatmul.msk.bf16.gmra.mxu0 %vm531_vm0, %v7471_v49 }
  0x8f   : > { %5826 = vmatmul.msk.bf16.gmra.mxu1 %vm531_vm0, %v7471_v49 }
  0x98   : > { %5842 = vmatmul.msk.bf16.gmra.mxu2 %vm531_vm0, %v7471_v49 }
  0x99   : > { %5858 = vmatmul.msk.bf16.gmra.mxu3 %vm531_vm0, %v7471_v49 }
  0x9b   : > { %v589_v56 = vpop.f32.mrf.mxu0 }
  0x9c   : > { %v590_v57 = vadd.f32 %v589_v56, %v7482_v53  ;;  %v678_v58 = vpop.f32.mrf.mxu1 }
  0x9d   : > { %v679_v59 = vadd.f32 %v678_v58, %v7485_v54  ;;  %v5877_v58 = vld [vmem:[%s9045_s3 + $0x10] sm:$0xf] }
  0x9e   : > { %v936_v60 = vmax.f32 %v590_v57, 0.0  ;;  %5811 = vmatmul.msk.bf16.gmra.mxu0 %vm531_vm0, %v7488_v55 }
  0x9f   : > { %v937_v61 = vmax.f32 %v679_v59, 0.0  ;;  %5827 = vmatmul.msk.bf16.gmra.mxu1 %vm531_vm0, %v7488_v55  ;;  %v6839_v59 = vld [vmem:[%s9045_s3 + $0x14] sm:$0xf0] }
  0xa1   : > { %v1064_v62 = vpack.c.bf16 %v937_v61, %v936_v60  ;;  %v6838_v60 = vld [vmem:[%s9045_s3 + $0x14] sm:$0xf] }
  0xa2   : > { %v5882_v2 = vor.u32 %v6838_v60, %v5879_v0 }
  0xa3   : > { %v591_v63 = vpop.f32.mrf.mxu0  ;;  %v1182_v14 = vunpack.c.l.b16 %v1064_v62  ;;  %v2030_v15 = vunpack.c.h.b16 %v1064_v62 }
  0xa4   : > { %v592_v3 = vadd.f32 %v591_v63, %v7482_v53  ;;  %v680_v4 = vpop.f32.mrf.mxu1  ;;  %v5878_v63 = vor.u32 %v6839_v59, %v5877_v58  ;;  %1421 = vmatpush.bf16.msrb.mxu1 %v5882_v2  ;;  %v6836_v58 = vld [vmem:[%s9045_s3 + $0x4] sm:$0xf] }
  0xa5   : > { %v681_v7 = vadd.f32 %v680_v4, %v7485_v54 }
  0xa6   : > { %v940_v9 = vmax.f32 %v592_v3, 0.0  ;;  %1332 = vmatpush.bf16.msrb.mxu0 %v5878_v63 }
  0xa7   : > { %v941_v10 = vmax.f32 %v681_v7, 0.0  ;;  %v7565_v7 = vld [vmem:[%s7335_s19 + $0x58] sm:$0xff] }
  0xa8   : > { %5843 = vmatmul.msk.bf16.gmra.mxu2 %vm531_vm0, %v7488_v55 }
  0xa9   : > { %v1066_v11 = vpack.c.bf16 %v941_v10, %v940_v9  ;;  %5859 = vmatmul.msk.bf16.gmra.mxu3 %vm531_vm0, %v7488_v55 }
  0xab   : > { %v1183_v16 = vunpack.c.l.b16 %v1066_v11  ;;  %v2031_v17 = vunpack.c.h.b16 %v1066_v11  ;;  %v594_v18 = vpop.f32.mrf.mxu0 }
  0xac   : > { %v595_v19 = vadd.f32 %v594_v18, %v7482_v53  ;;  %v683_v20 = vpop.f32.mrf.mxu1 }
  0xad   : > { %v7518_v21 = vpack.c.b16 %v2031_v17, %v2030_v15  ;;  %v684_v22 = vadd.f32 %v683_v20, %v7485_v54  ;;  %v7521_v23 = vpack.c.b16 %v1183_v16, %v1182_v14 }
  0xae   : > { %v944_v24 = vmax.f32 %v595_v19, 0.0  ;;  %5812 = vmatmul.msk.bf16.gmra.mxu0 %vm531_vm0, %v7515_v13 }
  0xaf   : > { %v945_v25 = vmax.f32 %v684_v22, 0.0  ;;  %5828 = vmatmul.msk.bf16.gmra.mxu1 %vm531_vm0, %v7515_v13 }
  0xb1   : > { %v1068_v26 = vpack.c.bf16 %v945_v25, %v944_v24  ;;  %v6865_v24 = vld [vmem:[#allocation7 + $0x68] sm:$0xff] }
  0xb2   : > { %1823 = vmatpush.bf16.msrb.mxu3 %v6865_v24  ;;  %v6864_v24 = vld [vmem:[#allocation7 + $0x60] sm:$0xff] }
  0xb3   : > { %v596_v29 = vpop.f32.mrf.mxu0  ;;  %v1184_v40 = vunpack.c.l.b16 %v1068_v26  ;;  %v2032_v41 = vunpack.c.h.b16 %v1068_v26 }
  0xb4   : > { %v597_v31 = vadd.f32 %v596_v29, %v7482_v53  ;;  %v685_v32 = vpop.f32.mrf.mxu1 }
  0xb5   : > { %v686_v33 = vadd.f32 %v685_v32, %v7485_v54 }
  0xb6   : > { %v948_v34 = vmax.f32 %v597_v31, 0.0  ;;  %1824 = vmatpush.bf16.msrb.mxu3 %v6864_v24 }
  0xb7   : > { %v949_v37 = vmax.f32 %v686_v33, 0.0  ;;  %v7584_v33 = vld [vmem:[%s7335_s19 + $0x60] sm:$0xff] }
  0xb8   : > { %5844 = vmatmul.msk.bf16.gmra.mxu2 %vm531_vm0, %v7515_v13 }
  0xb9   : > { %v1070_v38 = vpack.c.bf16 %v949_v37, %v948_v34  ;;  %5860 = vmatmul.msk.bf16.gmra.mxu3 %vm531_vm0, %v7515_v13 }
  0xbb   : > { %v599_v42 = vpop.f32.mrf.mxu0  ;;  %v1185_v43 = vunpack.c.l.b16 %v1070_v38  ;;  %v2033_v44 = vunpack.c.h.b16 %v1070_v38 }
  0xbc   : > { %v600_v45 = vadd.f32 %v599_v42, %v7482_v53  ;;  %v688_v46 = vpop.f32.mrf.mxu1 }
  0xbd   : > { %v689_v47 = vadd.f32 %v688_v46, %v7485_v54  ;;  %v7538_v48 = vpack.c.b16 %v1185_v43, %v1184_v40  ;;  %v7540_v27 = vpack.c.b16 %v2033_v44, %v2032_v41 }
  0xbe   : > { %v952_v50 = vmax.f32 %v600_v45, 0.0  ;;  %5813 = vmatmul.msk.bf16.gmra.mxu0 %vm531_vm0, %v7534_v39 }
  0xbf   : > { %v953_v51 = vmax.f32 %v689_v47, 0.0  ;;  %5829 = vmatmul.msk.bf16.gmra.mxu1 %vm531_vm0, %v7534_v39 }
  0xc1   : > { %v1072_v56 = vpack.c.bf16 %v953_v51, %v952_v50 }
  0xc3   : > { %v601_v57 = vpop.f32.mrf.mxu0  ;;  %v1186_v8 = vunpack.c.l.b16 %v1072_v56  ;;  %v2034_v9 = vunpack.c.h.b16 %v1072_v56  ;;  %v5869_v56 = vld [vmem:[%s9045_s3] sm:$0xf] }
  0xc4   : > { %v602_v61 = vadd.f32 %v601_v57, %v7482_v53  ;;  %v690_v62 = vpop.f32.mrf.mxu1  ;;  %v6837_v57 = vld [vmem:[%s9045_s3 + $0x4] sm:$0xf0] }
  0xc5   : > { %v691_v1 = vadd.f32 %v690_v62, %v7485_v54  ;;  %v5871_v62 = vld [vmem:[%s9045_s3 + $0x8] sm:$0xf0] }
  0xc6   : > { %v956_v3 = vmax.f32 %v602_v61, 0.0  ;;  %v5870_v61 = vor.u32 %v6837_v57, %v5869_v56  ;;  %v5874_v0 = vor.u32 %v6836_v58, %v5871_v62  ;;  %v6069_v58 = vld [vmem:[%s9045_s3 + $0xf0] sm:$0xf] }
  0xc7   : > { %v957_v4 = vmax.f32 %v691_v1, 0.0 }
  0xc8   : > { %1333 = vmatpush.bf16.msrb.mxu0 %v5870_v61  ;;  %1422 = vmatpush.bf16.msrb.mxu1 %v5874_v0  ;;  %v6071_v0 = vld [vmem:[%s9045_s3 + $0xf8] sm:$0xf0] }
  0xc9   : > { %v1074_v5 = vpack.c.bf16 %v957_v4, %v956_v3  ;;  %v6856_v4 = vld [vmem:[#allocation7 + $0x20] sm:$0xff]  ;;  %5845 = vmatmul.msk.bf16.gmra.mxu2 %vm531_vm0, %v7534_v39  ;;  %5861 = vmatmul.msk.bf16.gmra.mxu3 %vm531_vm0, %v7534_v39 }
  0xca   : > { %1735 = vmatpush.bf16.msrb.mxu2 %v6856_v4  ;;  %v767_v4 = vpop.f32.mrf.mxu2 }
  0xcb   : > { %v604_v10 = vpop.f32.mrf.mxu0  ;;  %v1187_v11 = vunpack.c.l.b16 %v1074_v5  ;;  %v2035_v12 = vunpack.c.h.b16 %v1074_v5  ;;  %v7615_v5 = vld [vmem:[%s7335_s19 + $0x68] sm:$0xff] }
  0xcc   : > { %v605_v14 = vadd.f32 %v604_v10, %v7482_v53  ;;  %v693_v28 = vpop.f32.mrf.mxu1 }
  0xcd   : > { %v694_v15 = vadd.f32 %v693_v28, %v7485_v54  ;;  %v7569_v16 = vpack.c.b16 %v1187_v11, %v1186_v8  ;;  %v7571_v17 = vpack.c.b16 %v2035_v12, %v2034_v9 }
  0xce   : > { %v960_v18 = vmax.f32 %v605_v14, 0.0  ;;  %5814 = vmatmul.msk.bf16.gmra.mxu0 %vm531_vm0, %v7565_v7 }
  0xcf   : > { %v961_v19 = vmax.f32 %v694_v15, 0.0  ;;  %5830 = vmatmul.msk.bf16.gmra.mxu1 %vm531_vm0, %v7565_v7 }
  0xd1   : > { %v1076_v20 = vpack.c.bf16 %v961_v19, %v960_v18 }
  0xd3   : > { %v606_v22 = vpop.f32.mrf.mxu0  ;;  %v1188_v34 = vunpack.c.l.b16 %v1076_v20  ;;  %v2036_v37 = vunpack.c.h.b16 %v1076_v20 }
  0xd4   : > { %v607_v25 = vadd.f32 %v606_v22, %v7482_v53  ;;  %v695_v26 = vpop.f32.mrf.mxu1 }
  0xd5   : > { %v696_v29 = vadd.f32 %v695_v26, %v7485_v54 }
  0xd6   : > { %v964_v30 = vmax.f32 %v607_v25, 0.0 }
  0xd7   : > { %v965_v31 = vmax.f32 %v696_v29, 0.0 }
  0xd9   : > { %v1078_v32 = vpack.c.bf16 %v965_v31, %v964_v30  ;;  %5846 = vmatmul.msk.bf16.gmra.mxu2 %vm531_vm0, %v7565_v7  ;;  %5862 = vmatmul.msk.bf16.gmra.mxu3 %vm531_vm0, %v7565_v7 }
  0xdb   : > { %v609_v38 = vpop.f32.mrf.mxu0  ;;  %v1189_v40 = vunpack.c.l.b16 %v1078_v32  ;;  %v2037_v41 = vunpack.c.h.b16 %v1078_v32 }
  0xdc   : > { %v610_v42 = vadd.f32 %v609_v38, %v7482_v53  ;;  %v698_v43 = vpop.f32.mrf.mxu1 }
  0xdd   : > { %v699_v44 = vadd.f32 %v698_v43, %v7485_v54  ;;  %v7588_v45 = vpack.c.b16 %v1189_v40, %v1188_v34  ;;  %v7590_v35 = vpack.c.b16 %v2037_v41, %v2036_v37  ;;  %v7634_v34 = vld [vmem:[%s7335_s19 + $0x70] sm:$0xff] }
  0xde   : > { %v968_v46 = vmax.f32 %v610_v42, 0.0  ;;  %5815 = vmatmul.msk.bf16.gmra.mxu0 %vm531_vm0, %v7584_v33 }
  0xdf   : > { %v969_v47 = vmax.f32 %v699_v44, 0.0  ;;  %5831 = vmatmul.msk.bf16.gmra.mxu1 %vm531_vm0, %v7584_v33 }
  0xe1   : > { %v1080_v50 = vpack.c.bf16 %v969_v47, %v968_v46 }
  0xe3   : > { %v611_v51 = vpop.f32.mrf.mxu0  ;;  %v1190_v6 = vunpack.c.l.b16 %v1080_v50  ;;  %v2038_v8 = vunpack.c.h.b16 %v1080_v50 }
  0xe4   : > { %v612_v59 = vadd.f32 %v611_v51, %v7482_v53  ;;  %v700_v60 = vpop.f32.mrf.mxu1 }
  0xe5   : > { %v701_v63 = vadd.f32 %v700_v60, %v7485_v54  ;;  %v6882_v60 = vld [vmem:[%s9045_s3 + $0xf4] sm:$0xf] }
  0xe6   : > { %v972_v1 = vmax.f32 %v612_v59, 0.0  ;;  %v6883_v59 = vld [vmem:[%s9045_s3 + $0xf4] sm:$0xf0] }
  0xe7   : > { %v973_v2 = vmax.f32 %v701_v63, 0.0  ;;  %v6070_v63 = vor.u32 %v6883_v59, %v6069_v58 }
  0xe9   : > { %v1082_v3 = vpack.c.bf16 %v973_v2, %v972_v1  ;;  %v6074_v2 = vor.u32 %v6882_v60, %v6071_v0  ;;  %2174 = vmatpush.bf16.msra.mxu0 %v6070_v63 }
  0xeb   : > { %v614_v9 = vpop.f32.mrf.mxu0  ;;  %v1191_v10 = vunpack.c.l.b16 %v1082_v3  ;;  %v2039_v11 = vunpack.c.h.b16 %v1082_v3  ;;  %2263 = vmatpush.bf16.msra.mxu1 %v6074_v2 }
  0xec   : > { %v615_v12 = vadd.f32 %v614_v9, %v7482_v53  ;;  %v703_v36 = vpop.f32.mrf.mxu1 }
  0xed   : > { %v704_v14 = vadd.f32 %v703_v36, %v7485_v54  ;;  %v7619_v28 = vpack.c.b16 %v1191_v10, %v1190_v6  ;;  %v7621_v15 = vpack.c.b16 %v2039_v11, %v2038_v8  ;;  %v856_v8 = vpop.f32.mrf.mxu3  ;;  %v7665_v10 = vperm.slane %v7479_v52, 2 }
  0xee   : > { %v976_v18 = vmax.f32 %v615_v12, 0.0  ;;  %5816 = vmatmul.msk.bf16.gmra.mxu0 %vm531_vm0, %v7615_v5  ;;  %v7668_v11 = vperm.slane %v7479_v52, 3  ;;  %v6855_v12 = vld [vmem:[#allocation7 + $0x18] sm:$0xff] }
  0xef   : > { %v977_v19 = vmax.f32 %v704_v14, 0.0  ;;  %5832 = vmatmul.msk.bf16.gmra.mxu1 %vm531_vm0, %v7615_v5  ;;  %v7671_v14 = vld [vmem:[%s7335_s19 + $0x78] sm:$0xff]  ;;  %1736 = vmatpush.bf16.msrb.mxu2 %v6855_v12  ;;  %s5722_s19 = sshll.u32 %s9110_s12, 3 }
  0xf0   : > { %s8919_s20 = scalar_lea.vmem %s9051_s9, %s5722_s19 }
  0xf1   : > { %v1084_v20 = vpack.c.bf16 %v977_v19, %v976_v18  ;;  %v768_v18 = vadd.f32 %v767_v4, %v7665_v10  ;;  %v857_v19 = vadd.f32 %v856_v8, %v7668_v11 }
  0xf3   : > { %v616_v22 = vpop.f32.mrf.mxu0  ;;  %v1192_v37 = vunpack.c.l.b16 %v1084_v20  ;;  %v2040_v38 = vunpack.c.h.b16 %v1084_v20  ;;  %v938_v52 = vmax.f32 %v768_v18, 0.0 }
  0xf4   : > { %v617_v25 = vadd.f32 %v616_v22, %v7482_v53  ;;  %v705_v26 = vpop.f32.mrf.mxu1 }
  0xf5   : > { %v706_v29 = vadd.f32 %v705_v26, %v7485_v54 }
  0xf6   : > { %v980_v30 = vmax.f32 %v617_v25, 0.0 }
  0xf7   : > { %v981_v31 = vmax.f32 %v706_v29, 0.0 }
  0xf9   : > { %v1086_v32 = vpack.c.bf16 %v981_v31, %v980_v30  ;;  %v939_v30 = vmax.f32 %v857_v19, 0.0 }
  0xfb   : > { %v619_v40 = vpop.f32.mrf.mxu0  ;;  %v1193_v41 = vunpack.c.l.b16 %v1086_v32  ;;  %v2041_v42 = vunpack.c.h.b16 %v1086_v32 }
  0xfc   : > { %v620_v43 = vadd.f32 %v619_v40, %v7482_v53  ;;  %v708_v44 = vpop.f32.mrf.mxu1 }
  0xfd   : > { %v709_v46 = vadd.f32 %v708_v44, %v7485_v54  ;;  %v7638_v47 = vpack.c.b16 %v1193_v41, %v1192_v37  ;;  %v7640_v49 = vpack.c.b16 %v2041_v42, %v2040_v38  ;;  %v769_v37 = vpop.f32.mrf.mxu2  ;;  %v1065_v41 = vpack.c.bf16 %v939_v30, %v938_v52  ;;  %5847 = vmatmul.msk.bf16.gmra.mxu2 %vm531_vm0, %v7584_v33 }
  0xfe   : > { %v984_v50 = vmax.f32 %v620_v43, 0.0  ;;  %5817 = vmatmul.msk.bf16.gmra.mxu0 %vm531_vm0, %v7634_v34  ;;  %v770_v42 = vadd.f32 %v769_v37, %v7665_v10  ;;  %v858_v43 = vpop.f32.mrf.mxu3  ;;  %5863 = vmatmul.msk.bf16.gmra.mxu3 %vm531_vm0, %v7584_v33 }
  0xff   : > { %v985_v51 = vmax.f32 %v709_v46, 0.0  ;;  %5833 = vmatmul.msk.bf16.gmra.mxu1 %vm531_vm0, %v7634_v34  ;;  %v859_v44 = vadd.f32 %v858_v43, %v7668_v11  ;;  %v2912_v60 = vunpack.c.l.b16 %v1065_v41 }
 0x101   : > { %v1088_v56 = vpack.c.bf16 %v985_v51, %v984_v50  ;;  %v942_v50 = vmax.f32 %v770_v42, 0.0  ;;  %v943_v51 = vmax.f32 %v859_v44, 0.0 }
 0x103   : > { %v621_v57 = vpop.f32.mrf.mxu0  ;;  %v1194_v36 = vunpack.c.l.b16 %v1088_v56  ;;  %v2042_v24 = vunpack.c.h.b16 %v1088_v56 }
 0x104   : > { %v622_v61 = vadd.f32 %v621_v57, %v7482_v53  ;;  %v710_v62 = vpop.f32.mrf.mxu1  ;;  %v6863_v57 = vld [vmem:[#allocation7 + $0x58] sm:$0xff] }
 0x105   : > { %v711_v1 = vadd.f32 %v710_v62, %v7485_v54  ;;  %v1067_v62 = vpack.c.bf16 %v943_v51, %v942_v50  ;;  %1825 = vmatpush.bf16.msrb.mxu3 %v6863_v57 }
 0x106   : > { %v988_v3 = vmax.f32 %v622_v61, 0.0  ;;  %v3762_v61 = vunpack.c.h.b16 %v1065_v41 }
 0x107   : > { %v989_v6 = vmax.f32 %v711_v1, 0.0  ;;  %v2913_v1 = vunpack.c.l.b16 %v1067_v62  ;;  %v3763_v2 = vunpack.c.h.b16 %v1067_v62 }
 0x109   : > { %v1090_v9 = vpack.c.bf16 %v989_v6, %v988_v3  ;;  %v772_v3 = vpop.f32.mrf.mxu2  ;;  %v861_v6 = vpop.f32.mrf.mxu3  ;;  %v7693_v8 = vpack.c.b16 %v2913_v1, %v2912_v60  ;;  %v6881_v60 = vld [vmem:[%s9045_s3 + $0xe4] sm:$0xf0] }
 0x10b   : > { %v624_v55 = vpop.f32.mrf.mxu0  ;;  %v1195_v20 = vunpack.c.l.b16 %v1090_v9  ;;  %v2043_v22 = vunpack.c.h.b16 %v1090_v9  ;;  %v7695_v9 = vpack.c.b16 %v3763_v2, %v3762_v61  ;;  %v6063_v2 = vld [vmem:[%s9045_s3 + $0xe8] sm:$0xf0] }
 0x10c   : > { %v625_v25 = vadd.f32 %v624_v55, %v7482_v53  ;;  %v713_v26 = vpop.f32.mrf.mxu1  ;;  %v862_v55 = vadd.f32 %v861_v6, %v7668_v11 }
 0x10d   : > { %v714_v29 = vadd.f32 %v713_v26, %v7485_v54  ;;  %v7677_v31 = vpack.c.b16 %v1195_v20, %v1194_v36  ;;  %v7681_v38 = vpack.c.b16 %v2043_v22, %v2042_v24  ;;  %9073 = vst [vmem:[#allocation10_spill] sm:$0xff] %v7695_v9  ;;  %v773_v36 = vadd.f32 %v772_v3, %v7665_v10 }
 0x10e   : > { %v992_v32 = vmax.f32 %v625_v25, 0.0  ;;  %5818 = vmatmul.msk.bf16.gmra.mxu0 %vm531_vm0, %v7671_v14  ;;  %v947_v22 = vmax.f32 %v862_v55, 0.0 }
 0x10f   : > { %v993_v40 = vmax.f32 %v714_v29, 0.0  ;;  %5834 = vmatmul.msk.bf16.gmra.mxu1 %vm531_vm0, %v7671_v14  ;;  %v946_v20 = vmax.f32 %v773_v36, 0.0 }
 0x111   : > { %v1092_v46 = vpack.c.bf16 %v993_v40, %v992_v32  ;;  %v1069_v30 = vpack.c.bf16 %v947_v22, %v946_v20  ;;  %v774_v41 = vpop.f32.mrf.mxu2  ;;  %v863_v44 = vpop.f32.mrf.mxu3  ;;  %5848 = vmatmul.msk.bf16.gmra.mxu2 %vm531_vm0, %v7615_v5  ;;  %5864 = vmatmul.msk.bf16.gmra.mxu3 %vm531_vm0, %v7615_v5 }
 0x112   : > { %v775_v43 = vadd.f32 %v774_v41, %v7665_v10 }
 0x113   : > { %v626_v56 = vpop.f32.mrf.mxu0  ;;  %v1196_v18 = vunpack.c.l.b16 %v1092_v46  ;;  %v2044_v13 = vunpack.c.h.b16 %v1092_v46  ;;  %v864_v46 = vadd.f32 %v863_v44, %v7668_v11 }
 0x114   : > { %v627_v58 = vadd.f32 %v626_v56, %v7482_v53  ;;  %v715_v59 = vpop.f32.mrf.mxu1  ;;  %v950_v51 = vmax.f32 %v775_v43, 0.0 }
 0x115   : > { %v716_v63 = vadd.f32 %v715_v59, %v7485_v54  ;;  %v951_v56 = vmax.f32 %v864_v46, 0.0  ;;  %v6061_v59 = vld [vmem:[%s9045_s3 + $0xe0] sm:$0xf] }
 0x116   : > { %v996_v0 = vmax.f32 %v627_v58, 0.0  ;;  %v2914_v58 = vunpack.c.l.b16 %v1069_v30  ;;  %v6062_v1 = vor.u32 %v6881_v60, %v6061_v59 }
 0x117   : > { %v997_v4 = vmax.f32 %v716_v63, 0.0  ;;  %v3764_v63 = vunpack.c.h.b16 %v1069_v30 }
 0x118   : > { %2175 = vmatpush.bf16.msra.mxu0 %v6062_v1 }
 0x119   : > { %v1094_v12 = vpack.c.bf16 %v997_v4, %v996_v0  ;;  %v1071_v0 = vpack.c.bf16 %v951_v56, %v950_v51 }
 0x11b   : > { %v629_v19 = vpop.f32.mrf.mxu0  ;;  %v1197_v24 = vunpack.c.l.b16 %v1094_v12  ;;  %v2045_v25 = vunpack.c.h.b16 %v1094_v12  ;;  %v777_v12 = vpop.f32.mrf.mxu2  ;;  %v2915_v36 = vunpack.c.l.b16 %v1071_v0  ;;  %v3765_v55 = vunpack.c.h.b16 %v1071_v0 }
 0x11c   : > { %v630_v26 = vadd.f32 %v629_v19, %v7482_v53  ;;  %v718_v29 = vpop.f32.mrf.mxu1 }
 0x11d   : > { %v719_v52 = vadd.f32 %v718_v29, %v7485_v54  ;;  %v7701_v32 = vpack.c.b16 %v1197_v24, %v1196_v18  ;;  %v7703_v37 = vpack.c.b16 %v2045_v25, %v2044_v13  ;;  %v866_v13 = vpop.f32.mrf.mxu3  ;;  %v7727_v19 = vpack.c.b16 %v2915_v36, %v2914_v58  ;;  %v6854_v25 = vld [vmem:[#allocation7 + $0x10] sm:$0xff] }
 0x11e   : > { %v1000_v40 = vmax.f32 %v630_v26, 0.0  ;;  %1334 = vmatmul.bf16.vlgmr.msrb.gmra.mxu0 %v7521_v23  ;;  %v7729_v20 = vpack.c.b16 %v3765_v55, %v3764_v63  ;;  %v778_v24 = vadd.f32 %v777_v12, %v7665_v10  ;;  %v867_v39 = vadd.f32 %v866_v13, %v7668_v11  ;;  %1737 = vmatpush.bf16.msrb.mxu2 %v6854_v25 }
 0x11f   : > { %v1001_v42 = vmax.f32 %v719_v52, 0.0  ;;  %1423 = vmatmul.bf16.vlgmr.msrb.gmra.mxu1 %v7521_v23  ;;  %v6880_v23 = vld [vmem:[%s9045_s3 + $0xe4] sm:$0xf] }
 0x120   : > { %v6066_v4 = vor.u32 %v6880_v23, %v6063_v2  ;;  %9074 = vst [vmem:[#allocation11_spill] sm:$0xff] %v7729_v20  ;;  %v954_v30 = vmax.f32 %v778_v24, 0.0  ;;  %v6862_v2 = vld [vmem:[#allocation7 + $0x50] sm:$0xff] }
 0x121   : > { %v1096_v50 = vpack.c.bf16 %v1001_v42, %v1000_v40  ;;  %v955_v40 = vmax.f32 %v867_v39, 0.0  ;;  %1826 = vmatpush.bf16.msrb.mxu3 %v6862_v2 }
 0x122   : > { %2264 = vmatpush.bf16.msra.mxu1 %v6066_v4 }
 0x123   : > { %v631_v57 = vpop.f32.mrf.mxu0  ;;  %v1198_v26 = vunpack.c.l.b16 %v1096_v50  ;;  %v2046_v29 = vunpack.c.h.b16 %v1096_v50  ;;  %v1073_v51 = vpack.c.bf16 %v955_v40, %v954_v30  ;;  %v779_v50 = vpop.f32.mrf.mxu2  ;;  %5849 = vmatmul.msk.bf16.gmra.mxu2 %vm531_vm0, %v7634_v34 }
 0x124   : > { %v632_v61 = vadd.f32 %v631_v57, %v7482_v53  ;;  %v720_v62 = vpop.f32.mrf.mxu1  ;;  %v780_v60 = vadd.f32 %v779_v50, %v7665_v10 }
 0x125   : > { %v721_v3 = vadd.f32 %v720_v62, %v7485_v54  ;;  %v868_v23 = vpop.f32.mrf.mxu3  ;;  %v3766_v12 = vunpack.c.h.b16 %v1073_v51  ;;  %5865 = vmatmul.msk.bf16.gmra.mxu3 %vm531_vm0, %v7634_v34 }
 0x126   : > { %v1004_v6 = vmax.f32 %v632_v61, 0.0  ;;  %v869_v61 = vadd.f32 %v868_v23, %v7668_v11  ;;  %v958_v63 = vmax.f32 %v780_v60, 0.0 }
 0x127   : > { %v1005_v18 = vmax.f32 %v721_v3, 0.0 }
 0x128   : > { %v959_v0 = vmax.f32 %v869_v61, 0.0 }
 0x129   : > { %v1098_v22 = vpack.c.bf16 %v1005_v18, %v1004_v6  ;;  %v2916_v6 = vunpack.c.l.b16 %v1073_v51 }
 0x12a   : > { %v1075_v36 = vpack.c.bf16 %v959_v0, %v958_v63 }
 0x12b   : > { %v634_v52 = vpop.f32.mrf.mxu0  ;;  %v1199_v41 = vunpack.c.l.b16 %v1098_v22  ;;  %v2047_v42 = vunpack.c.h.b16 %v1098_v22  ;;  %v782_v18 = vpop.f32.mrf.mxu2 }
 0x12c   : > { %v635_v43 = vadd.f32 %v634_v52, %v7482_v53  ;;  %v723_v44 = vpop.f32.mrf.mxu1  ;;  %v2917_v13 = vunpack.c.l.b16 %v1075_v36  ;;  %v3767_v22 = vunpack.c.h.b16 %v1075_v36  ;;  %v783_v52 = vadd.f32 %v782_v18, %v7665_v10 }
 0x12d   : > { %v724_v46 = vadd.f32 %v723_v44, %v7485_v54  ;;  %v7735_v56 = vpack.c.b16 %v1199_v41, %v1198_v26  ;;  %v7737_v57 = vpack.c.b16 %v2047_v42, %v2046_v29  ;;  %v871_v39 = vpop.f32.mrf.mxu3 }
 0x12e   : > { %v1008_v58 = vmax.f32 %v635_v43, 0.0  ;;  %1339 = vmatmul.bf16.gmra.mxu0 %v7538_v48  ;;  %v7749_v25 = vpack.c.b16 %v2917_v13, %v2916_v6  ;;  %v7751_v26 = vpack.c.b16 %v3767_v22, %v3766_v12  ;;  %v872_v30 = vadd.f32 %v871_v39, %v7668_v11 }
 0x12f   : > { %v1009_v59 = vmax.f32 %v724_v46, 0.0  ;;  %1428 = vmatmul.bf16.gmra.mxu1 %v7538_v48  ;;  %v962_v42 = vmax.f32 %v783_v52, 0.0 }
 0x130   : > { %9075 = vst [vmem:[#allocation12_spill] sm:$0xff] %v7751_v26  ;;  %v963_v43 = vmax.f32 %v872_v30, 0.0 }
 0x131   : > { %v1100_v62 = vpack.c.bf16 %v1009_v59, %v1008_v58 }
 0x132   : > { %v1077_v59 = vpack.c.bf16 %v963_v43, %v962_v42 }
 0x133   : > { %v636_v1 = vpop.f32.mrf.mxu0  ;;  %v1200_v40 = vunpack.c.l.b16 %v1100_v62  ;;  %v2048_v7 = vunpack.c.h.b16 %v1100_v62  ;;  %v784_v63 = vpop.f32.mrf.mxu2  ;;  %5850 = vmatmul.msk.bf16.gmra.mxu2 %vm531_vm0, %v7671_v14 }
 0x134   : > { %v637_v3 = vadd.f32 %v636_v1, %v7482_v53  ;;  %v725_v4 = vpop.f32.mrf.mxu1  ;;  %v785_v0 = vadd.f32 %v784_v63, %v7665_v10  ;;  %v2918_v36 = vunpack.c.l.b16 %v1077_v59  ;;  %v3768_v22 = vunpack.c.h.b16 %v1077_v59  ;;  %v6853_v59 = vld [vmem:[#allocation7 + $0x8] sm:$0xff] }
 0x135   : > { %v726_v48 = vadd.f32 %v725_v4, %v7485_v54  ;;  %v873_v1 = vpop.f32.mrf.mxu3  ;;  %1738 = vmatpush.bf16.msrb.mxu2 %v6853_v59  ;;  %5866 = vmatmul.msk.bf16.gmra.mxu3 %vm531_vm0, %v7671_v14 }
 0x136   : > { %v1012_v55 = vmax.f32 %v637_v3, 0.0  ;;  %v874_v2 = vadd.f32 %v873_v1, %v7668_v11  ;;  %v966_v4 = vmax.f32 %v785_v0, 0.0 }
 0x137   : > { %v1013_v24 = vmax.f32 %v726_v48, 0.0  ;;  %v6053_v48 = vld [vmem:[%s9045_s3 + $0xd0] sm:$0xf] }
 0x138   : > { %v967_v6 = vmax.f32 %v874_v2, 0.0 }
 0x139   : > { %v1102_v29 = vpack.c.bf16 %v1013_v24, %v1012_v55  ;;  %v6879_v55 = vld [vmem:[%s9045_s3 + $0xd4] sm:$0xf0] }
 0x13a   : > { %v1079_v24 = vpack.c.bf16 %v967_v6, %v966_v4  ;;  %v6054_v39 = vor.u32 %v6879_v55, %v6053_v48 }
 0x13b   : > { %v639_v41 = vpop.f32.mrf.mxu0  ;;  %v1201_v44 = vunpack.c.l.b16 %v1102_v29  ;;  %v2049_v46 = vunpack.c.h.b16 %v1102_v29  ;;  %v6055_v29 = vld [vmem:[%s9045_s3 + $0xd8] sm:$0xf0] }
 0x13c   : > { %v640_v51 = vadd.f32 %v639_v41, %v7482_v53  ;;  %v728_v58 = vpop.f32.mrf.mxu1  ;;  %2176 = vmatpush.bf16.msra.mxu0 %v6054_v39  ;;  %v2919_v41 = vunpack.c.l.b16 %v1079_v24  ;;  %v3769_v42 = vunpack.c.h.b16 %v1079_v24 }
 0x13d   : > { %v729_v50 = vadd.f32 %v728_v58, %v7485_v54  ;;  %v7757_v60 = vpack.c.b16 %v1201_v44, %v1200_v40  ;;  %v7759_v23 = vpack.c.b16 %v2049_v46, %v2048_v7  ;;  %v787_v7 = vpop.f32.mrf.mxu2  ;;  %v876_v44 = vpop.f32.mrf.mxu3 }
 0x13e   : > { %v1016_v61 = vmax.f32 %v640_v51, 0.0  ;;  %1344 = vmatmul.bf16.gmra.mxu0 %v7569_v16  ;;  %v7783_v46 = vpack.c.b16 %v2919_v41, %v2918_v36  ;;  %v7785_v51 = vpack.c.b16 %v3769_v42, %v3768_v22  ;;  %v877_v33 = vadd.f32 %v876_v44, %v7668_v11 }
 0x13f   : > { %v1017_v62 = vmax.f32 %v729_v50, 0.0  ;;  %1433 = vmatmul.bf16.gmra.mxu1 %v7569_v16  ;;  %v6878_v16 = vld [vmem:[%s9045_s3 + $0xd4] sm:$0xf]  ;;  %v788_v50 = vadd.f32 %v787_v7, %v7665_v10 }
 0x140   : > { %v6058_v30 = vor.u32 %v6878_v16, %v6055_v29  ;;  %9076 = vst [vmem:[#allocation13_spill] sm:$0xff] %v7785_v51  ;;  %v971_v1 = vmax.f32 %v877_v33, 0.0  ;;  %v6861_v7 = vld [vmem:[#allocation7 + $0x48] sm:$0xff] }
 0x141   : > { %v1104_v3 = vpack.c.bf16 %v1017_v62, %v1016_v61  ;;  %v970_v0 = vmax.f32 %v788_v50, 0.0  ;;  %1827 = vmatpush.bf16.msrb.mxu3 %v6861_v7 }
 0x142   : > { %2265 = vmatpush.bf16.msra.mxu1 %v6058_v30 }
 0x143   : > { %v641_v12 = vpop.f32.mrf.mxu0  ;;  %v1202_v61 = vunpack.c.l.b16 %v1104_v3  ;;  %v2050_v63 = vunpack.c.h.b16 %v1104_v3  ;;  %v7791_v48 = vpack.c.bf16 %v971_v1, %v970_v0 }
 0x144   : > { %v642_v18 = vadd.f32 %v641_v12, %v7482_v53  ;;  %v730_v13 = vpop.f32.mrf.mxu1 }
 0x145   : > { %v731_v52 = vadd.f32 %v730_v13, %v7485_v54  ;;  %v789_v3 = vpop.f32.mrf.mxu2  ;;  %v878_v24 = vpop.f32.mrf.mxu3 }
 0x146   : > { %v1020_v40 = vmax.f32 %v642_v18, 0.0  ;;  %v790_v22 = vadd.f32 %v789_v3, %v7665_v10  ;;  %v879_v39 = vadd.f32 %v878_v24, %v7668_v11 }
 0x147   : > { %v1021_v43 = vmax.f32 %v731_v52, 0.0 }
 0x148   : > { %v974_v52 = vmax.f32 %v790_v22, 0.0  ;;  %v975_v30 = vmax.f32 %v879_v39, 0.0 }
 0x149   : > { %v1106_v58 = vpack.c.bf16 %v1021_v43, %v1020_v40  ;;  %v3770_v43 = vunpack.c.h.b16 %v7791_v48 }
 0x14a   : > { %v7805_v44 = vpack.c.bf16 %v975_v30, %v974_v52 }
 0x14b   : > { %v644_v62 = vpop.f32.mrf.mxu0  ;;  %v1203_v2 = vunpack.c.l.b16 %v1106_v58  ;;  %v2051_v4 = vunpack.c.h.b16 %v1106_v58 }
 0x14c   : > { %v645_v6 = vadd.f32 %v644_v62, %v7482_v53  ;;  %v733_v12 = vpop.f32.mrf.mxu1  ;;  %v3771_v33 = vunpack.c.h.b16 %v7805_v44 }
 0x14d   : > { %v734_v36 = vadd.f32 %v733_v12, %v7485_v54  ;;  %v7793_v55 = vpack.c.b16 %v1203_v2, %v1202_v61  ;;  %v7795_v16 = vpack.c.b16 %v2051_v4, %v2050_v63  ;;  %v792_v50 = vpop.f32.mrf.mxu2  ;;  %v881_v61 = vpop.f32.mrf.mxu3 }
 0x14e   : > { %v1024_v18 = vmax.f32 %v645_v6, 0.0  ;;  %1349 = vmatmul.bf16.gmra.mxu0 %v7588_v45  ;;  %v7811_v63 = vpack.c.b16 %v3771_v33, %v3770_v43  ;;  %v793_v0 = vadd.f32 %v792_v50, %v7665_v10  ;;  %v882_v1 = vadd.f32 %v881_v61, %v7668_v11  ;;  %v6045_v33 = vld [vmem:[%s9045_s3 + $0xc0] sm:$0xf] }
 0x14f   : > { %v1025_v13 = vmax.f32 %v734_v36, 0.0  ;;  %1438 = vmatmul.bf16.gmra.mxu1 %v7588_v45 }
 0x150   : > { %9077 = vst [vmem:[#allocation14_spill] sm:$0xff] %v7811_v63  ;;  %v978_v5 = vmax.f32 %v793_v0, 0.0  ;;  %v979_v12 = vmax.f32 %v882_v1, 0.0 }
 0x151   : > { %v1108_v29 = vpack.c.bf16 %v1025_v13, %v1024_v18 }
 0x152   : > { %v7817_v24 = vpack.c.bf16 %v979_v12, %v978_v5 }
 0x153   : > { %v646_v40 = vpop.f32.mrf.mxu0  ;;  %v1204_v2 = vunpack.c.l.b16 %v1108_v29  ;;  %v2052_v4 = vunpack.c.h.b16 %v1108_v29 }
 0x154   : > { %v647_v41 = vadd.f32 %v646_v40, %v7482_v53  ;;  %v735_v42 = vpop.f32.mrf.mxu1  ;;  %v3772_v0 = vunpack.c.h.b16 %v7817_v24 }
 0x155   : > { %v736_v45 = vadd.f32 %v735_v42, %v7485_v54  ;;  %v794_v29 = vpop.f32.mrf.mxu2 }
 0x156   : > { %v1028_v58 = vmax.f32 %v647_v41, 0.0  ;;  %v795_v7 = vadd.f32 %v794_v29, %v7665_v10  ;;  %v883_v41 = vpop.f32.mrf.mxu3 }
 0x157   : > { %v1029_v59 = vmax.f32 %v736_v45, 0.0  ;;  %v884_v42 = vadd.f32 %v883_v41, %v7668_v11 }
 0x158   : > { %v982_v45 = vmax.f32 %v795_v7, 0.0  ;;  %v6852_v7 = vld [vmem:[#allocation7] sm:$0xff] }
 0x159   : > { %v1110_v62 = vpack.c.bf16 %v1029_v59, %v1028_v58  ;;  %v983_v58 = vmax.f32 %v884_v42, 0.0  ;;  %v6877_v59 = vld [vmem:[%s9045_s3 + $0xc4] sm:$0xf0]  ;;  %1739 = vmatpush.bf16.msrb.mxu2 %v6852_v7 }
 0x15b   : > { %v649_v6 = vpop.f32.mrf.mxu0  ;;  %v1205_v36 = vunpack.c.l.b16 %v1110_v62  ;;  %v2053_v18 = vunpack.c.h.b16 %v1110_v62  ;;  %v7840_v1 = vpack.c.bf16 %v983_v58, %v982_v45 }
 0x15c   : > { %v650_v3 = vadd.f32 %v649_v6, %v7482_v53  ;;  %v738_v13 = vpop.f32.mrf.mxu1 }
 0x15d   : > { %v739_v22 = vadd.f32 %v738_v13, %v7485_v54  ;;  %v7819_v39 = vpack.c.b16 %v1205_v36, %v1204_v2  ;;  %v7821_v52 = vpack.c.b16 %v2053_v18, %v2052_v4  ;;  %v6046_v2 = vor.u32 %v6877_v59, %v6045_v33  ;;  %v6047_v4 = vld [vmem:[%s9045_s3 + $0xc8] sm:$0xf0]  ;;  %v797_v36 = vpop.f32.mrf.mxu2 }
 0x15e   : > { %v1032_v30 = vmax.f32 %v650_v3, 0.0  ;;  %1354 = vmatmul.bf16.gmra.mxu0 %v7619_v28  ;;  %v3773_v18 = vunpack.c.h.b16 %v7840_v1  ;;  %v886_v13 = vpop.f32.mrf.mxu3  ;;  %v798_v29 = vadd.f32 %v797_v36, %v7665_v10 }
 0x15f   : > { %v1033_v40 = vmax.f32 %v739_v22, 0.0  ;;  %1443 = vmatmul.bf16.gmra.mxu1 %v7619_v28  ;;  %v6876_v28 = vld [vmem:[%s9045_s3 + $0xc4] sm:$0xf]  ;;  %2177 = vmatpush.bf16.msra.mxu0 %v6046_v2 }
 0x160   : > { %v6050_v5 = vor.u32 %v6876_v28, %v6047_v4  ;;  %v7849_v22 = vpack.c.b16 %v3773_v18, %v3772_v0  ;;  %v986_v45 = vmax.f32 %v798_v29, 0.0  ;;  %v6860_v29 = vld [vmem:[#allocation7 + $0x40] sm:$0xff] }
 0x161   : > { %v1112_v43 = vpack.c.bf16 %v1033_v40, %v1032_v30  ;;  %v887_v40 = vadd.f32 %v886_v13, %v7668_v11  ;;  %1828 = vmatpush.bf16.msrb.mxu3 %v6860_v29 }
 0x162   : > { %2266 = vmatpush.bf16.msra.mxu1 %v6050_v5  ;;  %9078 = vst [vmem:[#allocation15_spill] sm:$0xff] %v7849_v22 }
 0x163   : > { %v651_v50 = vpop.f32.mrf.mxu0  ;;  %v1206_v34 = vunpack.c.l.b16 %v1112_v43  ;;  %v2054_v41 = vunpack.c.h.b16 %v1112_v43  ;;  %v987_v58 = vmax.f32 %v887_v40, 0.0 }
 0x164   : > { %v652_v61 = vadd.f32 %v651_v50, %v7482_v53  ;;  %v740_v62 = vpop.f32.mrf.mxu1 }
 0x165   : > { %v741_v6 = vadd.f32 %v740_v62, %v7485_v54  ;;  %v7855_v62 = vpack.c.bf16 %v987_v58, %v986_v45  ;;  %v799_v43 = vpop.f32.mrf.mxu2 }
 0x166   : > { %v1036_v12 = vmax.f32 %v652_v61, 0.0  ;;  %v800_v5 = vadd.f32 %v799_v43, %v7665_v10 }
 0x167   : > { %v1037_v3 = vmax.f32 %v741_v6, 0.0 }
 0x169   : > { %v1114_v30 = vpack.c.bf16 %v1037_v3, %v1036_v12  ;;  %v888_v12 = vpop.f32.mrf.mxu3  ;;  %v990_v3 = vmax.f32 %v800_v5, 0.0 }
 0x16a   : > { %v889_v36 = vadd.f32 %v888_v12, %v7668_v11 }
 0x16b   : > { %v654_v42 = vpop.f32.mrf.mxu0  ;;  %v1207_v50 = vunpack.c.l.b16 %v1114_v30  ;;  %v2055_v33 = vunpack.c.h.b16 %v1114_v30 }
 0x16c   : > { %v655_v59 = vadd.f32 %v654_v42, %v7482_v53  ;;  %v743_v28 = vpop.f32.mrf.mxu1  ;;  %v991_v13 = vmax.f32 %v889_v36, 0.0 }
 0x16d   : > { %v744_v61 = vadd.f32 %v743_v28, %v7485_v54  ;;  %v7857_v0 = vpack.c.b16 %v1207_v50, %v1206_v34  ;;  %v7859_v2 = vpack.c.b16 %v2055_v33, %v2054_v41  ;;  %v3774_v34 = vunpack.c.h.b16 %v7855_v62  ;;  %v802_v45 = vpop.f32.mrf.mxu2 }
 0x16e   : > { %v1040_v4 = vmax.f32 %v655_v59, 0.0  ;;  %1359 = vmatmul.bf16.gmra.mxu0 %v7638_v47  ;;  %v7869_v41 = vpack.c.bf16 %v991_v13, %v990_v3 }
 0x16f   : > { %v1041_v6 = vmax.f32 %v744_v61, 0.0  ;;  %1448 = vmatmul.bf16.gmra.mxu1 %v7638_v47  ;;  %v803_v61 = vadd.f32 %v802_v45, %v7665_v10 }
 0x170   : > { %v3775_v58 = vunpack.c.h.b16 %v7869_v41 }
 0x171   : > { %v1116_v18 = vpack.c.bf16 %v1041_v6, %v1040_v4  ;;  %v891_v33 = vpop.f32.mrf.mxu3  ;;  %v994_v5 = vmax.f32 %v803_v61, 0.0 }
 0x172   : > { %v7875_v59 = vpack.c.b16 %v3775_v58, %v3774_v34  ;;  %v892_v4 = vadd.f32 %v891_v33, %v7668_v11  ;;  %v6875_v33 = vld [vmem:[%s9045_s3 + $0xb4] sm:$0xf0] }
 0x173   : > { %v656_v30 = vpop.f32.mrf.mxu0  ;;  %v1208_v43 = vunpack.c.l.b16 %v1116_v18  ;;  %v2056_v36 = vunpack.c.h.b16 %v1116_v18 }
 0x174   : > { %v657_v40 = vadd.f32 %v656_v30, %v7482_v53  ;;  %v745_v7 = vpop.f32.mrf.mxu1  ;;  %9079 = vst [vmem:[#allocation16_spill] sm:$0xff] %v7875_v59  ;;  %v995_v14 = vmax.f32 %v892_v4, 0.0  ;;  %v6874_v4 = vld [vmem:[%s9045_s3 + $0xb4] sm:$0xf] }
 0x175   : > { %v746_v47 = vadd.f32 %v745_v7, %v7485_v54 }
 0x176   : > { %v1044_v42 = vmax.f32 %v657_v40, 0.0  ;;  %v7881_v40 = vpack.c.bf16 %v995_v14, %v994_v5 }
 0x177   : > { %v1045_v50 = vmax.f32 %v746_v47, 0.0  ;;  %v804_v47 = vpop.f32.mrf.mxu2 }
 0x178   : > { %v805_v18 = vadd.f32 %v804_v47, %v7665_v10 }
 0x179   : > { %v1118_v28 = vpack.c.bf16 %v1045_v50, %v1044_v42  ;;  %v893_v58 = vpop.f32.mrf.mxu3  ;;  %v6037_v50 = vld [vmem:[%s9045_s3 + $0xb0] sm:$0xf] }
 0x17a   : > { %v6038_v61 = vor.u32 %v6875_v33, %v6037_v50 }
 0x17b   : > { %v659_v6 = vpop.f32.mrf.mxu0  ;;  %v1209_v12 = vunpack.c.l.b16 %v1118_v28  ;;  %v2057_v30 = vunpack.c.h.b16 %v1118_v28  ;;  %v894_v28 = vadd.f32 %v893_v58, %v7668_v11 }
 0x17c   : > { %v660_v3 = vadd.f32 %v659_v6, %v7482_v53  ;;  %v748_v13 = vpop.f32.mrf.mxu1  ;;  %v998_v6 = vmax.f32 %v805_v18, 0.0  ;;  %2178 = vmatpush.bf16.msra.mxu0 %v6038_v61 }
 0x17d   : > { %v749_v29 = vadd.f32 %v748_v13, %v7485_v54  ;;  %v7883_v7 = vpack.c.b16 %v1209_v12, %v1208_v43  ;;  %v7886_v42 = vpack.c.b16 %v2057_v30, %v2056_v36  ;;  %v999_v14 = vmax.f32 %v894_v28, 0.0 }
 0x17e   : > { %v1048_v34 = vmax.f32 %v660_v3, 0.0  ;;  %1364 = vmatmul.bf16.gmra.mxu0 %v7677_v31  ;;  %v3776_v13 = vunpack.c.h.b16 %v7881_v40 }
 0x17f   : > { %v1049_v45 = vmax.f32 %v749_v29, 0.0  ;;  %1453 = vmatmul.bf16.gmra.mxu1 %v7677_v31  ;;  %v6039_v31 = vld [vmem:[%s9045_s3 + $0xb8] sm:$0xf0]  ;;  %v7905_v30 = vpack.c.bf16 %v999_v14, %v998_v6  ;;  %v807_v58 = vpop.f32.mrf.mxu2 }
 0x180   : > { %v6042_v5 = vor.u32 %v6874_v4, %v6039_v31  ;;  %v808_v28 = vadd.f32 %v807_v58, %v7665_v10 }
 0x181   : > { %v1120_v43 = vpack.c.bf16 %v1049_v45, %v1048_v34  ;;  %v3777_v50 = vunpack.c.h.b16 %v7905_v30  ;;  %v896_v45 = vpop.f32.mrf.mxu3 }
 0x182   : > { %2267 = vmatpush.bf16.msra.mxu1 %v6042_v5  ;;  %v897_v61 = vadd.f32 %v896_v45, %v7668_v11  ;;  %v1002_v6 = vmax.f32 %v808_v28, 0.0  ;;  %v6899_v45 = vld [vmem:[#allocation7 + $0xf8] sm:$0xff] }
 0x183   : > { %v661_v12 = vpop.f32.mrf.mxu0  ;;  %v7909_v18 = vpack.c.b16 %v3777_v50, %v3776_v13  ;;  %v1210_v4 = vunpack.c.l.b16 %v1120_v43  ;;  %v2058_v31 = vunpack.c.h.b16 %v1120_v43  ;;  %2671 = vmatpush.bf16.msra.mxu3 %v6899_v45 }
 0x184   : > { %v662_v36 = vadd.f32 %v661_v12, %v7482_v53  ;;  %v750_v3 = vpop.f32.mrf.mxu1  ;;  %v1003_v14 = vmax.f32 %v897_v61, 0.0  ;;  %v6891_v12 = vld [vmem:[#allocation7 + $0xb8] sm:$0xff] }
 0x185   : > { %v751_v29 = vadd.f32 %v750_v3, %v7485_v54  ;;  %9080 = vst [vmem:[#allocation17_spill] sm:$0xff] %v7909_v18  ;;  %2582 = vmatpush.bf16.msra.mxu2 %v6891_v12 }
 0x186   : > { %v1052_v47 = vmax.f32 %v662_v36, 0.0  ;;  %v7915_v13 = vpack.c.bf16 %v1003_v14, %v1002_v6 }
 0x187   : > { %v1053_v34 = vmax.f32 %v751_v29, 0.0  ;;  %v809_v43 = vpop.f32.mrf.mxu2 }
 0x188   : > { %v3778_v14 = vunpack.c.h.b16 %v7915_v13 }
 0x189   : > { %v1122_v33 = vpack.c.bf16 %v1053_v34, %v1052_v47  ;;  %v898_v28 = vpop.f32.mrf.mxu3 }
 0x18b   : > { %v664_v5 = vpop.f32.mrf.mxu0  ;;  %v1211_v3 = vunpack.c.l.b16 %v1122_v33  ;;  %v2059_v36 = vunpack.c.h.b16 %v1122_v33  ;;  %v810_v33 = vadd.f32 %v809_v43, %v7665_v10 }
 0x18c   : > { %v665_v59 = vadd.f32 %v664_v5, %v7482_v53  ;;  %v753_v22 = vpop.f32.mrf.mxu1 }
 0x18d   : > { %v754_v29 = vadd.f32 %v753_v22, %v7485_v54  ;;  %v7917_v47 = vpack.c.b16 %v1211_v3, %v1210_v4  ;;  %v7919_v58 = vpack.c.b16 %v2059_v36, %v2058_v31  ;;  %v899_v22 = vadd.f32 %v898_v28, %v7668_v11 }
 0x18e   : > { %v1056_v50 = vmax.f32 %v665_v59, 0.0  ;;  %1369 = vmatmul.bf16.gmra.mxu0 %v7701_v32  ;;  %v1006_v5 = vmax.f32 %v810_v33, 0.0 }
 0x18f   : > { %v1057_v34 = vmax.f32 %v754_v29, 0.0  ;;  %1458 = vmatmul.bf16.gmra.mxu1 %v7701_v32  ;;  %v1007_v4 = vmax.f32 %v899_v22, 0.0  ;;  %v812_v36 = vpop.f32.mrf.mxu2 }
 0x191   : > { %v1124_v61 = vpack.c.bf16 %v1057_v34, %v1056_v50  ;;  %v7927_v12 = vpack.c.bf16 %v1007_v4, %v1006_v5  ;;  %v813_v50 = vadd.f32 %v812_v36, %v7665_v10  ;;  %v901_v34 = vpop.f32.mrf.mxu3  ;;  %v1144_v4 = vld [vmem:[#allocation5] sm:$0x3] }
 0x192   : > { %v902_v45 = vadd.f32 %v901_v34, %v7668_v11  ;;  %v7941_v51 = vperm.slane %v1144_v4, 0 }
 0x193   : > { %v666_v6 = vpop.f32.mrf.mxu0  ;;  %v3779_v29 = vunpack.c.h.b16 %v7927_v12  ;;  %v1010_v28 = vmax.f32 %v813_v50, 0.0  ;;  %v2060_v5 = vunpack.c.h.b16 %v1124_v61  ;;  %v6873_v50 = vld [vmem:[%s9045_s3 + $0xa4] sm:$0xf0] }
 0x194   : > { %v667_v31 = vadd.f32 %v666_v6, %v7482_v53  ;;  %v755_v59 = vpop.f32.mrf.mxu1  ;;  %v1011_v22 = vmax.f32 %v902_v45, 0.0  ;;  %v1212_v6 = vunpack.c.l.b16 %v1124_v61 }
 0x195   : > { %v756_v32 = vadd.f32 %v755_v59, %v7485_v54  ;;  %v7933_v33 = vpack.c.b16 %v3779_v29, %v3778_v14 }
 0x196   : > { %v1060_v3 = vmax.f32 %v667_v31, 0.0  ;;  %v7935_v63 = vpack.c.bf16 %v1011_v22, %v1010_v28 }
 0x197   : > { %v1061_v43 = vmax.f32 %v756_v32, 0.0  ;;  %9081 = vst [vmem:[#allocation18_spill] sm:$0xff] %v7933_v33  ;;  %v814_v14 = vpop.f32.mrf.mxu2 }
 0x198   : > { %v815_v61 = vadd.f32 %v814_v14, %v7665_v10 }
 0x199   : > { %v1126_v53 = vpack.c.bf16 %v1061_v43, %v1060_v3  ;;  %v7944_v3 = vperm.slane %v1144_v4, 1  ;;  %v903_v29 = vpop.f32.mrf.mxu3  ;;  %v6029_v43 = vld [vmem:[%s9045_s3 + $0xa0] sm:$0xf] }
 0x19a   : > { %v904_v34 = vadd.f32 %v903_v29, %v7668_v11  ;;  %v6030_v45 = vor.u32 %v6873_v50, %v6029_v43  ;;  %v1014_v28 = vmax.f32 %v815_v61, 0.0  ;;  %v3780_v29 = vunpack.c.h.b16 %v7935_v63 }
 0x19b   : > { %v1335_v18 = vpop.f32.mrf.mxu0  ;;  %v1213_v54 = vunpack.c.l.b16 %v1126_v53  ;;  %v2061_v31 = vunpack.c.h.b16 %v1126_v53  ;;  %v6872_v53 = vld [vmem:[%s9045_s3 + $0xa4] sm:$0xf] }
 0x19c   : > { %v1424_v59 = vpop.f32.mrf.mxu1  ;;  %2179 = vmatpush.bf16.msra.mxu0 %v6030_v45 }
 0x19d   : > { %v7937_v32 = vpack.c.b16 %v1213_v54, %v1212_v6  ;;  %v7939_v36 = vpack.c.b16 %v2061_v31, %v2060_v5  ;;  %v1336_v6 = vadd.f32 %v1335_v18, %v7941_v51  ;;  %v1015_v5 = vmax.f32 %v904_v34, 0.0 }
 0x19e   : > { %1374 = vmatmul.bf16.gmra.mxu0 %v7735_v56  ;;  %v1425_v4 = vadd.f32 %v1424_v59, %v7944_v3 }
 0x19f   : > { %1463 = vmatmul.bf16.gmra.mxu1 %v7735_v56  ;;  %v6031_v56 = vld [vmem:[%s9045_s3 + $0xa8] sm:$0xf0]  ;;  %v7965_v43 = vpack.c.bf16 %v1015_v5, %v1014_v28  ;;  %v1504_v33 = vmax.f32 %v1336_v6, 0.0 }
 0x1a0   : > { %v6034_v22 = vor.u32 %v6872_v53, %v6031_v56  ;;  %v817_v53 = vpop.f32.mrf.mxu2  ;;  %v1505_v34 = vmax.f32 %v1425_v4, 0.0 }
 0x1a1   : > { %v3781_v18 = vunpack.c.h.b16 %v7965_v43  ;;  %v818_v59 = vadd.f32 %v817_v53, %v7665_v10  ;;  %v906_v56 = vpop.f32.mrf.mxu3 }
 0x1a2   : > { %2268 = vmatpush.bf16.msra.mxu1 %v6034_v22 }
 0x1a3   : > { %v1337_v54 = vpop.f32.mrf.mxu0  ;;  %v7971_v26 = vpack.c.b16 %v3781_v18, %v3780_v29  ;;  %v1018_v28 = vmax.f32 %v818_v59, 0.0 }
 0x1a4   : > { %v1338_v31 = vadd.f32 %v1337_v54, %v7941_v51  ;;  %v1426_v14 = vpop.f32.mrf.mxu1  ;;  %v907_v54 = vadd.f32 %v906_v56, %v7668_v11 }
 0x1a5   : > { %v1427_v50 = vadd.f32 %v1426_v14, %v7944_v3  ;;  %9082 = vst [vmem:[#allocation19_spill] sm:$0xff] %v7971_v26 }
 0x1a6   : > { %v1506_v61 = vmax.f32 %v1338_v31, 0.0  ;;  %v1019_v5 = vmax.f32 %v907_v54, 0.0  ;;  %v6890_v31 = vld [vmem:[#allocation7 + $0xb0] sm:$0xff] }
 0x1a7   : > { %v1507_v45 = vmax.f32 %v1427_v50, 0.0  ;;  %2583 = vmatpush.bf16.msra.mxu2 %v6890_v31 }
 0x1a8   : > { %v1568_v22 = vpack.c.bf16 %v1506_v61, %v1504_v33  ;;  %v7973_v9 = vpack.c.bf16 %v1019_v5, %v1018_v28  ;;  %v819_v4 = vpop.f32.mrf.mxu2  ;;  %v6898_v33 = vld [vmem:[#allocation7 + $0xf0] sm:$0xff] }
 0x1a9   : > { %v1569_v20 = vpack.c.bf16 %v1507_v45, %v1505_v34  ;;  %v820_v29 = vadd.f32 %v819_v4, %v7665_v10  ;;  %v908_v50 = vpop.f32.mrf.mxu3  ;;  %2672 = vmatpush.bf16.msra.mxu3 %v6898_v33 }
 0x1aa   : > { %1740 = vmatmul.bf16.vlgmr.msrb.gmra.mxu2 %v1568_v22  ;;  %v909_v61 = vadd.f32 %v908_v50, %v7668_v11  ;;  %v3782_v22 = vunpack.c.h.b16 %v7973_v9 }
 0x1ab   : > { %1829 = vmatmul.bf16.vlgmr.msrb.gmra.mxu3 %v1569_v20  ;;  %v1340_v6 = vpop.f32.mrf.mxu0  ;;  %v1022_v53 = vmax.f32 %v820_v29, 0.0 }
 0x1ac   : > { %v1429_v14 = vpop.f32.mrf.mxu1  ;;  %v1341_v20 = vadd.f32 %v1340_v6, %v7941_v51  ;;  %v1023_v18 = vmax.f32 %v909_v61, 0.0 }
 0x1ad   : > { %v1430_v34 = vadd.f32 %v1429_v14, %v7944_v3 }
 0x1ae   : > { %1379 = vmatmul.bf16.gmra.mxu0 %v7757_v60  ;;  %v1508_v28 = vmax.f32 %v1341_v20, 0.0 }
 0x1af   : > { %1468 = vmatmul.bf16.gmra.mxu1 %v7757_v60  ;;  %v7983_v60 = vpack.c.bf16 %v1023_v18, %v1022_v53  ;;  %v1509_v33 = vmax.f32 %v1430_v34, 0.0 }
 0x1b0   : > { %v822_v31 = vpop.f32.mrf.mxu2 }
 0x1b1   : > { %9083 = vst [vmem:[#allocation20_spill] sm:$0xff] %v7983_v60  ;;  %v3783_v4 = vunpack.c.h.b16 %v7983_v60  ;;  %v823_v29 = vadd.f32 %v822_v31, %v7665_v10  ;;  %v911_v14 = vpop.f32.mrf.mxu3 }
 0x1b2   : > { %v912_v61 = vadd.f32 %v911_v14, %v7668_v11 }
 0x1b3   : > { %v1342_v45 = vpop.f32.mrf.mxu0  ;;  %v1026_v53 = vmax.f32 %v823_v29, 0.0 }
 0x1b4   : > { %v1343_v59 = vadd.f32 %v1342_v45, %v7941_v51  ;;  %v1431_v56 = vpop.f32.mrf.mxu1  ;;  %v7989_v45 = vpack.c.b16 %v3783_v4, %v3782_v22  ;;  %v1027_v18 = vmax.f32 %v912_v61, 0.0  ;;  %v6021_v22 = vld [vmem:[%s9045_s3 + $0x90] sm:$0xf]  ;;  %v6870_v4 = vld [vmem:[%s9045_s3 + $0x94] sm:$0xf] }
 0x1b5   : > { %v1432_v54 = vadd.f32 %v1431_v56, %v7944_v3 }
 0x1b6   : > { %v1510_v5 = vmax.f32 %v1343_v59, 0.0  ;;  %9084 = vst [vmem:[#allocation21_spill] sm:$0xff] %v7989_v45  ;;  %v7991_v56 = vpack.c.bf16 %v1027_v18, %v1026_v53 }
 0x1b7   : > { %v1511_v6 = vmax.f32 %v1432_v54, 0.0 }
 0x1b8   : > { %v1570_v50 = vpack.c.bf16 %v1510_v5, %v1508_v28  ;;  %9085 = vst [vmem:[#allocation22_spill] sm:$0xff] %v7991_v56  ;;  %v824_v34 = vpop.f32.mrf.mxu2 }
 0x1b9   : > { %v1571_v26 = vpack.c.bf16 %v1511_v6, %v1509_v33  ;;  %v825_v54 = vadd.f32 %v824_v34, %v7665_v10  ;;  %v913_v28 = vpop.f32.mrf.mxu3  ;;  %v3784_v34 = vunpack.c.h.b16 %v7991_v56 }
 0x1ba   : > { %1745 = vmatmul.bf16.gmra.mxu2 %v1570_v50  ;;  %v914_v5 = vadd.f32 %v913_v28, %v7668_v11 }
 0x1bb   : > { %1834 = vmatmul.bf16.gmra.mxu3 %v1571_v26  ;;  %v1345_v20 = vpop.f32.mrf.mxu0  ;;  %v6871_v26 = vld [vmem:[%s9045_s3 + $0x94] sm:$0xf0]  ;;  %v1030_v33 = vmax.f32 %v825_v54, 0.0 }
 0x1bc   : > { %v1434_v59 = vpop.f32.mrf.mxu1  ;;  %v6022_v31 = vor.u32 %v6871_v26, %v6021_v22  ;;  %v1346_v29 = vadd.f32 %v1345_v20, %v7941_v51  ;;  %v1031_v14 = vmax.f32 %v914_v5, 0.0 }
 0x1bd   : > { %v1435_v50 = vadd.f32 %v1434_v59, %v7944_v3 }
 0x1be   : > { %1384 = vmatmul.bf16.gmra.mxu0 %v7793_v55  ;;  %v8013_v28 = vpack.c.bf16 %v1031_v14, %v1030_v33  ;;  %v1512_v26 = vmax.f32 %v1346_v29, 0.0 }
 0x1bf   : > { %1473 = vmatmul.bf16.gmra.mxu1 %v7793_v55  ;;  %v6023_v55 = vld [vmem:[%s9045_s3 + $0x98] sm:$0xf0]  ;;  %2180 = vmatpush.bf16.msra.mxu0 %v6022_v31  ;;  %v1513_v5 = vmax.f32 %v1435_v50, 0.0 }
 0x1c0   : > { %v6026_v6 = vor.u32 %v6870_v4, %v6023_v55  ;;  %v827_v4 = vpop.f32.mrf.mxu2  ;;  %v3785_v20 = vunpack.c.h.b16 %v8013_v28 }
 0x1c1   : > { %v828_v59 = vadd.f32 %v827_v4, %v7665_v10  ;;  %v916_v55 = vpop.f32.mrf.mxu3 }
 0x1c2   : > { %2269 = vmatpush.bf16.msra.mxu1 %v6026_v6  ;;  %v8019_v45 = vpack.c.b16 %v3785_v20, %v3784_v34 }
 0x1c3   : > { %v1347_v61 = vpop.f32.mrf.mxu0  ;;  %v1034_v33 = vmax.f32 %v828_v59, 0.0 }
 0x1c4   : > { %v1348_v53 = vadd.f32 %v1347_v61, %v7941_v51  ;;  %v1436_v18 = vpop.f32.mrf.mxu1  ;;  %v917_v61 = vadd.f32 %v916_v55, %v7668_v11  ;;  %9086 = vst [vmem:[#allocation23_spill] sm:$0xff] %v8019_v45 }
 0x1c5   : > { %v1437_v22 = vadd.f32 %v1436_v18, %v7944_v3 }
 0x1c6   : > { %v1514_v54 = vmax.f32 %v1348_v53, 0.0  ;;  %v1035_v14 = vmax.f32 %v917_v61, 0.0  ;;  %v6889_v53 = vld [vmem:[#allocation7 + $0xa8] sm:$0xff] }
 0x1c7   : > { %v1515_v31 = vmax.f32 %v1437_v22, 0.0  ;;  %2584 = vmatpush.bf16.msra.mxu2 %v6889_v53  ;;  %v6897_v22 = vld [vmem:[#allocation7 + $0xe8] sm:$0xff] }
 0x1c8   : > { %v1572_v6 = vpack.c.bf16 %v1514_v54, %v1512_v26  ;;  %v8021_v60 = vpack.c.bf16 %v1035_v14, %v1034_v33  ;;  %v829_v50 = vpop.f32.mrf.mxu2  ;;  %2673 = vmatpush.bf16.msra.mxu3 %v6897_v22 }
 0x1c9   : > { %v1573_v56 = vpack.c.bf16 %v1515_v31, %v1513_v5  ;;  %v830_v34 = vadd.f32 %v829_v50, %v7665_v10  ;;  %v918_v26 = vpop.f32.mrf.mxu3 }
 0x1ca   : > { %1750 = vmatmul.bf16.gmra.mxu2 %v1572_v6  ;;  %v919_v54 = vadd.f32 %v918_v26, %v7668_v11  ;;  %v3786_v6 = vunpack.c.h.b16 %v8021_v60 }
 0x1cb   : > { %1839 = vmatmul.bf16.gmra.mxu3 %v1573_v56  ;;  %v1350_v29 = vpop.f32.mrf.mxu0  ;;  %v1038_v4 = vmax.f32 %v830_v34, 0.0 }
 0x1cc   : > { %v1439_v18 = vpop.f32.mrf.mxu1  ;;  %v1351_v56 = vadd.f32 %v1350_v29, %v7941_v51  ;;  %v1039_v20 = vmax.f32 %v919_v54, 0.0 }
 0x1cd   : > { %v1440_v5 = vadd.f32 %v1439_v18, %v7944_v3 }
 0x1ce   : > { %1389 = vmatmul.bf16.gmra.mxu0 %v7819_v39  ;;  %v1516_v33 = vmax.f32 %v1351_v56, 0.0 }
 0x1cf   : > { %1478 = vmatmul.bf16.gmra.mxu1 %v7819_v39  ;;  %v8031_v39 = vpack.c.bf16 %v1039_v20, %v1038_v4  ;;  %v1517_v22 = vmax.f32 %v1440_v5, 0.0 }
 0x1d0   : > { %v832_v53 = vpop.f32.mrf.mxu2 }
 0x1d1   : > { %9087 = vst [vmem:[#allocation24_spill] sm:$0xff] %v8031_v39  ;;  %v3787_v50 = vunpack.c.h.b16 %v8031_v39  ;;  %v833_v34 = vadd.f32 %v832_v53, %v7665_v10  ;;  %v921_v18 = vpop.f32.mrf.mxu3 }
 0x1d2   : > { %v922_v54 = vadd.f32 %v921_v18, %v7668_v11 }
 0x1d3   : > { %v1352_v31 = vpop.f32.mrf.mxu0  ;;  %v1042_v4 = vmax.f32 %v833_v34, 0.0 }
 0x1d4   : > { %v1353_v59 = vadd.f32 %v1352_v31, %v7941_v51  ;;  %v1441_v55 = vpop.f32.mrf.mxu1  ;;  %v8037_v31 = vpack.c.b16 %v3787_v50, %v3786_v6  ;;  %v1043_v20 = vmax.f32 %v922_v54, 0.0  ;;  %v6013_v6 = vld [vmem:[%s9045_s3 + $0x80] sm:$0xf]  ;;  %v6868_v50 = vld [vmem:[%s9045_s3 + $0x84] sm:$0xf] }
 0x1d5   : > { %v1442_v61 = vadd.f32 %v1441_v55, %v7944_v3 }
 0x1d6   : > { %v1518_v14 = vmax.f32 %v1353_v59, 0.0  ;;  %9088 = vst [vmem:[#allocation25_spill] sm:$0xff] %v8037_v31  ;;  %v8039_v55 = vpack.c.bf16 %v1043_v20, %v1042_v4 }
 0x1d7   : > { %v1519_v29 = vmax.f32 %v1442_v61, 0.0 }
 0x1d8   : > { %v1574_v26 = vpack.c.bf16 %v1518_v14, %v1516_v33  ;;  %9089 = vst [vmem:[#allocation26_spill] sm:$0xff] %v8039_v55  ;;  %v834_v5 = vpop.f32.mrf.mxu2 }
 0x1d9   : > { %v1575_v45 = vpack.c.bf16 %v1519_v29, %v1517_v22  ;;  %v835_v61 = vadd.f32 %v834_v5, %v7665_v10  ;;  %v923_v33 = vpop.f32.mrf.mxu3  ;;  %v3788_v5 = vunpack.c.h.b16 %v8039_v55 }
 0x1da   : > { %1755 = vmatmul.bf16.gmra.mxu2 %v1574_v26  ;;  %v924_v14 = vadd.f32 %v923_v33, %v7668_v11 }
 0x1db   : > { %1844 = vmatmul.bf16.gmra.mxu3 %v1575_v45  ;;  %v1355_v56 = vpop.f32.mrf.mxu0  ;;  %v6869_v45 = vld [vmem:[%s9045_s3 + $0x84] sm:$0xf0]  ;;  %v1046_v22 = vmax.f32 %v835_v61, 0.0 }
 0x1dc   : > { %v1444_v59 = vpop.f32.mrf.mxu1  ;;  %v6014_v53 = vor.u32 %v6869_v45, %v6013_v6  ;;  %v1356_v34 = vadd.f32 %v1355_v56, %v7941_v51  ;;  %v1047_v18 = vmax.f32 %v924_v14, 0.0 }
 0x1dd   : > { %v1445_v26 = vadd.f32 %v1444_v59, %v7944_v3 }
 0x1de   : > { %1394 = vmatmul.bf16.gmra.mxu0 %v7857_v0  ;;  %v8061_v33 = vpack.c.bf16 %v1047_v18, %v1046_v22  ;;  %v1520_v45 = vmax.f32 %v1356_v34, 0.0 }
 0x1df   : > { %1483 = vmatmul.bf16.gmra.mxu1 %v7857_v0  ;;  %v6015_v0 = vld [vmem:[%s9045_s3 + $0x88] sm:$0xf0]  ;;  %2181 = vmatpush.bf16.msra.mxu0 %v6014_v53  ;;  %v1521_v14 = vmax.f32 %v1445_v26, 0.0 }
 0x1e0   : > { %v6018_v29 = vor.u32 %v6868_v50, %v6015_v0  ;;  %v837_v50 = vpop.f32.mrf.mxu2  ;;  %v3789_v56 = vunpack.c.h.b16 %v8061_v33 }
 0x1e1   : > { %v838_v59 = vadd.f32 %v837_v50, %v7665_v10  ;;  %v926_v0 = vpop.f32.mrf.mxu3 }
 0x1e2   : > { %2270 = vmatpush.bf16.msra.mxu1 %v6018_v29  ;;  %v8067_v31 = vpack.c.b16 %v3789_v56, %v3788_v5 }
 0x1e3   : > { %v1357_v54 = vpop.f32.mrf.mxu0  ;;  %v1050_v22 = vmax.f32 %v838_v59, 0.0 }
 0x1e4   : > { %v1358_v4 = vadd.f32 %v1357_v54, %v7941_v51  ;;  %v1446_v20 = vpop.f32.mrf.mxu1  ;;  %v927_v54 = vadd.f32 %v926_v0, %v7668_v11  ;;  %9090 = vst [vmem:[#allocation27_spill] sm:$0xff] %v8067_v31 }
 0x1e5   : > { %v1447_v6 = vadd.f32 %v1446_v20, %v7944_v3 }
 0x1e6   : > { %v1522_v61 = vmax.f32 %v1358_v4, 0.0  ;;  %v1051_v18 = vmax.f32 %v927_v54, 0.0  ;;  %v6888_v4 = vld [vmem:[#allocation7 + $0xa0] sm:$0xff] }
 0x1e7   : > { %v1523_v53 = vmax.f32 %v1447_v6, 0.0  ;;  %2585 = vmatpush.bf16.msra.mxu2 %v6888_v4  ;;  %v6896_v6 = vld [vmem:[#allocation7 + $0xe0] sm:$0xff] }
 0x1e8   : > { %v1576_v29 = vpack.c.bf16 %v1522_v61, %v1520_v45  ;;  %v8069_v39 = vpack.c.bf16 %v1051_v18, %v1050_v22  ;;  %v839_v26 = vpop.f32.mrf.mxu2  ;;  %2674 = vmatpush.bf16.msra.mxu3 %v6896_v6 }
 0x1e9   : > { %v1577_v55 = vpack.c.bf16 %v1523_v53, %v1521_v14  ;;  %v840_v5 = vadd.f32 %v839_v26, %v7665_v10  ;;  %v928_v45 = vpop.f32.mrf.mxu3 }
 0x1ea   : > { %1760 = vmatmul.bf16.gmra.mxu2 %v1576_v29  ;;  %v929_v61 = vadd.f32 %v928_v45, %v7668_v11  ;;  %v3790_v29 = vunpack.c.h.b16 %v8069_v39 }
 0x1eb   : > { %1849 = vmatmul.bf16.gmra.mxu3 %v1577_v55  ;;  %v1360_v34 = vpop.f32.mrf.mxu0  ;;  %v1054_v50 = vmax.f32 %v840_v5, 0.0 }
 0x1ec   : > { %v1449_v20 = vpop.f32.mrf.mxu1  ;;  %v1361_v55 = vadd.f32 %v1360_v34, %v7941_v51  ;;  %v1055_v56 = vmax.f32 %v929_v61, 0.0 }
 0x1ed   : > { %v1450_v14 = vadd.f32 %v1449_v20, %v7944_v3 }
 0x1ee   : > { %1399 = vmatmul.bf16.gmra.mxu0 %v7883_v7  ;;  %v1524_v22 = vmax.f32 %v1361_v55, 0.0 }
 0x1ef   : > { %1488 = vmatmul.bf16.gmra.mxu1 %v7883_v7  ;;  %v8079_v7 = vpack.c.bf16 %v1055_v56, %v1054_v50  ;;  %v1525_v6 = vmax.f32 %v1450_v14, 0.0 }
 0x1f0   : > { %v842_v4 = vpop.f32.mrf.mxu2 }
 0x1f1   : > { %v3791_v26 = vunpack.c.h.b16 %v8079_v7  ;;  %v843_v5 = vadd.f32 %v842_v4, %v7665_v10  ;;  %v931_v20 = vpop.f32.mrf.mxu3 }
 0x1f2   : > { %v932_v61 = vadd.f32 %v931_v20, %v7668_v11 }
 0x1f3   : > { %v1362_v53 = vpop.f32.mrf.mxu0  ;;  %v1058_v50 = vmax.f32 %v843_v5, 0.0 }
 0x1f4   : > { %v1363_v59 = vadd.f32 %v1362_v53, %v7941_v51  ;;  %v1451_v0 = vpop.f32.mrf.mxu1  ;;  %v8085_v53 = vpack.c.b16 %v3791_v26, %v3790_v29  ;;  %v1059_v56 = vmax.f32 %v932_v61, 0.0  ;;  %v6214_v29 = vld [vmem:[%s9045_s3 + $0x170] sm:$0xf]  ;;  %v6914_v26 = vld [vmem:[%s9045_s3 + $0x174] sm:$0xf] }
 0x1f5   : > { %v1452_v54 = vadd.f32 %v1451_v0, %v7944_v3 }
 0x1f6   : > { %v1526_v18 = vmax.f32 %v1363_v59, 0.0  ;;  %v8087_v0 = vpack.c.bf16 %v1059_v56, %v1058_v50 }
 0x1f7   : > { %v1527_v34 = vmax.f32 %v1452_v54, 0.0 }
 0x1f8   : > { %v1578_v45 = vpack.c.bf16 %v1526_v18, %v1524_v22  ;;  %v844_v14 = vpop.f32.mrf.mxu2  ;;  %v3792_v50 = vunpack.c.h.b16 %v8087_v0 }
 0x1f9   : > { %v1579_v31 = vpack.c.bf16 %v1527_v34, %v1525_v6  ;;  %v845_v54 = vadd.f32 %v844_v14, %v7665_v10  ;;  %v933_v22 = vpop.f32.mrf.mxu3  ;;  %v6216_v10 = vld [vmem:[%s9045_s3 + $0x178] sm:$0xf0] }
 0x1fa   : > { %1765 = vmatmul.bf16.gmra.mxu2 %v1578_v45  ;;  %v934_v18 = vadd.f32 %v933_v22, %v7668_v11  ;;  %v6219_v6 = vor.u32 %v6914_v26, %v6216_v10  ;;  %v6887_v10 = vld [vmem:[#allocation7 + $0x98] sm:$0xff] }
 0x1fb   : > { %1854 = vmatmul.bf16.gmra.mxu3 %v1579_v31  ;;  %v1365_v55 = vpop.f32.mrf.mxu0  ;;  %v6915_v31 = vld [vmem:[%s9045_s3 + $0x174] sm:$0xf0]  ;;  %2586 = vmatpush.bf16.msra.mxu2 %v6887_v10 }
 0x1fc   : > { %v1454_v59 = vpop.f32.mrf.mxu1  ;;  %v6215_v4 = vor.u32 %v6915_v31, %v6214_v29  ;;  %v1366_v34 = vadd.f32 %v1365_v55, %v7941_v51  ;;  %v1063_v5 = vmax.f32 %v934_v18, 0.0  ;;  %3145 = vmatpush.bf16.msrb.mxu1 %v6219_v6 }
 0x1fd   : > { %v1455_v20 = vadd.f32 %v1454_v59, %v7944_v3 }
 0x1fe   : > { %1404 = vmatmul.bf16.gmra.mxu0 %v7917_v47  ;;  %v1528_v22 = vmax.f32 %v1366_v34, 0.0 }
 0x1ff   : > { %1493 = vmatmul.bf16.gmra.mxu1 %v7917_v47  ;;  %v1062_v47 = vmax.f32 %v845_v54, 0.0  ;;  %3056 = vmatpush.bf16.msrb.mxu0 %v6215_v4  ;;  %v1529_v55 = vmax.f32 %v1455_v20, 0.0 }
 0x201   : > { %v8109_v56 = vpack.c.bf16 %v1063_v5, %v1062_v47  ;;  %v6895_v47 = vld [vmem:[#allocation7 + $0xd8] sm:$0xff] }
 0x202   : > { %2675 = vmatpush.bf16.msra.mxu3 %v6895_v47 }
 0x203   : > { %v1367_v45 = vpop.f32.mrf.mxu0  ;;  %v3793_v29 = vunpack.c.h.b16 %v8109_v56 }
 0x204   : > { %v1368_v11 = vadd.f32 %v1367_v45, %v7941_v51  ;;  %v1456_v61 = vpop.f32.mrf.mxu1 }
 0x205   : > { %v1457_v14 = vadd.f32 %v1456_v61, %v7944_v3  ;;  %v8113_v4 = vpack.c.b16 %v3793_v29, %v3792_v50 }
 0x206   : > { %v1530_v54 = vmax.f32 %v1368_v11, 0.0 }
 0x207   : > { %v1531_v31 = vmax.f32 %v1457_v14, 0.0 }
 0x208   : > { %v1580_v18 = vpack.c.bf16 %v1530_v54, %v1528_v22 }
 0x209   : > { %v1581_v59 = vpack.c.bf16 %v1531_v31, %v1529_v55 }
 0x20a   : > { %1770 = vmatmul.bf16.gmra.mxu2 %v1580_v18 }
 0x20b   : > { %1859 = vmatmul.bf16.gmra.mxu3 %v1581_v59  ;;  %v1370_v26 = vpop.f32.mrf.mxu0 }
 0x20c   : > { %v1459_v6 = vpop.f32.mrf.mxu1  ;;  %v1371_v34 = vadd.f32 %v1370_v26, %v7941_v51 }
 0x20d   : > { %v1460_v5 = vadd.f32 %v1459_v6, %v7944_v3 }
 0x20e   : > { %1409 = vmatmul.bf16.gmra.mxu0 %v7937_v32  ;;  %v1532_v50 = vmax.f32 %v1371_v34, 0.0 }
 0x20f   : > { %1498 = vmatmul.bf16.gmra.mxu1 %v7937_v32  ;;  %v1533_v22 = vmax.f32 %v1460_v5, 0.0 }
 0x213   : > { %v1372_v20 = vpop.f32.mrf.mxu0 }
 0x214   : > { %v1373_v45 = vadd.f32 %v1372_v20, %v7941_v51  ;;  %v1461_v11 = vpop.f32.mrf.mxu1  ;;  %v6206_v20 = vld [vmem:[%s9045_s3 + $0x160] sm:$0xf] }
 0x215   : > { %v1462_v61 = vadd.f32 %v1461_v11, %v7944_v3 }
 0x216   : > { %v1534_v14 = vmax.f32 %v1373_v45, 0.0 }
 0x217   : > { %v1535_v54 = vmax.f32 %v1462_v61, 0.0 }
 0x218   : > { %v1582_v29 = vpack.c.bf16 %v1534_v14, %v1532_v50  ;;  %v6912_v50 = vld [vmem:[%s9045_s3 + $0x164] sm:$0xf]  ;;  %v6208_v14 = vld [vmem:[%s9045_s3 + $0x168] sm:$0xf0] }
 0x219   : > { %v1583_v55 = vpack.c.bf16 %v1535_v54, %v1533_v22  ;;  %v6211_v54 = vor.u32 %v6912_v50, %v6208_v14 }
 0x21a   : > { %1775 = vmatmul.bf16.gmra.mxu2 %v1582_v29 }
 0x21b   : > { %1864 = vmatmul.bf16.gmra.mxu3 %v1583_v55  ;;  %v1375_v32 = vpop.f32.mrf.mxu0  ;;  %v8142_v55 = vld [vmem:[%s9048_s6] ss:$0 sm:$0xff]  ;;  %3146 = vmatpush.bf16.msrb.mxu1 %v6211_v54 }
 0x21c   : > { %v1464_v31 = vpop.f32.mrf.mxu1  ;;  %v1376_v18 = vadd.f32 %v1375_v32, %v7941_v51 }
 0x21d   : > { %v1465_v59 = vadd.f32 %v1464_v31, %v7944_v3 }
 0x21e   : > { %2182 = vmatmul.bf16.vlgmr.msra.gmra.mxu0 %v7518_v21  ;;  %v1536_v34 = vmax.f32 %v1376_v18, 0.0 }
 0x21f   : > { %2271 = vmatmul.bf16.vlgmr.msra.gmra.mxu1 %v7518_v21  ;;  %v6913_v21 = vld [vmem:[%s9045_s3 + $0x164] sm:$0xf0]  ;;  %v1537_v45 = vmax.f32 %v1465_v59, 0.0 }
 0x220   : > { %v6207_v61 = vor.u32 %v6913_v21, %v6206_v20 }
 0x222   : > { %3057 = vmatpush.bf16.msrb.mxu0 %v6207_v61 }
 0x223   : > { %v1377_v26 = vpop.f32.mrf.mxu0 }
 0x224   : > { %v1378_v10 = vadd.f32 %v1377_v26, %v7941_v51  ;;  %v1466_v6 = vpop.f32.mrf.mxu1 }
 0x225   : > { %v1467_v47 = vadd.f32 %v1466_v6, %v7944_v3  ;;  %v6894_v6 = vld [vmem:[#allocation7 + $0xd0] sm:$0xff] }
 0x226   : > { %v1538_v5 = vmax.f32 %v1378_v10, 0.0  ;;  %v6886_v10 = vld [vmem:[#allocation7 + $0x90] sm:$0xff]  ;;  %2676 = vmatpush.bf16.msra.mxu3 %v6894_v6 }
 0x227   : > { %v1539_v11 = vmax.f32 %v1467_v47, 0.0  ;;  %2587 = vmatpush.bf16.msra.mxu2 %v6886_v10 }
 0x228   : > { %v1584_v22 = vpack.c.bf16 %v1538_v5, %v1536_v34 }
 0x229   : > { %v1585_v29 = vpack.c.bf16 %v1539_v11, %v1537_v45 }
 0x22a   : > { %1780 = vmatmul.bf16.gmra.mxu2 %v1584_v22 }
 0x22b   : > { %1869 = vmatmul.bf16.gmra.mxu3 %v1585_v29  ;;  %v1380_v32 = vpop.f32.mrf.mxu0 }
 0x22c   : > { %v1469_v31 = vpop.f32.mrf.mxu1  ;;  %v1381_v34 = vadd.f32 %v1380_v32, %v7941_v51 }
 0x22d   : > { %v1741_v18 = vpop.f32.mrf.mxu2  ;;  %v1470_v20 = vadd.f32 %v1469_v31, %v7944_v3 }
 0x22e   : > { %v1742_v59 = vadd.f32 %v8142_v55, %v1741_v18  ;;  %v1830_v26 = vpop.f32.mrf.mxu3  ;;  %2187 = vmatmul.bf16.gmra.mxu0 %v7540_v27  ;;  %v1540_v22 = vmax.f32 %v1381_v34, 0.0 }
 0x22f   : > { %2276 = vmatmul.bf16.gmra.mxu1 %v7540_v27  ;;  %v1541_v18 = vmax.f32 %v1470_v20, 0.0 }
 0x230   : > { %v1831_v47 = vadd.f32 %v1830_v26, %v1742_v59 }
 0x232   : > { %v1910_v5 = vmax.f32 %v1831_v47, 0.0 }
 0x233   : > { %v1382_v21 = vpop.f32.mrf.mxu0 }
 0x234   : > { %v1942_v45 = vpack.c.bf16 %v1910_v5, %v1910_v5  ;;  %v1383_v11 = vadd.f32 %v1382_v21, %v7941_v51  ;;  %v1471_v61 = vpop.f32.mrf.mxu1 }
 0x235   : > { %v1472_v50 = vadd.f32 %v1471_v61, %v7944_v3  ;;  %v1743_v14 = vpop.f32.mrf.mxu2 }
 0x236   : > { %1974 = vst [vmem:[#allocation2] sm:$0xf] %v1942_v45  ;;  %v1542_v27 = vmax.f32 %v1383_v11, 0.0  ;;  %v1744_v54 = vadd.f32 %v8142_v55, %v1743_v14  ;;  %v1832_v29 = vpop.f32.mrf.mxu3 }
 0x237   : > { %v1543_v59 = vmax.f32 %v1472_v50, 0.0 }
 0x238   : > { %v1833_v32 = vadd.f32 %v1832_v29, %v1744_v54  ;;  %v1586_v26 = vpack.c.bf16 %v1542_v27, %v1540_v22 }
 0x239   : > { %v1587_v10 = vpack.c.bf16 %v1543_v59, %v1541_v18 }
 0x23a   : > { %v1911_v31 = vmax.f32 %v1833_v32, 0.0  ;;  %1785 = vmatmul.bf16.gmra.mxu2 %v1586_v26 }
 0x23b   : > { %1874 = vmatmul.bf16.gmra.mxu3 %v1587_v10  ;;  %v1385_v6 = vpop.f32.mrf.mxu0  ;;  %v6198_v10 = vld [vmem:[%s9045_s3 + $0x150] sm:$0xf] }
 0x23c   : > { %v1943_v47 = vpack.c.bf16 %v1911_v31, %v1911_v31  ;;  %v1474_v5 = vpop.f32.mrf.mxu1  ;;  %v1386_v11 = vadd.f32 %v1385_v6, %v7941_v51 }
 0x23d   : > { %v1746_v21 = vpop.f32.mrf.mxu2  ;;  %v1475_v50 = vadd.f32 %v1474_v5, %v7944_v3  ;;  %v6910_v5 = vld [vmem:[%s9045_s3 + $0x154] sm:$0xf] }
 0x23e   : > { %1975 = vst [vmem:[#allocation2 + $0x10] sm:$0xf] %v1943_v47  ;;  %v1747_v34 = vadd.f32 %v8142_v55, %v1746_v21  ;;  %v1835_v45 = vpop.f32.mrf.mxu3  ;;  %2192 = vmatmul.bf16.gmra.mxu0 %v7571_v17  ;;  %v1544_v59 = vmax.f32 %v1386_v11, 0.0  ;;  %v6911_v47 = vld [vmem:[%s9045_s3 + $0x154] sm:$0xf0] }
 0x23f   : > { %2281 = vmatmul.bf16.gmra.mxu1 %v7571_v17  ;;  %v1545_v31 = vmax.f32 %v1475_v50, 0.0 }
 0x240   : > { %v1836_v20 = vadd.f32 %v1835_v45, %v1747_v34  ;;  %v6199_v45 = vor.u32 %v6911_v47, %v6198_v10 }
 0x242   : > { %v1912_v61 = vmax.f32 %v1836_v20, 0.0  ;;  %v6200_v20 = vld [vmem:[%s9045_s3 + $0x158] sm:$0xf0]  ;;  %3058 = vmatpush.bf16.msrb.mxu0 %v6199_v45 }
 0x243   : > { %v1387_v14 = vpop.f32.mrf.mxu0 }
 0x244   : > { %v1944_v22 = vpack.c.bf16 %v1912_v61, %v1912_v61  ;;  %v1388_v27 = vadd.f32 %v1387_v14, %v7941_v51  ;;  %v1476_v54 = vpop.f32.mrf.mxu1  ;;  %v6203_v61 = vor.u32 %v6910_v5, %v6200_v20 }
 0x245   : > { %v1477_v29 = vadd.f32 %v1476_v54, %v7944_v3  ;;  %v1748_v18 = vpop.f32.mrf.mxu2 }
 0x246   : > { %1976 = vst [vmem:[#allocation2 + $0x20] sm:$0xf] %v1944_v22  ;;  %v1546_v32 = vmax.f32 %v1388_v27, 0.0  ;;  %v1749_v26 = vadd.f32 %v8142_v55, %v1748_v18  ;;  %v1837_v17 = vpop.f32.mrf.mxu3  ;;  %3147 = vmatpush.bf16.msrb.mxu1 %v6203_v61 }
 0x247   : > { %v1547_v6 = vmax.f32 %v1477_v29, 0.0 }
 0x248   : > { %v1838_v21 = vadd.f32 %v1837_v17, %v1749_v26  ;;  %v1588_v34 = vpack.c.bf16 %v1546_v32, %v1544_v59  ;;  %v6885_v59 = vld [vmem:[#allocation7 + $0x88] sm:$0xff] }
 0x249   : > { %v1589_v11 = vpack.c.bf16 %v1547_v6, %v1545_v31  ;;  %v6893_v32 = vld [vmem:[#allocation7 + $0xc8] sm:$0xff]  ;;  %2588 = vmatpush.bf16.msra.mxu2 %v6885_v59 }
 0x24a   : > { %v1913_v14 = vmax.f32 %v1838_v21, 0.0  ;;  %1790 = vmatmul.bf16.gmra.mxu2 %v1588_v34  ;;  %2677 = vmatpush.bf16.msra.mxu3 %v6893_v32 }
 0x24b   : > { %1879 = vmatmul.bf16.gmra.mxu3 %v1589_v11  ;;  %v1390_v50 = vpop.f32.mrf.mxu0 }
 0x24c   : > { %v1945_v22 = vpack.c.bf16 %v1913_v14, %v1913_v14  ;;  %v1479_v27 = vpop.f32.mrf.mxu1  ;;  %v1391_v17 = vadd.f32 %v1390_v50, %v7941_v51 }
 0x24d   : > { %v1751_v54 = vpop.f32.mrf.mxu2  ;;  %v1480_v31 = vadd.f32 %v1479_v27, %v7944_v3 }
 0x24e   : > { %1977 = vst [vmem:[#allocation2 + $0x30] sm:$0xf] %v1945_v22  ;;  %v1752_v29 = vadd.f32 %v8142_v55, %v1751_v54  ;;  %v1840_v18 = vpop.f32.mrf.mxu3  ;;  %2197 = vmatmul.bf16.gmra.mxu0 %v7590_v35  ;;  %v1548_v20 = vmax.f32 %v1391_v17, 0.0 }
 0x24f   : > { %2286 = vmatmul.bf16.gmra.mxu1 %v7590_v35  ;;  %v1549_v14 = vmax.f32 %v1480_v31, 0.0 }
 0x250   : > { %v1841_v26 = vadd.f32 %v1840_v18, %v1752_v29 }
 0x252   : > { %v1914_v10 = vmax.f32 %v1841_v26, 0.0 }
 0x253   : > { %v1392_v6 = vpop.f32.mrf.mxu0 }
 0x254   : > { %v1946_v47 = vpack.c.bf16 %v1914_v10, %v1914_v10  ;;  %v1393_v5 = vadd.f32 %v1392_v6, %v7941_v51  ;;  %v1481_v21 = vpop.f32.mrf.mxu1 }
 0x255   : > { %v1482_v34 = vadd.f32 %v1481_v21, %v7944_v3  ;;  %v1753_v45 = vpop.f32.mrf.mxu2 }
 0x256   : > { %1978 = vst [vmem:[#allocation2 + $0x40] sm:$0xf] %v1946_v47  ;;  %v1550_v35 = vmax.f32 %v1393_v5, 0.0  ;;  %v1754_v11 = vadd.f32 %v8142_v55, %v1753_v45  ;;  %v1842_v61 = vpop.f32.mrf.mxu3 }
 0x257   : > { %v1551_v22 = vmax.f32 %v1482_v34, 0.0 }
 0x258   : > { %v1843_v50 = vadd.f32 %v1842_v61, %v1754_v11  ;;  %v1590_v54 = vpack.c.bf16 %v1550_v35, %v1548_v20 }
 0x259   : > { %v1591_v29 = vpack.c.bf16 %v1551_v22, %v1549_v14 }
 0x25a   : > { %v1915_v27 = vmax.f32 %v1843_v50, 0.0  ;;  %1795 = vmatmul.bf16.gmra.mxu2 %v1590_v54  ;;  %v6190_v50 = vld [vmem:[%s9045_s3 + $0x140] sm:$0xf] }
 0x25b   : > { %1884 = vmatmul.bf16.gmra.mxu3 %v1591_v29  ;;  %v1395_v18 = vpop.f32.mrf.mxu0 }
 0x25c   : > { %v1947_v59 = vpack.c.bf16 %v1915_v27, %v1915_v27  ;;  %v1484_v32 = vpop.f32.mrf.mxu1  ;;  %v1396_v6 = vadd.f32 %v1395_v18, %v7941_v51  ;;  %v6909_v27 = vld [vmem:[%s9045_s3 + $0x144] sm:$0xf0]  ;;  %v6908_v18 = vld [vmem:[%s9045_s3 + $0x144] sm:$0xf] }
 0x25d   : > { %v1756_v26 = vpop.f32.mrf.mxu2  ;;  %v1485_v5 = vadd.f32 %v1484_v32, %v7944_v3 }
 0x25e   : > { %1979 = vst [vmem:[#allocation2 + $0x50] sm:$0xf] %v1947_v59  ;;  %v1757_v17 = vadd.f32 %v8142_v55, %v1756_v26  ;;  %v1845_v10 = vpop.f32.mrf.mxu3  ;;  %2202 = vmatmul.bf16.gmra.mxu0 %v7621_v15  ;;  %v1552_v61 = vmax.f32 %v1396_v6, 0.0  ;;  %v6191_v26 = vor.u32 %v6909_v27, %v6190_v50 }
 0x25f   : > { %2291 = vmatmul.bf16.gmra.mxu1 %v7621_v15  ;;  %v1553_v54 = vmax.f32 %v1485_v5, 0.0 }
 0x260   : > { %v1846_v31 = vadd.f32 %v1845_v10, %v1757_v17  ;;  %v6192_v17 = vld [vmem:[%s9045_s3 + $0x148] sm:$0xf0]  ;;  %3059 = vmatpush.bf16.msrb.mxu0 %v6191_v26 }
 0x262   : > { %v1916_v47 = vmax.f32 %v1846_v31, 0.0  ;;  %v6195_v31 = vor.u32 %v6908_v18, %v6192_v17 }
 0x263   : > { %v1397_v21 = vpop.f32.mrf.mxu0 }
 0x264   : > { %v1948_v34 = vpack.c.bf16 %v1916_v47, %v1916_v47  ;;  %v1398_v45 = vadd.f32 %v1397_v21, %v7941_v51  ;;  %v1486_v20 = vpop.f32.mrf.mxu1  ;;  %3148 = vmatpush.bf16.msrb.mxu1 %v6195_v31 }
 0x265   : > { %v1487_v35 = vadd.f32 %v1486_v20, %v7944_v3  ;;  %v1758_v11 = vpop.f32.mrf.mxu2 }
 0x266   : > { %1980 = vst [vmem:[#allocation2 + $0x60] sm:$0xf] %v1948_v34  ;;  %v1554_v14 = vmax.f32 %v1398_v45, 0.0  ;;  %v1759_v22 = vadd.f32 %v8142_v55, %v1758_v11  ;;  %v1847_v15 = vpop.f32.mrf.mxu3  ;;  %v6892_v11 = vld [vmem:[#allocation7 + $0xc0] sm:$0xff] }
 0x267   : > { %v1555_v29 = vmax.f32 %v1487_v35, 0.0  ;;  %v6884_v35 = vld [vmem:[#allocation7 + $0x80] sm:$0xff]  ;;  %2678 = vmatpush.bf16.msra.mxu3 %v6892_v11 }
 0x268   : > { %v1848_v59 = vadd.f32 %v1847_v15, %v1759_v22  ;;  %v1592_v32 = vpack.c.bf16 %v1554_v14, %v1552_v61  ;;  %2589 = vmatpush.bf16.msra.mxu2 %v6884_v35 }
 0x269   : > { %v1593_v10 = vpack.c.bf16 %v1555_v29, %v1553_v54 }
 0x26a   : > { %v1917_v6 = vmax.f32 %v1848_v59, 0.0  ;;  %1800 = vmatmul.bf16.gmra.mxu2 %v1592_v32 }
 0x26b   : > { %1889 = vmatmul.bf16.gmra.mxu3 %v1593_v10  ;;  %v1400_v47 = vpop.f32.mrf.mxu0 }
 0x26c   : > { %v1949_v5 = vpack.c.bf16 %v1917_v6, %v1917_v6  ;;  %v1489_v21 = vpop.f32.mrf.mxu1  ;;  %v1401_v14 = vadd.f32 %v1400_v47, %v7941_v51 }
 0x26d   : > { %v1761_v34 = vpop.f32.mrf.mxu2  ;;  %v1490_v15 = vadd.f32 %v1489_v21, %v7944_v3 }
 0x26e   : > { %1981 = vst [vmem:[#allocation2 + $0x70] sm:$0xf] %v1949_v5  ;;  %v1762_v45 = vadd.f32 %v8142_v55, %v1761_v34  ;;  %v1850_v20 = vpop.f32.mrf.mxu3  ;;  %2207 = vmatmul.bf16.gmra.mxu0 %v7640_v49  ;;  %v1556_v32 = vmax.f32 %v1401_v14, 0.0 }
 0x26f   : > { %2296 = vmatmul.bf16.gmra.mxu1 %v7640_v49  ;;  %v1557_v10 = vmax.f32 %v1490_v15, 0.0 }
 0x270   : > { %v1851_v61 = vadd.f32 %v1850_v20, %v1762_v45 }
 0x272   : > { %v1918_v22 = vmax.f32 %v1851_v61, 0.0 }
 0x273   : > { %v1402_v50 = vpop.f32.mrf.mxu0 }
 0x274   : > { %v1950_v54 = vpack.c.bf16 %v1918_v22, %v1918_v22  ;;  %v1403_v29 = vadd.f32 %v1402_v50, %v7941_v51  ;;  %v1491_v27 = vpop.f32.mrf.mxu1 }
 0x275   : > { %v1492_v18 = vadd.f32 %v1491_v27, %v7944_v3  ;;  %v1763_v59 = vpop.f32.mrf.mxu2 }
 0x276   : > { %1982 = vst [vmem:[#allocation2 + $0x80] sm:$0xf] %v1950_v54  ;;  %v1558_v49 = vmax.f32 %v1403_v29, 0.0  ;;  %v1764_v26 = vadd.f32 %v8142_v55, %v1763_v59  ;;  %v1852_v17 = vpop.f32.mrf.mxu3 }
 0x277   : > { %v1559_v31 = vmax.f32 %v1492_v18, 0.0 }
 0x278   : > { %v1853_v6 = vadd.f32 %v1852_v17, %v1764_v26  ;;  %v1594_v47 = vpack.c.bf16 %v1558_v49, %v1556_v32 }
 0x279   : > { %v1595_v5 = vpack.c.bf16 %v1559_v31, %v1557_v10  ;;  %v6182_v10 = vld [vmem:[%s9045_s3 + $0x130] sm:$0xf] }
 0x27a   : > { %v1919_v21 = vmax.f32 %v1853_v6, 0.0  ;;  %1805 = vmatmul.bf16.gmra.mxu2 %v1594_v47  ;;  %v6907_v47 = vld [vmem:[%s9045_s3 + $0x134] sm:$0xf0] }
 0x27b   : > { %1894 = vmatmul.bf16.gmra.mxu3 %v1595_v5  ;;  %v1405_v34 = vpop.f32.mrf.mxu0  ;;  %v6906_v5 = vld [vmem:[%s9045_s3 + $0x134] sm:$0xf] }
 0x27c   : > { %v1951_v45 = vpack.c.bf16 %v1919_v21, %v1919_v21  ;;  %v1494_v20 = vpop.f32.mrf.mxu1  ;;  %v1406_v22 = vadd.f32 %v1405_v34, %v7941_v51 }
 0x27d   : > { %v1766_v35 = vpop.f32.mrf.mxu2  ;;  %v1495_v50 = vadd.f32 %v1494_v20, %v7944_v3  ;;  %v6184_v20 = vld [vmem:[%s9045_s3 + $0x138] sm:$0xf0] }
 0x27e   : > { %1983 = vst [vmem:[#allocation2 + $0x90] sm:$0xf] %v1951_v45  ;;  %v1767_v11 = vadd.f32 %v8142_v55, %v1766_v35  ;;  %v1855_v61 = vpop.f32.mrf.mxu3  ;;  %2212 = vmatmul.bf16.gmra.mxu0 %v7681_v38  ;;  %v1560_v49 = vmax.f32 %v1406_v22, 0.0  ;;  %v6183_v45 = vor.u32 %v6907_v47, %v6182_v10 }
 0x27f   : > { %2301 = vmatmul.bf16.gmra.mxu1 %v7681_v38  ;;  %v1561_v31 = vmax.f32 %v1495_v50, 0.0 }
 0x280   : > { %v1856_v14 = vadd.f32 %v1855_v61, %v1767_v11  ;;  %v6187_v11 = vor.u32 %v6906_v5, %v6184_v20  ;;  %3060 = vmatpush.bf16.msrb.mxu0 %v6183_v45 }
 0x282   : > { %v1920_v15 = vmax.f32 %v1856_v14, 0.0  ;;  %3149 = vmatpush.bf16.msrb.mxu1 %v6187_v11 }
 0x283   : > { %v1407_v54 = vpop.f32.mrf.mxu0 }
 0x284   : > { %v1952_v29 = vpack.c.bf16 %v1920_v15, %v1920_v15  ;;  %v1408_v27 = vadd.f32 %v1407_v54, %v7941_v51  ;;  %v1496_v18 = vpop.f32.mrf.mxu1 }
 0x285   : > { %v1497_v59 = vadd.f32 %v1496_v18, %v7944_v3  ;;  %v1768_v32 = vpop.f32.mrf.mxu2  ;;  %v6931_v18 = vld [vmem:[#allocation7 + $0x178] sm:$0xff] }
 0x286   : > { %1984 = vst [vmem:[#allocation2 + $0xa0] sm:$0xf] %v1952_v29  ;;  %v1562_v26 = vmax.f32 %v1408_v27, 0.0  ;;  %v1769_v17 = vadd.f32 %v8142_v55, %v1768_v32  ;;  %v1857_v38 = vpop.f32.mrf.mxu3  ;;  %v6923_v27 = vld [vmem:[#allocation7 + $0x138] sm:$0xff]  ;;  %3553 = vmatpush.bf16.msrb.mxu3 %v6931_v18 }
 0x287   : > { %v1563_v6 = vmax.f32 %v1497_v59, 0.0  ;;  %3464 = vmatpush.bf16.msrb.mxu2 %v6923_v27 }
 0x288   : > { %v1858_v21 = vadd.f32 %v1857_v38, %v1769_v17  ;;  %v1596_v34 = vpack.c.bf16 %v1562_v26, %v1560_v49 }
 0x289   : > { %v1597_v35 = vpack.c.bf16 %v1563_v6, %v1561_v31 }
 0x28a   : > { %v1921_v61 = vmax.f32 %v1858_v21, 0.0  ;;  %1810 = vmatmul.bf16.gmra.mxu2 %v1596_v34 }
 0x28b   : > { %1899 = vmatmul.bf16.gmra.mxu3 %v1597_v35  ;;  %v1410_v14 = vpop.f32.mrf.mxu0 }
 0x28c   : > { %v1953_v22 = vpack.c.bf16 %v1921_v61, %v1921_v61  ;;  %v1499_v15 = vpop.f32.mrf.mxu1  ;;  %v1411_v32 = vadd.f32 %v1410_v14, %v7941_v51 }
 0x28d   : > { %v1771_v50 = vpop.f32.mrf.mxu2  ;;  %v1500_v26 = vadd.f32 %v1499_v15, %v7944_v3 }
 0x28e   : > { %1985 = vst [vmem:[#allocation2 + $0xb0] sm:$0xf] %v1953_v22  ;;  %v1772_v54 = vadd.f32 %v8142_v55, %v1771_v50  ;;  %v1860_v29 = vpop.f32.mrf.mxu3  ;;  %2217 = vmatmul.bf16.gmra.mxu0 %v7703_v37  ;;  %v1564_v5 = vmax.f32 %v1411_v32, 0.0  ;;  %v2024_v22 = vld [vmem:[#allocation5 + $0x2] sm:$0x3] }
 0x28f   : > { %2306 = vmatmul.bf16.gmra.mxu1 %v7703_v37  ;;  %v1565_v45 = vmax.f32 %v1500_v26, 0.0  ;;  %v8240_v18 = vperm.slane %v2024_v22, 1 }
 0x290   : > { %v1861_v59 = vadd.f32 %v1860_v29, %v1772_v54  ;;  %v8236_v54 = vperm.slane %v2024_v22, 0 }
 0x292   : > { %v1922_v49 = vmax.f32 %v1861_v59, 0.0 }
 0x293   : > { %v1412_v17 = vpop.f32.mrf.mxu0 }
 0x294   : > { %v1954_v38 = vpack.c.bf16 %v1922_v49, %v1922_v49  ;;  %v1413_v10 = vadd.f32 %v1412_v17, %v7941_v51  ;;  %v1501_v31 = vpop.f32.mrf.mxu1 }
 0x295   : > { %v1502_v6 = vadd.f32 %v1501_v31, %v7944_v3  ;;  %v1773_v47 = vpop.f32.mrf.mxu2 }
 0x296   : > { %1986 = vst [vmem:[#allocation2 + $0xc0] sm:$0xf] %v1954_v38  ;;  %v1566_v37 = vmax.f32 %v1413_v10, 0.0  ;;  %v1774_v21 = vadd.f32 %v8142_v55, %v1773_v47  ;;  %v1862_v34 = vpop.f32.mrf.mxu3 }
 0x297   : > { %v1567_v20 = vmax.f32 %v1502_v6, 0.0 }
 0x298   : > { %v1863_v35 = vadd.f32 %v1862_v34, %v1774_v21  ;;  %v1598_v11 = vpack.c.bf16 %v1566_v37, %v1564_v5  ;;  %v6174_v34 = vld [vmem:[%s9045_s3 + $0x120] sm:$0xf] }
 0x299   : > { %v1599_v61 = vpack.c.bf16 %v1567_v20, %v1565_v45 }
 0x29a   : > { %v1923_v14 = vmax.f32 %v1863_v35, 0.0  ;;  %1815 = vmatmul.bf16.gmra.mxu2 %v1598_v11  ;;  %v6905_v35 = vld [vmem:[%s9045_s3 + $0x124] sm:$0xf0]  ;;  %v6904_v11 = vld [vmem:[%s9045_s3 + $0x124] sm:$0xf] }
 0x29b   : > { %1904 = vmatmul.bf16.gmra.mxu3 %v1599_v61  ;;  %v2183_v51 = vpop.f32.mrf.mxu0  ;;  %v6175_v22 = vor.u32 %v6905_v35, %v6174_v34 }
 0x29c   : > { %v1955_v15 = vpack.c.bf16 %v1923_v14, %v1923_v14  ;;  %v2272_v50 = vpop.f32.mrf.mxu1  ;;  %v2184_v32 = vadd.f32 %v2183_v51, %v8236_v54  ;;  %v6176_v51 = vld [vmem:[%s9045_s3 + $0x128] sm:$0xf0] }
 0x29d   : > { %v1776_v3 = vpop.f32.mrf.mxu2  ;;  %v2273_v26 = vadd.f32 %v2272_v50, %v8240_v18  ;;  %v6179_v50 = vor.u32 %v6904_v11, %v6176_v51  ;;  %3061 = vmatpush.bf16.msrb.mxu0 %v6175_v22 }
 0x29e   : > { %1987 = vst [vmem:[#allocation2 + $0xd0] sm:$0xf] %v1955_v15  ;;  %v1777_v29 = vadd.f32 %v8142_v55, %v1776_v3  ;;  %v1865_v27 = vpop.f32.mrf.mxu3  ;;  %2222 = vmatmul.bf16.gmra.mxu0 %v7737_v57  ;;  %v2352_v5 = vmax.f32 %v2184_v32, 0.0 }
 0x29f   : > { %2311 = vmatmul.bf16.gmra.mxu1 %v7737_v57  ;;  %v2353_v45 = vmax.f32 %v2273_v26, 0.0 }
 0x2a0   : > { %v1866_v59 = vadd.f32 %v1865_v27, %v1777_v29  ;;  %3150 = vmatpush.bf16.msrb.mxu1 %v6179_v50 }
 0x2a2   : > { %v1924_v49 = vmax.f32 %v1866_v59, 0.0 }
 0x2a3   : > { %v2185_v17 = vpop.f32.mrf.mxu0 }
 0x2a4   : > { %v1956_v38 = vpack.c.bf16 %v1924_v49, %v1924_v49  ;;  %v2186_v10 = vadd.f32 %v2185_v17, %v8236_v54  ;;  %v2274_v31 = vpop.f32.mrf.mxu1  ;;  %v6922_v17 = vld [vmem:[#allocation7 + $0x130] sm:$0xff] }
 0x2a5   : > { %v2275_v6 = vadd.f32 %v2274_v31, %v8240_v18  ;;  %v1778_v47 = vpop.f32.mrf.mxu2  ;;  %3465 = vmatpush.bf16.msrb.mxu2 %v6922_v17 }
 0x2a6   : > { %1988 = vst [vmem:[#allocation2 + $0xe0] sm:$0xf] %v1956_v38  ;;  %v2354_v37 = vmax.f32 %v2186_v10, 0.0  ;;  %v1779_v21 = vadd.f32 %v8142_v55, %v1778_v47  ;;  %v1867_v57 = vpop.f32.mrf.mxu3  ;;  %v6930_v38 = vld [vmem:[#allocation7 + $0x170] sm:$0xff] }
 0x2a7   : > { %v2355_v20 = vmax.f32 %v2275_v6, 0.0  ;;  %3554 = vmatpush.bf16.msrb.mxu3 %v6930_v38 }
 0x2a8   : > { %v2416_v61 = vpack.c.bf16 %v2354_v37, %v2352_v5  ;;  %v1868_v14 = vadd.f32 %v1867_v57, %v1779_v21 }
 0x2a9   : > { %v2417_v15 = vpack.c.bf16 %v2355_v20, %v2353_v45 }
 0x2aa   : > { %v1925_v3 = vmax.f32 %v1868_v14, 0.0  ;;  %2590 = vmatmul.bf16.vlgmr.msra.gmra.mxu2 %v2416_v61 }
 0x2ab   : > { %2679 = vmatmul.bf16.vlgmr.msra.gmra.mxu3 %v2417_v15  ;;  %v2188_v29 = vpop.f32.mrf.mxu0 }
 0x2ac   : > { %v1957_v27 = vpack.c.bf16 %v1925_v3, %v1925_v3  ;;  %v2277_v59 = vpop.f32.mrf.mxu1  ;;  %v2189_v31 = vadd.f32 %v2188_v29, %v8236_v54 }
 0x2ad   : > { %v1781_v32 = vpop.f32.mrf.mxu2  ;;  %v2278_v47 = vadd.f32 %v2277_v59, %v8240_v18 }
 0x2ae   : > { %1989 = vst [vmem:[#allocation2 + $0xf0] sm:$0xf] %v1957_v27  ;;  %v1782_v49 = vadd.f32 %v8142_v55, %v1781_v32  ;;  %v1870_v26 = vpop.f32.mrf.mxu3  ;;  %2227 = vmatmul.bf16.gmra.mxu0 %v7759_v23  ;;  %v2356_v20 = vmax.f32 %v2189_v31, 0.0 }
 0x2af   : > { %2316 = vmatmul.bf16.gmra.mxu1 %v7759_v23  ;;  %v2357_v61 = vmax.f32 %v2278_v47, 0.0 }
 0x2b0   : > { %v1871_v10 = vadd.f32 %v1870_v26, %v1782_v49 }
 0x2b2   : > { %v1926_v6 = vmax.f32 %v1871_v10, 0.0 }
 0x2b3   : > { %v2190_v5 = vpop.f32.mrf.mxu0 }
 0x2b4   : > { %v1958_v37 = vpack.c.bf16 %v1926_v6, %v1926_v6  ;;  %v2191_v21 = vadd.f32 %v2190_v5, %v8236_v54  ;;  %v2279_v57 = vpop.f32.mrf.mxu1 }
 0x2b5   : > { %v2280_v34 = vadd.f32 %v2279_v57, %v8240_v18  ;;  %v1783_v45 = vpop.f32.mrf.mxu2 }
 0x2b6   : > { %1990 = vst [vmem:[#allocation2 + $0x100] sm:$0xf] %v1958_v37  ;;  %v2358_v23 = vmax.f32 %v2191_v21, 0.0  ;;  %v1784_v35 = vadd.f32 %v8142_v55, %v1783_v45  ;;  %v1872_v11 = vpop.f32.mrf.mxu3 }
 0x2b7   : > { %v2359_v14 = vmax.f32 %v2280_v34, 0.0 }
 0x2b8   : > { %v1873_v22 = vadd.f32 %v1872_v11, %v1784_v35  ;;  %v2418_v51 = vpack.c.bf16 %v2358_v23, %v2356_v20  ;;  %v6166_v20 = vld [vmem:[%s9045_s3 + $0x110] sm:$0xf]  ;;  %v6903_v11 = vld [vmem:[%s9045_s3 + $0x114] sm:$0xf0] }
 0x2b9   : > { %v2419_v15 = vpack.c.bf16 %v2359_v14, %v2357_v61  ;;  %v6902_v61 = vld [vmem:[%s9045_s3 + $0x114] sm:$0xf] }
 0x2ba   : > { %v1927_v50 = vmax.f32 %v1873_v22, 0.0  ;;  %2595 = vmatmul.bf16.gmra.mxu2 %v2418_v51  ;;  %v6167_v51 = vor.u32 %v6903_v11, %v6166_v20 }
 0x2bb   : > { %2684 = vmatmul.bf16.gmra.mxu3 %v2419_v15  ;;  %v2193_v3 = vpop.f32.mrf.mxu0  ;;  %v6168_v15 = vld [vmem:[%s9045_s3 + $0x118] sm:$0xf0] }
 0x2bc   : > { %v1959_v29 = vpack.c.bf16 %v1927_v50, %v1927_v50  ;;  %v2282_v27 = vpop.f32.mrf.mxu1  ;;  %v2194_v17 = vadd.f32 %v2193_v3, %v8236_v54  ;;  %v6171_v3 = vor.u32 %v6902_v61, %v6168_v15  ;;  %3062 = vmatpush.bf16.msrb.mxu0 %v6167_v51 }
 0x2bd   : > { %v1786_v59 = vpop.f32.mrf.mxu2  ;;  %v2283_v10 = vadd.f32 %v2282_v27, %v8240_v18 }
 0x2be   : > { %1991 = vst [vmem:[#allocation2 + $0x110] sm:$0xf] %v1959_v29  ;;  %v1787_v32 = vadd.f32 %v8142_v55, %v1786_v59  ;;  %v1875_v49 = vpop.f32.mrf.mxu3  ;;  %2232 = vmatmul.bf16.gmra.mxu0 %v7795_v16  ;;  %v2360_v57 = vmax.f32 %v2194_v17, 0.0  ;;  %3151 = vmatpush.bf16.msrb.mxu1 %v6171_v3 }
 0x2bf   : > { %2321 = vmatmul.bf16.gmra.mxu1 %v7795_v16  ;;  %v2361_v23 = vmax.f32 %v2283_v10, 0.0  ;;  %v6929_v10 = vld [vmem:[#allocation7 + $0x168] sm:$0xff] }
 0x2c0   : > { %v1876_v26 = vadd.f32 %v1875_v49, %v1787_v32  ;;  %3555 = vmatpush.bf16.msrb.mxu3 %v6929_v10 }
 0x2c2   : > { %v1928_v38 = vmax.f32 %v1876_v26, 0.0 }
 0x2c3   : > { %v2195_v31 = vpop.f32.mrf.mxu0 }
 0x2c4   : > { %v1960_v6 = vpack.c.bf16 %v1928_v38, %v1928_v38  ;;  %v2196_v47 = vadd.f32 %v2195_v31, %v8236_v54  ;;  %v2284_v5 = vpop.f32.mrf.mxu1  ;;  %v6921_v38 = vld [vmem:[#allocation7 + $0x128] sm:$0xff] }
 0x2c5   : > { %v2285_v37 = vadd.f32 %v2284_v5, %v8240_v18  ;;  %v1788_v21 = vpop.f32.mrf.mxu2  ;;  %3466 = vmatpush.bf16.msrb.mxu2 %v6921_v38 }
 0x2c6   : > { %1992 = vst [vmem:[#allocation2 + $0x120] sm:$0xf] %v1960_v6  ;;  %v2362_v34 = vmax.f32 %v2196_v47, 0.0  ;;  %v1789_v45 = vadd.f32 %v8142_v55, %v1788_v21  ;;  %v1877_v16 = vpop.f32.mrf.mxu3 }
 0x2c7   : > { %v2363_v35 = vmax.f32 %v2285_v37, 0.0 }
 0x2c8   : > { %v1878_v14 = vadd.f32 %v1877_v16, %v1789_v45  ;;  %v2420_v22 = vpack.c.bf16 %v2362_v34, %v2360_v57 }
 0x2c9   : > { %v2421_v50 = vpack.c.bf16 %v2363_v35, %v2361_v23 }
 0x2ca   : > { %v1929_v29 = vmax.f32 %v1878_v14, 0.0  ;;  %2600 = vmatmul.bf16.gmra.mxu2 %v2420_v22 }
 0x2cb   : > { %2689 = vmatmul.bf16.gmra.mxu3 %v2421_v50  ;;  %v2198_v27 = vpop.f32.mrf.mxu0 }
 0x2cc   : > { %v1961_v59 = vpack.c.bf16 %v1929_v29, %v1929_v29  ;;  %v2287_v32 = vpop.f32.mrf.mxu1  ;;  %v2199_v6 = vadd.f32 %v2198_v27, %v8236_v54 }
 0x2cd   : > { %v1791_v49 = vpop.f32.mrf.mxu2  ;;  %v2288_v5 = vadd.f32 %v2287_v32, %v8240_v18 }
 0x2ce   : > { %1993 = vst [vmem:[#allocation2 + $0x130] sm:$0xf] %v1961_v59  ;;  %v1792_v26 = vadd.f32 %v8142_v55, %v1791_v49  ;;  %v1880_v17 = vpop.f32.mrf.mxu3  ;;  %2237 = vmatmul.bf16.gmra.mxu0 %v7821_v52  ;;  %v2364_v20 = vmax.f32 %v2199_v6, 0.0 }
 0x2cf   : > { %2326 = vmatmul.bf16.gmra.mxu1 %v7821_v52  ;;  %v2365_v11 = vmax.f32 %v2288_v5, 0.0 }
 0x2d0   : > { %v1881_v31 = vadd.f32 %v1880_v17, %v1792_v26 }
 0x2d2   : > { %v1930_v47 = vmax.f32 %v1881_v31, 0.0 }
 0x2d3   : > { %v2200_v37 = vpop.f32.mrf.mxu0 }
 0x2d4   : > { %v1962_v21 = vpack.c.bf16 %v1930_v47, %v1930_v47  ;;  %v2201_v57 = vadd.f32 %v2200_v37, %v8236_v54  ;;  %v2289_v34 = vpop.f32.mrf.mxu1 }
 0x2d5   : > { %v2290_v45 = vadd.f32 %v2289_v34, %v8240_v18  ;;  %v1793_v16 = vpop.f32.mrf.mxu2 }
 0x2d6   : > { %1994 = vst [vmem:[#allocation2 + $0x140] sm:$0xf] %v1962_v21  ;;  %v2366_v52 = vmax.f32 %v2201_v57, 0.0  ;;  %v1794_v23 = vadd.f32 %v8142_v55, %v1793_v16  ;;  %v1882_v35 = vpop.f32.mrf.mxu3 }
 0x2d7   : > { %v2367_v61 = vmax.f32 %v2290_v45, 0.0  ;;  %v6158_v45 = vld [vmem:[%s9045_s3 + $0x100] sm:$0xf] }
 0x2d8   : > { %v1883_v14 = vadd.f32 %v1882_v35, %v1794_v23  ;;  %v2422_v22 = vpack.c.bf16 %v2366_v52, %v2364_v20  ;;  %v6901_v52 = vld [vmem:[%s9045_s3 + $0x104] sm:$0xf0]  ;;  %v6900_v23 = vld [vmem:[%s9045_s3 + $0x104] sm:$0xf] }
 0x2d9   : > { %v2423_v51 = vpack.c.bf16 %v2367_v61, %v2365_v11  ;;  %v6159_v61 = vor.u32 %v6901_v52, %v6158_v45 }
 0x2da   : > { %v1931_v15 = vmax.f32 %v1883_v14, 0.0  ;;  %2605 = vmatmul.bf16.gmra.mxu2 %v2422_v22  ;;  %v6160_v14 = vld [vmem:[%s9045_s3 + $0x108] sm:$0xf0] }
 0x2db   : > { %2694 = vmatmul.bf16.gmra.mxu3 %v2423_v51  ;;  %v2203_v50 = vpop.f32.mrf.mxu0  ;;  %v6163_v51 = vor.u32 %v6900_v23, %v6160_v14  ;;  %3063 = vmatpush.bf16.msrb.mxu0 %v6159_v61 }
 0x2dc   : > { %v1963_v3 = vpack.c.bf16 %v1931_v15, %v1931_v15  ;;  %v2292_v29 = vpop.f32.mrf.mxu1  ;;  %v2204_v26 = vadd.f32 %v2203_v50, %v8236_v54 }
 0x2dd   : > { %v1796_v27 = vpop.f32.mrf.mxu2  ;;  %v2293_v38 = vadd.f32 %v2292_v29, %v8240_v18  ;;  %3152 = vmatpush.bf16.msrb.mxu1 %v6163_v51 }
 0x2de   : > { %1995 = vst [vmem:[#allocation2 + $0x150] sm:$0xf] %v1963_v3  ;;  %v1797_v59 = vadd.f32 %v8142_v55, %v1796_v27  ;;  %v1885_v32 = vpop.f32.mrf.mxu3  ;;  %2242 = vmatmul.bf16.gmra.mxu0 %v7859_v2  ;;  %v2368_v21 = vmax.f32 %v2204_v26, 0.0  ;;  %v6928_v26 = vld [vmem:[#allocation7 + $0x160] sm:$0xff] }
 0x2df   : > { %2331 = vmatmul.bf16.gmra.mxu1 %v7859_v2  ;;  %v2369_v16 = vmax.f32 %v2293_v38, 0.0  ;;  %3556 = vmatpush.bf16.msrb.mxu3 %v6928_v26 }
 0x2e0   : > { %v1886_v49 = vadd.f32 %v1885_v32, %v1797_v59 }
 0x2e2   : > { %v1932_v17 = vmax.f32 %v1886_v49, 0.0  ;;  %v6920_v49 = vld [vmem:[#allocation7 + $0x120] sm:$0xff] }
 0x2e3   : > { %v2205_v10 = vpop.f32.mrf.mxu0  ;;  %3467 = vmatpush.bf16.msrb.mxu2 %v6920_v49 }
 0x2e4   : > { %v1964_v31 = vpack.c.bf16 %v1932_v17, %v1932_v17  ;;  %v2206_v6 = vadd.f32 %v2205_v10, %v8236_v54  ;;  %v2294_v47 = vpop.f32.mrf.mxu1 }
 0x2e5   : > { %v2295_v5 = vadd.f32 %v2294_v47, %v8240_v18  ;;  %v1798_v37 = vpop.f32.mrf.mxu2 }
 0x2e6   : > { %1996 = vst [vmem:[#allocation2 + $0x160] sm:$0xf] %v1964_v31  ;;  %v2370_v57 = vmax.f32 %v2206_v6, 0.0  ;;  %v1799_v34 = vadd.f32 %v8142_v55, %v1798_v37  ;;  %v1887_v2 = vpop.f32.mrf.mxu3 }
 0x2e7   : > { %v2371_v20 = vmax.f32 %v2295_v5, 0.0 }
 0x2e8   : > { %v1888_v35 = vadd.f32 %v1887_v2, %v1799_v34  ;;  %v2424_v11 = vpack.c.bf16 %v2370_v57, %v2368_v21 }
 0x2e9   : > { %v2425_v22 = vpack.c.bf16 %v2371_v20, %v2369_v16 }
 0x2ea   : > { %v1933_v15 = vmax.f32 %v1888_v35, 0.0  ;;  %2610 = vmatmul.bf16.gmra.mxu2 %v2424_v11 }
 0x2eb   : > { %2699 = vmatmul.bf16.gmra.mxu3 %v2425_v22  ;;  %v2208_v50 = vpop.f32.mrf.mxu0 }
 0x2ec   : > { %v1965_v3 = vpack.c.bf16 %v1933_v15, %v1933_v15  ;;  %v2297_v29 = vpop.f32.mrf.mxu1  ;;  %v2209_v38 = vadd.f32 %v2208_v50, %v8236_v54 }
 0x2ed   : > { %v1801_v27 = vpop.f32.mrf.mxu2  ;;  %v2298_v31 = vadd.f32 %v2297_v29, %v8240_v18 }
 0x2ee   : > { %1997 = vst [vmem:[#allocation2 + $0x170] sm:$0xf] %v1965_v3  ;;  %v1802_v59 = vadd.f32 %v8142_v55, %v1801_v27  ;;  %v1890_v32 = vpop.f32.mrf.mxu3  ;;  %2247 = vmatmul.bf16.gmra.mxu0 %v7886_v42  ;;  %v2372_v34 = vmax.f32 %v2209_v38, 0.0 }
 0x2ef   : > { %2336 = vmatmul.bf16.gmra.mxu1 %v7886_v42  ;;  %v2373_v16 = vmax.f32 %v2298_v31, 0.0 }
 0x2f0   : > { %v1891_v17 = vadd.f32 %v1890_v32, %v1802_v59 }
 0x2f2   : > { %v1934_v10 = vmax.f32 %v1891_v17, 0.0 }
 0x2f3   : > { %v2210_v6 = vpop.f32.mrf.mxu0 }
 0x2f4   : > { %v1966_v47 = vpack.c.bf16 %v1934_v10, %v1934_v10  ;;  %v2211_v5 = vadd.f32 %v2210_v6, %v8236_v54  ;;  %v2299_v37 = vpop.f32.mrf.mxu1 }
 0x2f5   : > { %v2300_v21 = vadd.f32 %v2299_v37, %v8240_v18  ;;  %v1803_v57 = vpop.f32.mrf.mxu2 }
 0x2f6   : > { %1998 = vst [vmem:[#allocation2 + $0x180] sm:$0xf] %v1966_v47  ;;  %v2374_v42 = vmax.f32 %v2211_v5, 0.0  ;;  %v1804_v2 = vadd.f32 %v8142_v55, %v1803_v57  ;;  %v1892_v45 = vpop.f32.mrf.mxu3  ;;  %v6359_v5 = vld [vmem:[%s9045_s3 + $0x1f0] sm:$0xf] }
 0x2f7   : > { %v2375_v20 = vmax.f32 %v2300_v21, 0.0  ;;  %v6947_v57 = vld [vmem:[%s9045_s3 + $0x1f4] sm:$0xf0] }
 0x2f8   : > { %v1893_v52 = vadd.f32 %v1892_v45, %v1804_v2  ;;  %v2426_v23 = vpack.c.bf16 %v2374_v42, %v2372_v34  ;;  %v6946_v34 = vld [vmem:[%s9045_s3 + $0x1f4] sm:$0xf]  ;;  %v6360_v45 = vor.u32 %v6947_v57, %v6359_v5 }
 0x2f9   : > { %v2427_v35 = vpack.c.bf16 %v2375_v20, %v2373_v16  ;;  %v6361_v16 = vld [vmem:[%s9045_s3 + $0x1f8] sm:$0xf0] }
 0x2fa   : > { %v1935_v11 = vmax.f32 %v1893_v52, 0.0  ;;  %2615 = vmatmul.bf16.gmra.mxu2 %v2426_v23  ;;  %v6364_v52 = vor.u32 %v6946_v34, %v6361_v16  ;;  %3906 = vmatpush.bf16.msra.mxu0 %v6360_v45 }
 0x2fb   : > { %2704 = vmatmul.bf16.gmra.mxu3 %v2427_v35  ;;  %v2213_v61 = vpop.f32.mrf.mxu0 }
 0x2fc   : > { %v1967_v14 = vpack.c.bf16 %v1935_v11, %v1935_v11  ;;  %v2302_v22 = vpop.f32.mrf.mxu1  ;;  %v2214_v29 = vadd.f32 %v2213_v61, %v8236_v54  ;;  %3995 = vmatpush.bf16.msra.mxu1 %v6364_v52 }
 0x2fd   : > { %v1806_v51 = vpop.f32.mrf.mxu2  ;;  %v2303_v59 = vadd.f32 %v2302_v22, %v8240_v18 }
 0x2fe   : > { %1999 = vst [vmem:[#allocation2 + $0x190] sm:$0xf] %v1967_v14  ;;  %v1807_v15 = vadd.f32 %v8142_v55, %v1806_v51  ;;  %v1895_v50 = vpop.f32.mrf.mxu3  ;;  %2252 = vmatmul.bf16.gmra.mxu0 %v7919_v58  ;;  %v2376_v55 = vmax.f32 %v2214_v29, 0.0 }
 0x2ff   : > { %2341 = vmatmul.bf16.gmra.mxu1 %v7919_v58  ;;  %v8334_v58 = vld [vmem:[%s9048_s6] ss:$0 sm:$0xff]  ;;  %v2377_v37 = vmax.f32 %v2303_v59, 0.0 }
 0x300   : > { %v1896_v3 = vadd.f32 %v1895_v50, %v1807_v15  ;;  %v6919_v15 = vld [vmem:[#allocation7 + $0x118] sm:$0xff] }
 0x301   : > { %v6927_v50 = vld [vmem:[#allocation7 + $0x158] sm:$0xff]  ;;  %3468 = vmatpush.bf16.msrb.mxu2 %v6919_v15 }
 0x302   : > { %v1936_v27 = vmax.f32 %v1896_v3, 0.0  ;;  %3557 = vmatpush.bf16.msrb.mxu3 %v6927_v50 }
 0x303   : > { %v2215_v32 = vpop.f32.mrf.mxu0 }
 0x304   : > { %v1968_v49 = vpack.c.bf16 %v1936_v27, %v1936_v27  ;;  %v2216_v26 = vadd.f32 %v2215_v32, %v8236_v54  ;;  %v2304_v17 = vpop.f32.mrf.mxu1 }
 0x305   : > { %v2305_v38 = vadd.f32 %v2304_v17, %v8240_v18  ;;  %v1808_v10 = vpop.f32.mrf.mxu2 }
 0x306   : > { %2000 = vst [vmem:[#allocation2 + $0x1a0] sm:$0xf] %v1968_v49  ;;  %v2378_v31 = vmax.f32 %v2216_v26, 0.0  ;;  %v1809_v6 = vadd.f32 %v8334_v58, %v1808_v10  ;;  %v1897_v47 = vpop.f32.mrf.mxu3 }
 0x307   : > { %v2379_v21 = vmax.f32 %v2305_v38, 0.0 }
 0x308   : > { %v1898_v42 = vadd.f32 %v1897_v47, %v1809_v6  ;;  %v2428_v2 = vpack.c.bf16 %v2378_v31, %v2376_v55 }
 0x309   : > { %v2429_v20 = vpack.c.bf16 %v2379_v21, %v2377_v37 }
 0x30a   : > { %v1937_v23 = vmax.f32 %v1898_v42, 0.0  ;;  %2620 = vmatmul.bf16.gmra.mxu2 %v2428_v2 }
 0x30b   : > { %2709 = vmatmul.bf16.gmra.mxu3 %v2429_v20  ;;  %v2218_v35 = vpop.f32.mrf.mxu0 }
 0x30c   : > { %v1969_v11 = vpack.c.bf16 %v1937_v23, %v1937_v23  ;;  %v2307_v61 = vpop.f32.mrf.mxu1  ;;  %v2219_v29 = vadd.f32 %v2218_v35, %v8236_v54 }
 0x30d   : > { %v1811_v14 = vpop.f32.mrf.mxu2  ;;  %v2308_v59 = vadd.f32 %v2307_v61, %v8240_v18 }
 0x30e   : > { %2001 = vst [vmem:[#allocation2 + $0x1b0] sm:$0xf] %v1969_v11  ;;  %v1812_v22 = vadd.f32 %v8334_v58, %v1811_v14  ;;  %v1900_v51 = vpop.f32.mrf.mxu3  ;;  %2257 = vmatmul.bf16.gmra.mxu0 %v7939_v36  ;;  %v2380_v55 = vmax.f32 %v2219_v29, 0.0 }
 0x30f   : > { %2346 = vmatmul.bf16.gmra.mxu1 %v7939_v36  ;;  %v2381_v47 = vmax.f32 %v2308_v59, 0.0 }
 0x310   : > { %v1901_v3 = vadd.f32 %v1900_v51, %v1812_v22 }
 0x312   : > { %v1938_v27 = vmax.f32 %v1901_v3, 0.0 }
 0x313   : > { %v2220_v32 = vpop.f32.mrf.mxu0 }
 0x314   : > { %v1970_v49 = vpack.c.bf16 %v1938_v27, %v1938_v27  ;;  %v2221_v26 = vadd.f32 %v2220_v32, %v8236_v54  ;;  %v2309_v17 = vpop.f32.mrf.mxu1  ;;  %v6351_v32 = vld [vmem:[%s9045_s3 + $0x1e0] sm:$0xf] }
 0x315   : > { %v2310_v38 = vadd.f32 %v2309_v17, %v8240_v18  ;;  %v1813_v10 = vpop.f32.mrf.mxu2  ;;  %v6945_v17 = vld [vmem:[%s9045_s3 + $0x1e4] sm:$0xf0] }
 0x316   : > { %2002 = vst [vmem:[#allocation2 + $0x1c0] sm:$0xf] %v1970_v49  ;;  %v2382_v36 = vmax.f32 %v2221_v26, 0.0  ;;  %v1814_v31 = vadd.f32 %v8334_v58, %v1813_v10  ;;  %v1902_v6 = vpop.f32.mrf.mxu3 }
 0x317   : > { %v2383_v5 = vmax.f32 %v2310_v38, 0.0  ;;  %v6944_v38 = vld [vmem:[%s9045_s3 + $0x1e4] sm:$0xf] }
 0x318   : > { %v1903_v37 = vadd.f32 %v1902_v6, %v1814_v31  ;;  %v2430_v21 = vpack.c.bf16 %v2382_v36, %v2380_v55  ;;  %v6352_v36 = vor.u32 %v6945_v17, %v6351_v32 }
 0x319   : > { %v2431_v57 = vpack.c.bf16 %v2383_v5, %v2381_v47  ;;  %v8380_v5 = vld [vmem:[%s9048_s6 + $0x1] ss:$0 sm:$0xff] }
 0x31a   : > { %v1939_v34 = vmax.f32 %v1903_v37, 0.0  ;;  %2625 = vmatmul.bf16.gmra.mxu2 %v2430_v21  ;;  %3907 = vmatpush.bf16.msra.mxu0 %v6352_v36 }
 0x31b   : > { %2714 = vmatmul.bf16.gmra.mxu3 %v2431_v57  ;;  %v2223_v42 = vpop.f32.mrf.mxu0 }
 0x31c   : > { %v1971_v2 = vpack.c.bf16 %v1939_v34, %v1939_v34  ;;  %v2312_v45 = vpop.f32.mrf.mxu1  ;;  %v2224_v35 = vadd.f32 %v2223_v42, %v8236_v54 }
 0x31d   : > { %v1816_v16 = vpop.f32.mrf.mxu2  ;;  %v2313_v61 = vadd.f32 %v2312_v45, %v8240_v18  ;;  %v6918_v45 = vld [vmem:[#allocation7 + $0x110] sm:$0xff] }
 0x31e   : > { %2003 = vst [vmem:[#allocation2 + $0x1d0] sm:$0xf] %v1971_v2  ;;  %v1817_v20 = vadd.f32 %v8334_v58, %v1816_v16  ;;  %v1905_v52 = vpop.f32.mrf.mxu3  ;;  %3064 = vmatmul.bf16.vlgmr.msrb.gmra.mxu0 %v7693_v8  ;;  %v2384_v29 = vmax.f32 %v2224_v35, 0.0  ;;  %v6926_v16 = vld [vmem:[#allocation7 + $0x150] sm:$0xff]  ;;  %3469 = vmatpush.bf16.msrb.mxu2 %v6918_v45 }
 0x31f   : > { %3153 = vmatmul.bf16.vlgmr.msrb.gmra.mxu1 %v7693_v8  ;;  %v2385_v49 = vmax.f32 %v2313_v61, 0.0  ;;  %3558 = vmatpush.bf16.msrb.mxu3 %v6926_v16 }
 0x320   : > { %v1906_v23 = vadd.f32 %v1905_v52, %v1817_v20 }
 0x322   : > { %v1940_v11 = vmax.f32 %v1906_v23, 0.0 }
 0x323   : > { %v2225_v14 = vpop.f32.mrf.mxu0 }
 0x324   : > { %v1972_v22 = vpack.c.bf16 %v1940_v11, %v1940_v11  ;;  %v2226_v51 = vadd.f32 %v2225_v14, %v8236_v54  ;;  %v2314_v15 = vpop.f32.mrf.mxu1 }
 0x325   : > { %v2315_v50 = vadd.f32 %v2314_v15, %v8240_v18  ;;  %v1818_v3 = vpop.f32.mrf.mxu2 }
 0x326   : > { %2004 = vst [vmem:[#allocation2 + $0x1e0] sm:$0xf] %v1972_v22  ;;  %v2386_v27 = vmax.f32 %v2226_v51, 0.0  ;;  %v1819_v59 = vadd.f32 %v8334_v58, %v1818_v3  ;;  %v1907_v8 = vpop.f32.mrf.mxu3  ;;  %v6353_v58 = vld [vmem:[%s9045_s3 + $0x1e8] sm:$0xf0] }
 0x327   : > { %v2387_v26 = vmax.f32 %v2315_v50, 0.0  ;;  %v6356_v6 = vor.u32 %v6944_v38, %v6353_v58 }
 0x328   : > { %v1908_v10 = vadd.f32 %v1907_v8, %v1819_v59  ;;  %v2432_v55 = vpack.c.bf16 %v2386_v27, %v2384_v29 }
 0x329   : > { %v2433_v31 = vpack.c.bf16 %v2387_v26, %v2385_v49  ;;  %3996 = vmatpush.bf16.msra.mxu1 %v6356_v6 }
 0x32a   : > { %v1941_v47 = vmax.f32 %v1908_v10, 0.0  ;;  %2630 = vmatmul.bf16.gmra.mxu2 %v2432_v55 }
 0x32b   : > { %2719 = vmatmul.bf16.gmra.mxu3 %v2433_v31  ;;  %v2228_v37 = vpop.f32.mrf.mxu0 }
 0x32c   : > { %v1973_v21 = vpack.c.bf16 %v1941_v47, %v1941_v47  ;;  %v2317_v57 = vpop.f32.mrf.mxu1  ;;  %v2229_v52 = vadd.f32 %v2228_v37, %v8236_v54 }
 0x32d   : > { %v2591_v34 = vpop.f32.mrf.mxu2  ;;  %v2318_v35 = vadd.f32 %v2317_v57, %v8240_v18 }
 0x32e   : > { %2005 = vst [vmem:[#allocation2 + $0x1f0] sm:$0xf] %v1973_v21  ;;  %v2592_v42 = vadd.f32 %v8380_v5, %v2591_v34  ;;  %v2680_v2 = vpop.f32.mrf.mxu3  ;;  %3069 = vmatmul.bf16.gmra.mxu0 %v7727_v19  ;;  %v2388_v50 = vmax.f32 %v2229_v52, 0.0 }
 0x32f   : > { %3158 = vmatmul.bf16.gmra.mxu1 %v7727_v19  ;;  %v2389_v27 = vmax.f32 %v2318_v35, 0.0 }
 0x330   : > { %v2681_v20 = vadd.f32 %v2680_v2, %v2592_v42 }
 0x332   : > { %v2760_v23 = vmax.f32 %v2681_v20, 0.0 }
 0x333   : > { %v2230_v11 = vpop.f32.mrf.mxu0 }
 0x334   : > { %v2792_v61 = vpack.c.bf16 %v2760_v23, %v2760_v23  ;;  %v2231_v14 = vadd.f32 %v2230_v11, %v8236_v54  ;;  %v2319_v22 = vpop.f32.mrf.mxu1  ;;  %v6343_v23 = vld [vmem:[%s9045_s3 + $0x1d0] sm:$0xf] }
 0x335   : > { %v2320_v51 = vadd.f32 %v2319_v22, %v8240_v18  ;;  %v2593_v15 = vpop.f32.mrf.mxu2 }
 0x336   : > { %2824 = vst [vmem:[#allocation2 + $0x4] sm:$0xf] %v2792_v61  ;;  %v2390_v19 = vmax.f32 %v2231_v14, 0.0  ;;  %v2594_v3 = vadd.f32 %v8380_v5, %v2593_v15  ;;  %v2682_v29 = vpop.f32.mrf.mxu3  ;;  %v6943_v61 = vld [vmem:[%s9045_s3 + $0x1d4] sm:$0xf0] }
 0x337   : > { %v2391_v59 = vmax.f32 %v2320_v51, 0.0  ;;  %v6942_v14 = vld [vmem:[%s9045_s3 + $0x1d4] sm:$0xf]  ;;  %v6344_v15 = vor.u32 %v6943_v61, %v6343_v23  ;;  %v2921_v23 = vunpack.c.l.b16 %v7805_v44 }
 0x338   : > { %v2683_v8 = vadd.f32 %v2682_v29, %v2594_v3  ;;  %v2434_v32 = vpack.c.bf16 %v2390_v19, %v2388_v50  ;;  %v6345_v50 = vld [vmem:[%s9045_s3 + $0x1d8] sm:$0xf0] }
 0x339   : > { %v2435_v49 = vpack.c.bf16 %v2391_v59, %v2389_v27  ;;  %v6348_v3 = vor.u32 %v6942_v14, %v6345_v50  ;;  %3908 = vmatpush.bf16.msra.mxu0 %v6344_v15 }
 0x33a   : > { %v2761_v26 = vmax.f32 %v2683_v8, 0.0  ;;  %2635 = vmatmul.bf16.gmra.mxu2 %v2434_v32 }
 0x33b   : > { %2724 = vmatmul.bf16.gmra.mxu3 %v2435_v49  ;;  %v2233_v17 = vpop.f32.mrf.mxu0  ;;  %3997 = vmatpush.bf16.msra.mxu1 %v6348_v3 }
 0x33c   : > { %v2793_v38 = vpack.c.bf16 %v2761_v26, %v2761_v26  ;;  %v2322_v10 = vpop.f32.mrf.mxu1  ;;  %v2234_v6 = vadd.f32 %v2233_v17, %v8236_v54  ;;  %v6917_v17 = vld [vmem:[#allocation7 + $0x108] sm:$0xff] }
 0x33d   : > { %v2596_v55 = vpop.f32.mrf.mxu2  ;;  %v2323_v37 = vadd.f32 %v2322_v10, %v8240_v18  ;;  %3470 = vmatpush.bf16.msrb.mxu2 %v6917_v17 }
 0x33e   : > { %2825 = vst [vmem:[#allocation2 + $0x14] sm:$0xf] %v2793_v38  ;;  %v2597_v36 = vadd.f32 %v8380_v5, %v2596_v55  ;;  %v2685_v58 = vpop.f32.mrf.mxu3  ;;  %3074 = vmatmul.bf16.gmra.mxu0 %v7749_v25  ;;  %v2392_v16 = vmax.f32 %v2234_v6, 0.0  ;;  %v6925_v38 = vld [vmem:[#allocation7 + $0x148] sm:$0xff] }
 0x33f   : > { %3163 = vmatmul.bf16.gmra.mxu1 %v7749_v25  ;;  %v2393_v35 = vmax.f32 %v2323_v37, 0.0  ;;  %3559 = vmatpush.bf16.msrb.mxu3 %v6925_v38 }
 0x340   : > { %v2686_v31 = vadd.f32 %v2685_v58, %v2597_v36 }
 0x342   : > { %v2762_v47 = vmax.f32 %v2686_v31, 0.0 }
 0x343   : > { %v2235_v21 = vpop.f32.mrf.mxu0 }
 0x344   : > { %v2794_v57 = vpack.c.bf16 %v2762_v47, %v2762_v47  ;;  %v2236_v34 = vadd.f32 %v2235_v21, %v8236_v54  ;;  %v2324_v42 = vpop.f32.mrf.mxu1 }
 0x345   : > { %v2325_v2 = vadd.f32 %v2324_v42, %v8240_v18  ;;  %v2598_v45 = vpop.f32.mrf.mxu2 }
 0x346   : > { %2826 = vst [vmem:[#allocation2 + $0x24] sm:$0xf] %v2794_v57  ;;  %v2394_v20 = vmax.f32 %v2236_v34, 0.0  ;;  %v2599_v52 = vadd.f32 %v8380_v5, %v2598_v45  ;;  %v2687_v25 = vpop.f32.mrf.mxu3 }
 0x347   : > { %v2395_v11 = vmax.f32 %v2325_v2, 0.0 }
 0x348   : > { %v2688_v22 = vadd.f32 %v2687_v25, %v2599_v52  ;;  %v2436_v51 = vpack.c.bf16 %v2394_v20, %v2392_v16  ;;  %v2920_v20 = vunpack.c.l.b16 %v7791_v48 }
 0x349   : > { %v2437_v19 = vpack.c.bf16 %v2395_v11, %v2393_v35 }
 0x34a   : > { %v2763_v29 = vmax.f32 %v2688_v22, 0.0  ;;  %2640 = vmatmul.bf16.gmra.mxu2 %v2436_v51  ;;  %v2948_v51 = vpack.c.b16 %v2921_v23, %v2920_v20 }
 0x34b   : > { %2729 = vmatmul.bf16.gmra.mxu3 %v2437_v19  ;;  %v2238_v27 = vpop.f32.mrf.mxu0 }
 0x34c   : > { %v2795_v59 = vpack.c.bf16 %v2763_v29, %v2763_v29  ;;  %v2327_v8 = vpop.f32.mrf.mxu1  ;;  %v2239_v55 = vadd.f32 %v2238_v27, %v8236_v54 }
 0x34d   : > { %v2601_v32 = vpop.f32.mrf.mxu2  ;;  %v2328_v58 = vadd.f32 %v2327_v8, %v8240_v18 }
 0x34e   : > { %2827 = vst [vmem:[#allocation2 + $0x34] sm:$0xf] %v2795_v59  ;;  %v2602_v49 = vadd.f32 %v8380_v5, %v2601_v32  ;;  %v2690_v26 = vpop.f32.mrf.mxu3  ;;  %3079 = vmatmul.bf16.gmra.mxu0 %v7783_v46  ;;  %v2396_v34 = vmax.f32 %v2239_v55, 0.0 }
 0x34f   : > { %3168 = vmatmul.bf16.gmra.mxu1 %v7783_v46  ;;  %v2397_v45 = vmax.f32 %v2328_v58, 0.0  ;;  %v2922_v58 = vunpack.c.l.b16 %v7817_v24 }
 0x350   : > { %v2691_v10 = vadd.f32 %v2690_v26, %v2602_v49 }
 0x352   : > { %v2764_v36 = vmax.f32 %v2691_v10, 0.0 }
 0x353   : > { %v2240_v31 = vpop.f32.mrf.mxu0 }
 0x354   : > { %v2796_v6 = vpack.c.bf16 %v2764_v36, %v2764_v36  ;;  %v2241_v47 = vadd.f32 %v2240_v31, %v8236_v54  ;;  %v2329_v37 = vpop.f32.mrf.mxu1  ;;  %v6335_v36 = vld [vmem:[%s9045_s3 + $0x1c0] sm:$0xf] }
 0x355   : > { %v2330_v21 = vadd.f32 %v2329_v37, %v8240_v18  ;;  %v2603_v57 = vpop.f32.mrf.mxu2  ;;  %v6940_v37 = vld [vmem:[%s9045_s3 + $0x1c4] sm:$0xf] }
 0x356   : > { %2828 = vst [vmem:[#allocation2 + $0x44] sm:$0xf] %v2796_v6  ;;  %v2398_v46 = vmax.f32 %v2241_v47, 0.0  ;;  %v2604_v42 = vadd.f32 %v8380_v5, %v2603_v57  ;;  %v2692_v2 = vpop.f32.mrf.mxu3  ;;  %v6941_v47 = vld [vmem:[%s9045_s3 + $0x1c4] sm:$0xf0] }
 0x357   : > { %v2399_v16 = vmax.f32 %v2330_v21, 0.0 }
 0x358   : > { %v2693_v52 = vadd.f32 %v2692_v2, %v2604_v42  ;;  %v2438_v25 = vpack.c.bf16 %v2398_v46, %v2396_v34  ;;  %v2923_v34 = vunpack.c.l.b16 %v7840_v1  ;;  %v6336_v46 = vor.u32 %v6941_v47, %v6335_v36  ;;  %v6337_v42 = vld [vmem:[%s9045_s3 + $0x1c8] sm:$0xf0] }
 0x359   : > { %v2439_v35 = vpack.c.bf16 %v2399_v16, %v2397_v45  ;;  %v6340_v2 = vor.u32 %v6940_v37, %v6337_v42 }
 0x35a   : > { %v2765_v11 = vmax.f32 %v2693_v52, 0.0  ;;  %2645 = vmatmul.bf16.gmra.mxu2 %v2438_v25  ;;  %3909 = vmatpush.bf16.msra.mxu0 %v6336_v46  ;;  %v2949_v25 = vpack.c.b16 %v2923_v34, %v2922_v58 }
 0x35b   : > { %2734 = vmatmul.bf16.gmra.mxu3 %v2439_v35  ;;  %v2243_v61 = vpop.f32.mrf.mxu0  ;;  %3998 = vmatpush.bf16.msra.mxu1 %v6340_v2 }
 0x35c   : > { %v2797_v14 = vpack.c.bf16 %v2765_v11, %v2765_v11  ;;  %v2332_v22 = vpop.f32.mrf.mxu1  ;;  %v2244_v3 = vadd.f32 %v2243_v61, %v8236_v54  ;;  %v6916_v11 = vld [vmem:[#allocation7 + $0x100] sm:$0xff] }
 0x35d   : > { %v2606_v15 = vpop.f32.mrf.mxu2  ;;  %v2333_v44 = vadd.f32 %v2332_v22, %v8240_v18  ;;  %v6924_v61 = vld [vmem:[#allocation7 + $0x140] sm:$0xff]  ;;  %3471 = vmatpush.bf16.msrb.mxu2 %v6916_v11 }
 0x35e   : > { %2829 = vst [vmem:[#allocation2 + $0x54] sm:$0xf] %v2797_v14  ;;  %v2607_v50 = vadd.f32 %v8380_v5, %v2606_v15  ;;  %v2695_v19 = vpop.f32.mrf.mxu3  ;;  %3084 = vmatmul.bf16.gmra.mxu0 %v2948_v51  ;;  %v2400_v17 = vmax.f32 %v2244_v3, 0.0  ;;  %3560 = vmatpush.bf16.msrb.mxu3 %v6924_v61  ;;  %v6327_v11 = vld [vmem:[%s9045_s3 + $0x1b0] sm:$0xf]  ;;  %v2926_v61 = vunpack.c.l.b16 %v7881_v40 }
 0x35f   : > { %3173 = vmatmul.bf16.gmra.mxu1 %v2948_v51  ;;  %v2401_v31 = vmax.f32 %v2333_v44, 0.0 }
 0x360   : > { %v2696_v48 = vadd.f32 %v2695_v19, %v2607_v50 }
 0x362   : > { %v2766_v29 = vmax.f32 %v2696_v48, 0.0 }
 0x363   : > { %v2245_v27 = vpop.f32.mrf.mxu0 }
 0x364   : > { %v2798_v59 = vpack.c.bf16 %v2766_v29, %v2766_v29  ;;  %v2246_v8 = vadd.f32 %v2245_v27, %v8236_v54  ;;  %v2334_v32 = vpop.f32.mrf.mxu1 }
 0x365   : > { %v2335_v49 = vadd.f32 %v2334_v32, %v8240_v18  ;;  %v2608_v26 = vpop.f32.mrf.mxu2 }
 0x366   : > { %2830 = vst [vmem:[#allocation2 + $0x64] sm:$0xf] %v2798_v59  ;;  %v2402_v38 = vmax.f32 %v2246_v8, 0.0  ;;  %v2609_v10 = vadd.f32 %v8380_v5, %v2608_v26  ;;  %v2697_v55 = vpop.f32.mrf.mxu3 }
 0x367   : > { %v2403_v6 = vmax.f32 %v2335_v49, 0.0 }
 0x368   : > { %v2698_v21 = vadd.f32 %v2697_v55, %v2609_v10  ;;  %v2440_v57 = vpack.c.bf16 %v2402_v38, %v2400_v17  ;;  %v2924_v17 = vunpack.c.l.b16 %v7855_v62  ;;  %v2925_v55 = vunpack.c.l.b16 %v7869_v41 }
 0x369   : > { %v2441_v24 = vpack.c.bf16 %v2403_v6, %v2401_v31 }
 0x36a   : > { %v2767_v45 = vmax.f32 %v2698_v21, 0.0  ;;  %2650 = vmatmul.bf16.gmra.mxu2 %v2440_v57  ;;  %v2950_v37 = vpack.c.b16 %v2925_v55, %v2924_v17 }
 0x36b   : > { %2739 = vmatmul.bf16.gmra.mxu3 %v2441_v24  ;;  %v2248_v16 = vpop.f32.mrf.mxu0 }
 0x36c   : > { %v2799_v20 = vpack.c.bf16 %v2767_v45, %v2767_v45  ;;  %v2337_v52 = vpop.f32.mrf.mxu1  ;;  %v2249_v22 = vadd.f32 %v2248_v16, %v8236_v54 }
 0x36d   : > { %v2611_v23 = vpop.f32.mrf.mxu2  ;;  %v2338_v15 = vadd.f32 %v2337_v52, %v8240_v18 }
 0x36e   : > { %2831 = vst [vmem:[#allocation2 + $0x74] sm:$0xf] %v2799_v20  ;;  %v2612_v1 = vadd.f32 %v8380_v5, %v2611_v23  ;;  %v2700_v35 = vpop.f32.mrf.mxu3  ;;  %3089 = vmatmul.bf16.gmra.mxu0 %v2949_v25  ;;  %v2404_v27 = vmax.f32 %v2249_v22, 0.0 }
 0x36f   : > { %3178 = vmatmul.bf16.gmra.mxu1 %v2949_v25  ;;  %v2405_v49 = vmax.f32 %v2338_v15, 0.0  ;;  %v6938_v15 = vld [vmem:[%s9045_s3 + $0x1b4] sm:$0xf] }
 0x370   : > { %v2701_v14 = vadd.f32 %v2700_v35, %v2612_v1 }
 0x372   : > { %v2768_v51 = vmax.f32 %v2701_v14, 0.0 }
 0x373   : > { %v2250_v50 = vpop.f32.mrf.mxu0 }
 0x374   : > { %v2800_v19 = vpack.c.bf16 %v2768_v51, %v2768_v51  ;;  %v2251_v48 = vadd.f32 %v2250_v50, %v8236_v54  ;;  %v2339_v3 = vpop.f32.mrf.mxu1  ;;  %v6939_v51 = vld [vmem:[%s9045_s3 + $0x1b4] sm:$0xf0] }
 0x375   : > { %v2340_v29 = vadd.f32 %v2339_v3, %v8240_v18  ;;  %v2613_v44 = vpop.f32.mrf.mxu2  ;;  %v6328_v3 = vor.u32 %v6939_v51, %v6327_v11 }
 0x376   : > { %2832 = vst [vmem:[#allocation2 + $0x84] sm:$0xf] %v2800_v19  ;;  %v2406_v59 = vmax.f32 %v2251_v48, 0.0  ;;  %v2614_v8 = vadd.f32 %v8380_v5, %v2613_v44  ;;  %v2702_v32 = vpop.f32.mrf.mxu3  ;;  %v2927_v48 = vunpack.c.l.b16 %v7905_v30 }
 0x377   : > { %v2407_v26 = vmax.f32 %v2340_v29, 0.0  ;;  %v6329_v29 = vld [vmem:[%s9045_s3 + $0x1b8] sm:$0xf0]  ;;  %3910 = vmatpush.bf16.msra.mxu0 %v6328_v3 }
 0x378   : > { %v2703_v38 = vadd.f32 %v2702_v32, %v2614_v8  ;;  %v2442_v10 = vpack.c.bf16 %v2406_v59, %v2404_v27  ;;  %v6332_v44 = vor.u32 %v6938_v15, %v6329_v29 }
 0x379   : > { %v2443_v36 = vpack.c.bf16 %v2407_v26, %v2405_v49  ;;  %v2951_v49 = vpack.c.b16 %v2927_v48, %v2926_v61 }
 0x37a   : > { %v2769_v58 = vmax.f32 %v2703_v38, 0.0  ;;  %2655 = vmatmul.bf16.gmra.mxu2 %v2442_v10  ;;  %3999 = vmatpush.bf16.msra.mxu1 %v6332_v44  ;;  %v6955_v38 = vld [vmem:[#allocation7 + $0x1b8] sm:$0xff] }
 0x37b   : > { %2744 = vmatmul.bf16.gmra.mxu3 %v2443_v36  ;;  %v2253_v31 = vpop.f32.mrf.mxu0  ;;  %v6963_v10 = vld [vmem:[#allocation7 + $0x1f8] sm:$0xff]  ;;  %4314 = vmatpush.bf16.msra.mxu2 %v6955_v38 }
 0x37c   : > { %v2801_v6 = vpack.c.bf16 %v2769_v58, %v2769_v58  ;;  %v2342_v47 = vpop.f32.mrf.mxu1  ;;  %v2254_v46 = vadd.f32 %v2253_v31, %v8236_v54  ;;  %4403 = vmatpush.bf16.msra.mxu3 %v6963_v10  ;;  %v6937_v10 = vld [vmem:[%s9045_s3 + $0x1a4] sm:$0xf0] }
 0x37d   : > { %v2616_v21 = vpop.f32.mrf.mxu2  ;;  %v2343_v41 = vadd.f32 %v2342_v47, %v8240_v18 }
 0x37e   : > { %2833 = vst [vmem:[#allocation2 + $0x94] sm:$0xf] %v2801_v6  ;;  %v2617_v57 = vadd.f32 %v8380_v5, %v2616_v21  ;;  %v2705_v34 = vpop.f32.mrf.mxu3  ;;  %3094 = vmatmul.bf16.gmra.mxu0 %v2950_v37  ;;  %v2408_v25 = vmax.f32 %v2254_v46, 0.0 }
 0x37f   : > { %3183 = vmatmul.bf16.gmra.mxu1 %v2950_v37  ;;  %v2409_v14 = vmax.f32 %v2343_v41, 0.0 }
 0x380   : > { %v2706_v62 = vadd.f32 %v2705_v34, %v2617_v57 }
 0x382   : > { %v2770_v42 = vmax.f32 %v2706_v62, 0.0 }
 0x383   : > { %v2255_v24 = vpop.f32.mrf.mxu0 }
 0x384   : > { %v2802_v2 = vpack.c.bf16 %v2770_v42, %v2770_v42  ;;  %v2256_v45 = vadd.f32 %v2255_v24, %v8236_v54  ;;  %v2344_v16 = vpop.f32.mrf.mxu1 }
 0x385   : > { %v2345_v20 = vadd.f32 %v2344_v16, %v8240_v18  ;;  %v2618_v52 = vpop.f32.mrf.mxu2 }
 0x386   : > { %2834 = vst [vmem:[#allocation2 + $0xa4] sm:$0xf] %v2802_v2  ;;  %v2410_v23 = vmax.f32 %v2256_v45, 0.0  ;;  %v2619_v1 = vadd.f32 %v8380_v5, %v2618_v52  ;;  %v2707_v35 = vpop.f32.mrf.mxu3  ;;  %v2928_v45 = vunpack.c.l.b16 %v7915_v13  ;;  %v2929_v52 = vunpack.c.l.b16 %v7927_v12 }
 0x387   : > { %v2411_v22 = vmax.f32 %v2345_v20, 0.0 }
 0x388   : > { %v2708_v50 = vadd.f32 %v2707_v35, %v2619_v1  ;;  %v2444_v19 = vpack.c.bf16 %v2410_v23, %v2408_v25  ;;  %v2952_v11 = vpack.c.b16 %v2929_v52, %v2928_v45 }
 0x389   : > { %v2445_v40 = vpack.c.bf16 %v2411_v22, %v2409_v14 }
 0x38a   : > { %v2771_v27 = vmax.f32 %v2708_v50, 0.0  ;;  %2660 = vmatmul.bf16.gmra.mxu2 %v2444_v19 }
 0x38b   : > { %2749 = vmatmul.bf16.gmra.mxu3 %v2445_v40  ;;  %v2258_v59 = vpop.f32.mrf.mxu0 }
 0x38c   : > { %v2803_v8 = vpack.c.bf16 %v2771_v27, %v2771_v27  ;;  %v2347_v32 = vpop.f32.mrf.mxu1  ;;  %v2259_v36 = vadd.f32 %v2258_v59, %v8236_v54 }
 0x38d   : > { %v2621_v26 = vpop.f32.mrf.mxu2  ;;  %v2348_v31 = vadd.f32 %v2347_v32, %v8240_v18 }
 0x38e   : > { %2835 = vst [vmem:[#allocation2 + $0xb4] sm:$0xf] %v2803_v8  ;;  %v2622_v30 = vadd.f32 %v8380_v5, %v2621_v26  ;;  %v2710_v17 = vpop.f32.mrf.mxu3  ;;  %3099 = vmatmul.bf16.gmra.mxu0 %v2951_v49  ;;  %v2412_v62 = vmax.f32 %v2259_v36, 0.0  ;;  %v6319_v26 = vld [vmem:[%s9045_s3 + $0x1a0] sm:$0xf] }
 0x38f   : > { %3188 = vmatmul.bf16.gmra.mxu1 %v2951_v49  ;;  %v2413_v24 = vmax.f32 %v2348_v31, 0.0  ;;  %v2931_v31 = vunpack.c.l.b16 %v7965_v43 }
 0x390   : > { %v2711_v55 = vadd.f32 %v2710_v17, %v2622_v30  ;;  %v2930_v30 = vunpack.c.l.b16 %v7935_v63 }
 0x392   : > { %v2772_v58 = vmax.f32 %v2711_v55, 0.0  ;;  %v6936_v55 = vld [vmem:[%s9045_s3 + $0x1a4] sm:$0xf] }
 0x393   : > { %v2260_v6 = vpop.f32.mrf.mxu0 }
 0x394   : > { %v2804_v47 = vpack.c.bf16 %v2772_v58, %v2772_v58  ;;  %v2261_v37 = vadd.f32 %v2260_v6, %v8236_v54  ;;  %v2349_v21 = vpop.f32.mrf.mxu1  ;;  %v6320_v6 = vor.u32 %v6937_v10, %v6319_v26 }
 0x395   : > { %v2350_v57 = vadd.f32 %v2349_v21, %v8240_v18  ;;  %v2623_v34 = vpop.f32.mrf.mxu2  ;;  %v2874_v18 = vld [vmem:[#allocation5 + $0x4] sm:$0x3] }
 0x396   : > { %2836 = vst [vmem:[#allocation2 + $0xc4] sm:$0xf] %v2804_v47  ;;  %v2414_v46 = vmax.f32 %v2261_v37, 0.0  ;;  %v2624_v42 = vadd.f32 %v8380_v5, %v2623_v34  ;;  %v2712_v41 = vpop.f32.mrf.mxu3  ;;  %v8476_v14 = vperm.slane %v2874_v18, 0  ;;  %v8479_v51 = vperm.slane %v2874_v18, 1  ;;  %3911 = vmatpush.bf16.msra.mxu0 %v6320_v6 }
 0x397   : > { %v2415_v2 = vmax.f32 %v2350_v57, 0.0  ;;  %v6321_v47 = vld [vmem:[%s9045_s3 + $0x1a8] sm:$0xf0] }
 0x398   : > { %v2713_v16 = vadd.f32 %v2712_v41, %v2624_v42  ;;  %v2446_v20 = vpack.c.bf16 %v2414_v46, %v2412_v62  ;;  %v6324_v37 = vor.u32 %v6936_v55, %v6321_v47  ;;  %v2953_v46 = vpack.c.b16 %v2931_v31, %v2930_v30 }
 0x399   : > { %v2447_v25 = vpack.c.bf16 %v2415_v2, %v2413_v24  ;;  %v6954_v24 = vld [vmem:[#allocation7 + $0x1b0] sm:$0xff] }
 0x39a   : > { %v2773_v54 = vmax.f32 %v2713_v16, 0.0  ;;  %2665 = vmatmul.bf16.gmra.mxu2 %v2446_v20  ;;  %4000 = vmatpush.bf16.msra.mxu1 %v6324_v37  ;;  %v6962_v2 = vld [vmem:[#allocation7 + $0x1f0] sm:$0xff] }
 0x39b   : > { %2754 = vmatmul.bf16.gmra.mxu3 %v2447_v25  ;;  %v3065_v23 = vpop.f32.mrf.mxu0  ;;  %4315 = vmatpush.bf16.msra.mxu2 %v6954_v24  ;;  %v6934_v24 = vld [vmem:[%s9045_s3 + $0x194] sm:$0xf] }
 0x39c   : > { %v2805_v1 = vpack.c.bf16 %v2773_v54, %v2773_v54  ;;  %v3154_v35 = vpop.f32.mrf.mxu1  ;;  %v3066_v15 = vadd.f32 %v3065_v23, %v8476_v14  ;;  %4404 = vmatpush.bf16.msra.mxu3 %v6962_v2 }
 0x39d   : > { %v2626_v61 = vpop.f32.mrf.mxu2  ;;  %v3155_v19 = vadd.f32 %v3154_v35, %v8479_v51 }
 0x39e   : > { %2837 = vst [vmem:[#allocation2 + $0xd4] sm:$0xf] %v2805_v1  ;;  %v2627_v22 = vadd.f32 %v8380_v5, %v2626_v61  ;;  %v2715_v13 = vpop.f32.mrf.mxu3  ;;  %3104 = vmatmul.bf16.gmra.mxu0 %v2952_v11  ;;  %v3234_v59 = vmax.f32 %v3066_v15, 0.0 }
 0x39f   : > { %3193 = vmatmul.bf16.gmra.mxu1 %v2952_v11  ;;  %v3235_v17 = vmax.f32 %v3155_v19, 0.0 }
 0x3a0   : > { %v2716_v12 = vadd.f32 %v2715_v13, %v2627_v22 }
 0x3a2   : > { %v2774_v50 = vmax.f32 %v2716_v12, 0.0 }
 0x3a3   : > { %v3067_v48 = vpop.f32.mrf.mxu0 }
 0x3a4   : > { %v2806_v3 = vpack.c.bf16 %v2774_v50, %v2774_v50  ;;  %v3068_v29 = vadd.f32 %v3067_v48, %v8476_v14  ;;  %v3156_v40 = vpop.f32.mrf.mxu1  ;;  %v2932_v50 = vunpack.c.l.b16 %v7973_v9 }
 0x3a5   : > { %v3157_v44 = vadd.f32 %v3156_v40, %v8479_v51  ;;  %v2628_v27 = vpop.f32.mrf.mxu2 }
 0x3a6   : > { %2838 = vst [vmem:[#allocation2 + $0xe4] sm:$0xf] %v2806_v3  ;;  %v3236_v8 = vmax.f32 %v3068_v29, 0.0  ;;  %v2629_v32 = vadd.f32 %v8380_v5, %v2628_v27  ;;  %v2717_v49 = vpop.f32.mrf.mxu3  ;;  %v9091_v3 = vld [vmem:[#allocation20_spill] sm:$0xff] }
 0x3a7   : > { %v3237_v38 = vmax.f32 %v3157_v44, 0.0  ;;  %v2933_v29 = vunpack.c.l.b16 %v9091_v3 }
 0x3a8   : > { %v3298_v36 = vpack.c.bf16 %v3236_v8, %v3234_v59  ;;  %v2718_v58 = vadd.f32 %v2717_v49, %v2629_v32 }
 0x3a9   : > { %v3299_v63 = vpack.c.bf16 %v3237_v38, %v3235_v17  ;;  %v2954_v32 = vpack.c.b16 %v2933_v29, %v2932_v50 }
 0x3aa   : > { %v2775_v21 = vmax.f32 %v2718_v58, 0.0  ;;  %3472 = vmatmul.bf16.vlgmr.msrb.gmra.mxu2 %v3298_v36 }
 0x3ab   : > { %3561 = vmatmul.bf16.vlgmr.msrb.gmra.mxu3 %v3299_v63  ;;  %v3070_v57 = vpop.f32.mrf.mxu0 }
 0x3ac   : > { %v2807_v34 = vpack.c.bf16 %v2775_v21, %v2775_v21  ;;  %v3159_v62 = vpop.f32.mrf.mxu1  ;;  %v3071_v16 = vadd.f32 %v3070_v57, %v8476_v14 }
 0x3ad   : > { %v2631_v42 = vpop.f32.mrf.mxu2  ;;  %v3160_v52 = vadd.f32 %v3159_v62, %v8479_v51  ;;  %v9092_v62 = vld [vmem:[#allocation22_spill] sm:$0xff] }
 0x3ae   : > { %2839 = vst [vmem:[#allocation2 + $0xf4] sm:$0xf] %v2807_v34  ;;  %v2632_v43 = vadd.f32 %v8380_v5, %v2631_v42  ;;  %v2720_v41 = vpop.f32.mrf.mxu3  ;;  %3109 = vmatmul.bf16.gmra.mxu0 %v2953_v46  ;;  %v3238_v11 = vmax.f32 %v3071_v16, 0.0  ;;  %v6311_v34 = vld [vmem:[%s9045_s3 + $0x190] sm:$0xf]  ;;  %v2935_v16 = vunpack.c.l.b16 %v8013_v28 }
 0x3af   : > { %3198 = vmatmul.bf16.gmra.mxu1 %v2953_v46  ;;  %v3239_v12 = vmax.f32 %v3160_v52, 0.0  ;;  %v2934_v46 = vunpack.c.l.b16 %v9092_v62  ;;  %v6313_v52 = vld [vmem:[%s9045_s3 + $0x198] sm:$0xf0] }
 0x3b0   : > { %v2721_v45 = vadd.f32 %v2720_v41, %v2632_v43  ;;  %v6935_v41 = vld [vmem:[%s9045_s3 + $0x194] sm:$0xf0] }
 0x3b2   : > { %v2776_v20 = vmax.f32 %v2721_v45, 0.0 }
 0x3b3   : > { %v3072_v25 = vpop.f32.mrf.mxu0 }
 0x3b4   : > { %v2808_v54 = vpack.c.bf16 %v2776_v20, %v2776_v20  ;;  %v3073_v18 = vadd.f32 %v3072_v25, %v8476_v14  ;;  %v3161_v23 = vpop.f32.mrf.mxu1  ;;  %v6312_v20 = vor.u32 %v6935_v41, %v6311_v34 }
 0x3b5   : > { %v3162_v1 = vadd.f32 %v3161_v23, %v8479_v51  ;;  %v2633_v35 = vpop.f32.mrf.mxu2 }
 0x3b6   : > { %2840 = vst [vmem:[#allocation2 + $0x104] sm:$0xf] %v2808_v54  ;;  %v3240_v61 = vmax.f32 %v3073_v18, 0.0  ;;  %v2634_v22 = vadd.f32 %v8380_v5, %v2633_v35  ;;  %v2722_v13 = vpop.f32.mrf.mxu3  ;;  %v6316_v54 = vor.u32 %v6934_v24, %v6313_v52  ;;  %3912 = vmatpush.bf16.msra.mxu0 %v6312_v20 }
 0x3b7   : > { %v3241_v15 = vmax.f32 %v3162_v1, 0.0 }
 0x3b8   : > { %v2723_v19 = vadd.f32 %v2722_v13, %v2634_v22  ;;  %v3300_v48 = vpack.c.bf16 %v3240_v61, %v3238_v11  ;;  %4001 = vmatpush.bf16.msra.mxu1 %v6316_v54  ;;  %v2955_v11 = vpack.c.b16 %v2935_v16, %v2934_v46  ;;  %v6953_v13 = vld [vmem:[#allocation7 + $0x1a8] sm:$0xff] }
 0x3b9   : > { %v3301_v40 = vpack.c.bf16 %v3241_v15, %v3239_v12  ;;  %v6961_v12 = vld [vmem:[#allocation7 + $0x1e8] sm:$0xff]  ;;  %4316 = vmatpush.bf16.msra.mxu2 %v6953_v13 }
 0x3ba   : > { %v2777_v44 = vmax.f32 %v2723_v19, 0.0  ;;  %3477 = vmatmul.bf16.gmra.mxu2 %v3300_v48  ;;  %4405 = vmatpush.bf16.msra.mxu3 %v6961_v12  ;;  %v2939_v12 = vunpack.c.l.b16 %v8061_v33 }
 0x3bb   : > { %3566 = vmatmul.bf16.gmra.mxu3 %v3301_v40  ;;  %v3075_v27 = vpop.f32.mrf.mxu0 }
 0x3bc   : > { %v2809_v59 = vpack.c.bf16 %v2777_v44, %v2777_v44  ;;  %v3164_v8 = vpop.f32.mrf.mxu1  ;;  %v3076_v17 = vadd.f32 %v3075_v27, %v8476_v14 }
 0x3bd   : > { %v2636_v49 = vpop.f32.mrf.mxu2  ;;  %v3165_v10 = vadd.f32 %v3164_v8, %v8479_v51 }
 0x3be   : > { %2841 = vst [vmem:[#allocation2 + $0x114] sm:$0xf] %v2809_v59  ;;  %v2637_v26 = vadd.f32 %v8380_v5, %v2636_v49  ;;  %v2725_v30 = vpop.f32.mrf.mxu3  ;;  %3114 = vmatmul.bf16.gmra.mxu0 %v2954_v32  ;;  %v3242_v63 = vmax.f32 %v3076_v17, 0.0  ;;  %v2936_v17 = vunpack.c.l.b16 %v8021_v60 }
 0x3bf   : > { %3203 = vmatmul.bf16.gmra.mxu1 %v2954_v32  ;;  %v3243_v42 = vmax.f32 %v3165_v10, 0.0 }
 0x3c0   : > { %v2726_v9 = vadd.f32 %v2725_v30, %v2637_v26 }
 0x3c2   : > { %v2778_v38 = vmax.f32 %v2726_v9, 0.0 }
 0x3c3   : > { %v3077_v55 = vpop.f32.mrf.mxu0 }
 0x3c4   : > { %v2810_v36 = vpack.c.bf16 %v2778_v38, %v2778_v38  ;;  %v3078_v58 = vadd.f32 %v3077_v55, %v8476_v14  ;;  %v3166_v31 = vpop.f32.mrf.mxu1  ;;  %v9093_v55 = vld [vmem:[#allocation24_spill] sm:$0xff] }
 0x3c5   : > { %v3167_v6 = vadd.f32 %v3166_v31, %v8479_v51  ;;  %v2638_v47 = vpop.f32.mrf.mxu2 }
 0x3c6   : > { %2842 = vst [vmem:[#allocation2 + $0x124] sm:$0xf] %v2810_v36  ;;  %v3244_v37 = vmax.f32 %v3078_v58, 0.0  ;;  %v2639_v21 = vadd.f32 %v8380_v5, %v2638_v47  ;;  %v2727_v57 = vpop.f32.mrf.mxu3  ;;  %v2937_v36 = vunpack.c.l.b16 %v9093_v55 }
 0x3c7   : > { %v3245_v43 = vmax.f32 %v3167_v6, 0.0 }
 0x3c8   : > { %v2728_v2 = vadd.f32 %v2727_v57, %v2639_v21  ;;  %v3302_v45 = vpack.c.bf16 %v3244_v37, %v3242_v63  ;;  %v2956_v37 = vpack.c.b16 %v2937_v36, %v2936_v17 }
 0x3c9   : > { %v3303_v25 = vpack.c.bf16 %v3245_v43, %v3243_v42 }
 0x3ca   : > { %v2779_v18 = vmax.f32 %v2728_v2, 0.0  ;;  %3482 = vmatmul.bf16.gmra.mxu2 %v3302_v45 }
 0x3cb   : > { %3571 = vmatmul.bf16.gmra.mxu3 %v3303_v25  ;;  %v3080_v23 = vpop.f32.mrf.mxu0 }
 0x3cc   : > { %v2811_v1 = vpack.c.bf16 %v2779_v18, %v2779_v18  ;;  %v3169_v35 = vpop.f32.mrf.mxu1  ;;  %v3081_v50 = vadd.f32 %v3080_v23, %v8476_v14  ;;  %v6303_v18 = vld [vmem:[%s9045_s3 + $0x180] sm:$0xf]  ;;  %v9094_v23 = vld [vmem:[#allocation26_spill] sm:$0xff] }
 0x3cd   : > { %v2641_v61 = vpop.f32.mrf.mxu2  ;;  %v3170_v48 = vadd.f32 %v3169_v35, %v8479_v51 }
 0x3ce   : > { %2843 = vst [vmem:[#allocation2 + $0x134] sm:$0xf] %v2811_v1  ;;  %v2642_v28 = vadd.f32 %v8380_v5, %v2641_v61  ;;  %v2730_v22 = vpop.f32.mrf.mxu3  ;;  %3119 = vmatmul.bf16.gmra.mxu0 %v2955_v11  ;;  %v3246_v8 = vmax.f32 %v3081_v50, 0.0  ;;  %v2938_v1 = vunpack.c.l.b16 %v9094_v23  ;;  %v6933_v61 = vld [vmem:[%s9045_s3 + $0x184] sm:$0xf0] }
 0x3cf   : > { %3208 = vmatmul.bf16.gmra.mxu1 %v2955_v11  ;;  %v3247_v30 = vmax.f32 %v3170_v48, 0.0  ;;  %v6305_v50 = vld [vmem:[%s9045_s3 + $0x188] sm:$0xf0] }
 0x3d0   : > { %v2731_v15 = vadd.f32 %v2730_v22, %v2642_v28  ;;  %v6932_v28 = vld [vmem:[%s9045_s3 + $0x184] sm:$0xf] }
 0x3d1   : > { %v6308_v48 = vor.u32 %v6932_v28, %v6305_v50 }
 0x3d2   : > { %v2780_v19 = vmax.f32 %v2731_v15, 0.0  ;;  %v6304_v15 = vor.u32 %v6933_v61, %v6303_v18 }
 0x3d3   : > { %v3082_v3 = vpop.f32.mrf.mxu0  ;;  %4002 = vmatpush.bf16.msra.mxu1 %v6308_v48 }
 0x3d4   : > { %v2812_v29 = vpack.c.bf16 %v2780_v19, %v2780_v19  ;;  %v3083_v40 = vadd.f32 %v3082_v3, %v8476_v14  ;;  %v3171_v44 = vpop.f32.mrf.mxu1  ;;  %3913 = vmatpush.bf16.msra.mxu0 %v6304_v15 }
 0x3d5   : > { %v3172_v27 = vadd.f32 %v3171_v44, %v8479_v51  ;;  %v2643_v59 = vpop.f32.mrf.mxu2 }
 0x3d6   : > { %2844 = vst [vmem:[#allocation2 + $0x144] sm:$0xf] %v2812_v29  ;;  %v3248_v32 = vmax.f32 %v3083_v40, 0.0  ;;  %v2644_v49 = vadd.f32 %v8380_v5, %v2643_v59  ;;  %v2732_v26 = vpop.f32.mrf.mxu3 }
 0x3d7   : > { %v3249_v9 = vmax.f32 %v3172_v27, 0.0  ;;  %v2957_v27 = vpack.c.b16 %v2939_v12, %v2938_v1 }
 0x3d8   : > { %v2733_v38 = vadd.f32 %v2732_v26, %v2644_v49  ;;  %v3304_v10 = vpack.c.bf16 %v3248_v32, %v3246_v8  ;;  %v6952_v32 = vld [vmem:[#allocation7 + $0x1a0] sm:$0xff] }
 0x3d9   : > { %v3305_v58 = vpack.c.bf16 %v3249_v9, %v3247_v30  ;;  %v6960_v49 = vld [vmem:[#allocation7 + $0x1e0] sm:$0xff]  ;;  %4317 = vmatpush.bf16.msra.mxu2 %v6952_v32 }
 0x3da   : > { %v2781_v31 = vmax.f32 %v2733_v38, 0.0  ;;  %3487 = vmatmul.bf16.gmra.mxu2 %v3304_v10  ;;  %4406 = vmatpush.bf16.msra.mxu3 %v6960_v49 }
 0x3db   : > { %3576 = vmatmul.bf16.gmra.mxu3 %v3305_v58  ;;  %v3085_v6 = vpop.f32.mrf.mxu0 }
 0x3dc   : > { %v2813_v47 = vpack.c.bf16 %v2781_v31, %v2781_v31  ;;  %v3174_v63 = vpop.f32.mrf.mxu1  ;;  %v3086_v62 = vadd.f32 %v3085_v6, %v8476_v14 }
 0x3dd   : > { %v2646_v21 = vpop.f32.mrf.mxu2  ;;  %v3175_v42 = vadd.f32 %v3174_v63, %v8479_v51 }
 0x3de   : > { %2845 = vst [vmem:[#allocation2 + $0x154] sm:$0xf] %v2813_v47  ;;  %v2647_v57 = vadd.f32 %v8380_v5, %v2646_v21  ;;  %v2735_v34 = vpop.f32.mrf.mxu3  ;;  %3124 = vmatmul.bf16.gmra.mxu0 %v2956_v37  ;;  %v3250_v20 = vmax.f32 %v3086_v62, 0.0  ;;  %v8564_v47 = vld [vmem:[%s9048_s6 + $0x1] ss:$0 sm:$0xff] }
 0x3df   : > { %3213 = vmatmul.bf16.gmra.mxu1 %v2956_v37  ;;  %v3251_v35 = vmax.f32 %v3175_v42, 0.0 }
 0x3e0   : > { %v2736_v60 = vadd.f32 %v2735_v34, %v2647_v57  ;;  %v2940_v34 = vunpack.c.l.b16 %v8069_v39 }
 0x3e2   : > { %v2782_v46 = vmax.f32 %v2736_v60, 0.0 }
 0x3e3   : > { %v3087_v43 = vpop.f32.mrf.mxu0 }
 0x3e4   : > { %v2814_v41 = vpack.c.bf16 %v2782_v46, %v2782_v46  ;;  %v3088_v24 = vadd.f32 %v3087_v43, %v8476_v14  ;;  %v3176_v2 = vpop.f32.mrf.mxu1  ;;  %v2941_v46 = vunpack.c.l.b16 %v8079_v7 }
 0x3e5   : > { %v3177_v45 = vadd.f32 %v3176_v2, %v8479_v51  ;;  %v2648_v16 = vpop.f32.mrf.mxu2 }
 0x3e6   : > { %2846 = vst [vmem:[#allocation2 + $0x164] sm:$0xf] %v2814_v41  ;;  %v3252_v52 = vmax.f32 %v3088_v24, 0.0  ;;  %v2649_v25 = vadd.f32 %v8380_v5, %v2648_v16  ;;  %v2737_v54 = vpop.f32.mrf.mxu3 }
 0x3e7   : > { %v3253_v11 = vmax.f32 %v3177_v45, 0.0  ;;  %v2958_v45 = vpack.c.b16 %v2941_v46, %v2940_v34 }
 0x3e8   : > { %v2738_v22 = vadd.f32 %v2737_v54, %v2649_v25  ;;  %v3306_v13 = vpack.c.bf16 %v3252_v52, %v3250_v20 }
 0x3e9   : > { %v3307_v19 = vpack.c.bf16 %v3253_v11, %v3251_v35 }
 0x3ea   : > { %v2783_v3 = vmax.f32 %v2738_v22, 0.0  ;;  %3492 = vmatmul.bf16.gmra.mxu2 %v3306_v13 }
 0x3eb   : > { %3581 = vmatmul.bf16.gmra.mxu3 %v3307_v19  ;;  %v3090_v29 = vpop.f32.mrf.mxu0  ;;  %v2942_v19 = vunpack.c.l.b16 %v8087_v0  ;;  %v6959_v0 = vld [vmem:[#allocation7 + $0x1d8] sm:$0xff] }
 0x3ec   : > { %v2815_v40 = vpack.c.bf16 %v2783_v3, %v2783_v3  ;;  %v3179_v44 = vpop.f32.mrf.mxu1  ;;  %v3091_v30 = vadd.f32 %v3090_v29, %v8476_v14  ;;  %v2943_v29 = vunpack.c.l.b16 %v8109_v56  ;;  %4407 = vmatpush.bf16.msra.mxu3 %v6959_v0 }
 0x3ed   : > { %v2651_v59 = vpop.f32.mrf.mxu2  ;;  %v3180_v17 = vadd.f32 %v3179_v44, %v8479_v51 }
 0x3ee   : > { %2847 = vst [vmem:[#allocation2 + $0x174] sm:$0xf] %v2815_v40  ;;  %v2652_v33 = vadd.f32 %v8380_v5, %v2651_v59  ;;  %v2740_v8 = vpop.f32.mrf.mxu3  ;;  %3129 = vmatmul.bf16.gmra.mxu0 %v2957_v27  ;;  %v3254_v31 = vmax.f32 %v3091_v30, 0.0  ;;  %v6951_v30 = vld [vmem:[#allocation7 + $0x198] sm:$0xff] }
 0x3ef   : > { %3218 = vmatmul.bf16.gmra.mxu1 %v2957_v27  ;;  %v3255_v21 = vmax.f32 %v3180_v17, 0.0  ;;  %4318 = vmatpush.bf16.msra.mxu2 %v6951_v30 }
 0x3f0   : > { %v2741_v26 = vadd.f32 %v2740_v8, %v2652_v33  ;;  %v2959_v8 = vpack.c.b16 %v2943_v29, %v2942_v19  ;;  %v8594_v29 = vld [vmem:[%s9048_s6 + $0x2] ss:$0 sm:$0xff] }
 0x3f2   : > { %v2784_v9 = vmax.f32 %v2741_v26, 0.0 }
 0x3f3   : > { %v3092_v38 = vpop.f32.mrf.mxu0 }
 0x3f4   : > { %v2816_v10 = vpack.c.bf16 %v2784_v9, %v2784_v9  ;;  %v3093_v55 = vadd.f32 %v3092_v38, %v8476_v14  ;;  %v3181_v36 = vpop.f32.mrf.mxu1 }
 0x3f5   : > { %v3182_v5 = vadd.f32 %v3181_v36, %v8479_v51  ;;  %v2653_v58 = vpop.f32.mrf.mxu2 }
 0x3f6   : > { %2848 = vst [vmem:[#allocation2 + $0x184] sm:$0xf] %v2816_v10  ;;  %v3256_v6 = vmax.f32 %v3093_v55, 0.0  ;;  %v2654_v63 = vadd.f32 %v8564_v47, %v2653_v58  ;;  %v2742_v37 = vpop.f32.mrf.mxu3 }
 0x3f7   : > { %v3257_v57 = vmax.f32 %v3182_v5, 0.0 }
 0x3f8   : > { %v2743_v60 = vadd.f32 %v2742_v37, %v2654_v63  ;;  %v3308_v62 = vpack.c.bf16 %v3256_v6, %v3254_v31 }
 0x3f9   : > { %v3309_v42 = vpack.c.bf16 %v3257_v57, %v3255_v21 }
 0x3fa   : > { %v2785_v43 = vmax.f32 %v2743_v60, 0.0  ;;  %3497 = vmatmul.bf16.gmra.mxu2 %v3308_v62 }
 0x3fb   : > { %3586 = vmatmul.bf16.gmra.mxu3 %v3309_v42  ;;  %v3095_v41 = vpop.f32.mrf.mxu0 }
 0x3fc   : > { %v2817_v24 = vpack.c.bf16 %v2785_v43, %v2785_v43  ;;  %v3184_v2 = vpop.f32.mrf.mxu1  ;;  %v3096_v25 = vadd.f32 %v3095_v41, %v8476_v14 }
 0x3fd   : > { %v2656_v16 = vpop.f32.mrf.mxu2  ;;  %v3185_v7 = vadd.f32 %v3184_v2, %v8479_v51 }
 0x3fe   : > { %2849 = vst [vmem:[#allocation2 + $0x194] sm:$0xf] %v2817_v24  ;;  %v2657_v20 = vadd.f32 %v8564_v47, %v2656_v16  ;;  %v2745_v52 = vpop.f32.mrf.mxu3  ;;  %3134 = vmatmul.bf16.gmra.mxu0 %v2958_v45  ;;  %v3258_v28 = vmax.f32 %v3096_v25, 0.0 }
 0x3ff   : > { %3223 = vmatmul.bf16.gmra.mxu1 %v2958_v45  ;;  %v3259_v15 = vmax.f32 %v3185_v7, 0.0 }
 0x400   : > { %v2746_v39 = vadd.f32 %v2745_v52, %v2657_v20  ;;  %v9095_v20 = vld [vmem:[#allocation10_spill] sm:$0xff] }
 0x402   : > { %v2786_v54 = vmax.f32 %v2746_v39, 0.0 }
 0x403   : > { %v3097_v18 = vpop.f32.mrf.mxu0 }
 0x404   : > { %v2818_v23 = vpack.c.bf16 %v2786_v54, %v2786_v54  ;;  %v3098_v1 = vadd.f32 %v3097_v18, %v8476_v14  ;;  %v3186_v35 = vpop.f32.mrf.mxu1 }
 0x405   : > { %v3187_v11 = vadd.f32 %v3186_v35, %v8479_v51  ;;  %v2658_v61 = vpop.f32.mrf.mxu2 }
 0x406   : > { %2850 = vst [vmem:[#allocation2 + $0x1a4] sm:$0xf] %v2818_v23  ;;  %v3260_v22 = vmax.f32 %v3098_v1, 0.0  ;;  %v2659_v13 = vadd.f32 %v8564_v47, %v2658_v61  ;;  %v2747_v12 = vpop.f32.mrf.mxu3 }
 0x407   : > { %v3261_v50 = vmax.f32 %v3187_v11, 0.0 }
 0x408   : > { %v2748_v48 = vadd.f32 %v2747_v12, %v2659_v13  ;;  %v3310_v3 = vpack.c.bf16 %v3260_v22, %v3258_v28 }
 0x409   : > { %v3311_v40 = vpack.c.bf16 %v3261_v50, %v3259_v15 }
 0x40a   : > { %v2787_v44 = vmax.f32 %v2748_v48, 0.0  ;;  %3502 = vmatmul.bf16.gmra.mxu2 %v3310_v3 }
 0x40b   : > { %3591 = vmatmul.bf16.gmra.mxu3 %v3311_v40  ;;  %v3100_v27 = vpop.f32.mrf.mxu0 }
 0x40c   : > { %v2819_v59 = vpack.c.bf16 %v2787_v44, %v2787_v44  ;;  %v3189_v33 = vpop.f32.mrf.mxu1  ;;  %v3101_v56 = vadd.f32 %v3100_v27, %v8476_v14 }
 0x40d   : > { %v2661_v32 = vpop.f32.mrf.mxu2  ;;  %v3190_v38 = vadd.f32 %v3189_v33, %v8479_v51 }
 0x40e   : > { %2851 = vst [vmem:[#allocation2 + $0x1b4] sm:$0xf] %v2819_v59  ;;  %v2662_v49 = vadd.f32 %v8564_v47, %v2661_v32  ;;  %v2750_v26 = vpop.f32.mrf.mxu3  ;;  %3139 = vmatmul.bf16.gmra.mxu0 %v2959_v8  ;;  %v3262_v6 = vmax.f32 %v3101_v56, 0.0  ;;  %v6950_v32 = vld [vmem:[#allocation7 + $0x190] sm:$0xff] }
 0x40f   : > { %3228 = vmatmul.bf16.gmra.mxu1 %v2959_v8  ;;  %v3263_v57 = vmax.f32 %v3190_v38, 0.0  ;;  %v9096_v8 = vld [vmem:[#allocation11_spill] sm:$0xff]  ;;  %4319 = vmatpush.bf16.msra.mxu2 %v6950_v32 }
 0x410   : > { %v2751_v9 = vadd.f32 %v2750_v26, %v2662_v49  ;;  %v6958_v49 = vld [vmem:[#allocation7 + $0x1d0] sm:$0xff] }
 0x411   : > { %4408 = vmatpush.bf16.msra.mxu3 %v6958_v49 }
 0x412   : > { %v2788_v17 = vmax.f32 %v2751_v9, 0.0 }
 0x413   : > { %v3102_v10 = vpop.f32.mrf.mxu0 }
 0x414   : > { %v2820_v55 = vpack.c.bf16 %v2788_v17, %v2788_v17  ;;  %v3103_v36 = vadd.f32 %v3102_v10, %v8476_v14  ;;  %v3191_v5 = vpop.f32.mrf.mxu1 }
 0x415   : > { %v3192_v58 = vadd.f32 %v3191_v5, %v8479_v51  ;;  %v2663_v31 = vpop.f32.mrf.mxu2 }
 0x416   : > { %2852 = vst [vmem:[#allocation2 + $0x1c4] sm:$0xf] %v2820_v55  ;;  %v3264_v63 = vmax.f32 %v3103_v36, 0.0  ;;  %v2664_v37 = vadd.f32 %v8564_v47, %v2663_v31  ;;  %v2752_v21 = vpop.f32.mrf.mxu3 }
 0x417   : > { %v3265_v34 = vmax.f32 %v3192_v58, 0.0 }
 0x418   : > { %v2753_v60 = vadd.f32 %v2752_v21, %v2664_v37  ;;  %v3312_v62 = vpack.c.bf16 %v3264_v63, %v3262_v6 }
 0x419   : > { %v3313_v46 = vpack.c.bf16 %v3265_v34, %v3263_v57 }
 0x41a   : > { %v2789_v42 = vmax.f32 %v2753_v60, 0.0  ;;  %3507 = vmatmul.bf16.gmra.mxu2 %v3312_v62 }
 0x41b   : > { %3596 = vmatmul.bf16.gmra.mxu3 %v3313_v46  ;;  %v3105_v43 = vpop.f32.mrf.mxu0 }
 0x41c   : > { %v2821_v41 = vpack.c.bf16 %v2789_v42, %v2789_v42  ;;  %v3194_v24 = vpop.f32.mrf.mxu1  ;;  %v3106_v39 = vadd.f32 %v3105_v43, %v8476_v14 }
 0x41d   : > { %v2666_v2 = vpop.f32.mrf.mxu2  ;;  %v3195_v54 = vadd.f32 %v3194_v24, %v8479_v51 }
 0x41e   : > { %2853 = vst [vmem:[#allocation2 + $0x1d4] sm:$0xf] %v2821_v41  ;;  %v2667_v45 = vadd.f32 %v8564_v47, %v2666_v2  ;;  %v2755_v16 = vpop.f32.mrf.mxu3  ;;  %3914 = vmatmul.bf16.vlgmr.msra.gmra.mxu0 %v9095_v20  ;;  %v3266_v61 = vmax.f32 %v3106_v39, 0.0  ;;  %v9097_v2 = vld [vmem:[#allocation12_spill] sm:$0xff] }
 0x41f   : > { %4003 = vmatmul.bf16.vlgmr.msra.gmra.mxu1 %v9095_v20  ;;  %v3267_v12 = vmax.f32 %v3195_v54, 0.0 }
 0x420   : > { %v2756_v52 = vadd.f32 %v2755_v16, %v2667_v45 }
 0x422   : > { %v2790_v25 = vmax.f32 %v2756_v52, 0.0 }
 0x423   : > { %v3107_v7 = vpop.f32.mrf.mxu0 }
 0x424   : > { %v2822_v18 = vpack.c.bf16 %v2790_v25, %v2790_v25  ;;  %v3108_v23 = vadd.f32 %v3107_v7, %v8476_v14  ;;  %v3196_v1 = vpop.f32.mrf.mxu1 }
 0x425   : > { %v3197_v35 = vadd.f32 %v3196_v1, %v8479_v51  ;;  %v2668_v11 = vpop.f32.mrf.mxu2 }
 0x426   : > { %2854 = vst [vmem:[#allocation2 + $0x1e4] sm:$0xf] %v2822_v18  ;;  %v3268_v28 = vmax.f32 %v3108_v23, 0.0  ;;  %v2669_v22 = vadd.f32 %v8564_v47, %v2668_v11  ;;  %v2757_v13 = vpop.f32.mrf.mxu3 }
 0x427   : > { %v3269_v15 = vmax.f32 %v3197_v35, 0.0 }
 0x428   : > { %v2758_v50 = vadd.f32 %v2757_v13, %v2669_v22  ;;  %v3314_v19 = vpack.c.bf16 %v3268_v28, %v3266_v61 }
 0x429   : > { %v3315_v48 = vpack.c.bf16 %v3269_v15, %v3267_v12 }
 0x42a   : > { %v2791_v3 = vmax.f32 %v2758_v50, 0.0  ;;  %3512 = vmatmul.bf16.gmra.mxu2 %v3314_v19 }
 0x42b   : > { %3601 = vmatmul.bf16.gmra.mxu3 %v3315_v48  ;;  %v3110_v40 = vpop.f32.mrf.mxu0 }
 0x42c   : > { %v2823_v44 = vpack.c.bf16 %v2791_v3, %v2791_v3  ;;  %v3199_v27 = vpop.f32.mrf.mxu1  ;;  %v3111_v30 = vadd.f32 %v3110_v40, %v8476_v14 }
 0x42d   : > { %v3473_v59 = vpop.f32.mrf.mxu2  ;;  %v3200_v9 = vadd.f32 %v3199_v27, %v8479_v51 }
 0x42e   : > { %2855 = vst [vmem:[#allocation2 + $0x1f4] sm:$0xf] %v2823_v44  ;;  %v3474_v47 = vadd.f32 %v8594_v29, %v3473_v59  ;;  %v3562_v33 = vpop.f32.mrf.mxu3  ;;  %3919 = vmatmul.bf16.gmra.mxu0 %v9096_v8  ;;  %v3270_v5 = vmax.f32 %v3111_v30, 0.0  ;;  %v9098_v59 = vld [vmem:[#allocation13_spill] sm:$0xff] }
 0x42f   : > { %4008 = vmatmul.bf16.gmra.mxu1 %v9096_v8  ;;  %v3271_v63 = vmax.f32 %v3200_v9, 0.0 }
 0x430   : > { %v3563_v26 = vadd.f32 %v3562_v33, %v3474_v47  ;;  %v6949_v47 = vld [vmem:[#allocation7 + $0x188] sm:$0xff] }
 0x431   : > { %v6957_v33 = vld [vmem:[#allocation7 + $0x1c8] sm:$0xff]  ;;  %4320 = vmatpush.bf16.msra.mxu2 %v6949_v47 }
 0x432   : > { %v3642_v0 = vmax.f32 %v3563_v26, 0.0  ;;  %4409 = vmatpush.bf16.msra.mxu3 %v6957_v33 }
 0x433   : > { %v3112_v56 = vpop.f32.mrf.mxu0 }
 0x434   : > { %v3674_v17 = vpack.c.bf16 %v3642_v0, %v3642_v0  ;;  %v3113_v38 = vadd.f32 %v3112_v56, %v8476_v14  ;;  %v3201_v10 = vpop.f32.mrf.mxu1 }
 0x435   : > { %v3202_v55 = vadd.f32 %v3201_v10, %v8479_v51  ;;  %v3475_v36 = vpop.f32.mrf.mxu2 }
 0x436   : > { %3706 = vst [vmem:[#allocation2 + $0x8] sm:$0xf] %v3674_v17  ;;  %v3272_v58 = vmax.f32 %v3113_v38, 0.0  ;;  %v3476_v31 = vadd.f32 %v8594_v29, %v3475_v36  ;;  %v3564_v6 = vpop.f32.mrf.mxu3 }
 0x437   : > { %v3273_v37 = vmax.f32 %v3202_v55, 0.0 }
 0x438   : > { %v3565_v21 = vadd.f32 %v3564_v6, %v3476_v31  ;;  %v3316_v57 = vpack.c.bf16 %v3272_v58, %v3270_v5 }
 0x439   : > { %v3317_v34 = vpack.c.bf16 %v3273_v37, %v3271_v63 }
 0x43a   : > { %v3643_v60 = vmax.f32 %v3565_v21, 0.0  ;;  %3517 = vmatmul.bf16.gmra.mxu2 %v3316_v57 }
 0x43b   : > { %3606 = vmatmul.bf16.gmra.mxu3 %v3317_v34  ;;  %v3115_v62 = vpop.f32.mrf.mxu0 }
 0x43c   : > { %v3675_v46 = vpack.c.bf16 %v3643_v60, %v3643_v60  ;;  %v3204_v42 = vpop.f32.mrf.mxu1  ;;  %v3116_v16 = vadd.f32 %v3115_v62, %v8476_v14 }
 0x43d   : > { %v3478_v43 = vpop.f32.mrf.mxu2  ;;  %v3205_v52 = vadd.f32 %v3204_v42, %v8479_v51 }
 0x43e   : > { %3707 = vst [vmem:[#allocation2 + $0x18] sm:$0xf] %v3675_v46  ;;  %v3479_v41 = vadd.f32 %v8594_v29, %v3478_v43  ;;  %v3567_v24 = vpop.f32.mrf.mxu3  ;;  %3924 = vmatmul.bf16.gmra.mxu0 %v9097_v2  ;;  %v3274_v1 = vmax.f32 %v3116_v16, 0.0  ;;  %v9099_v43 = vld [vmem:[#allocation14_spill] sm:$0xff] }
 0x43f   : > { %4013 = vmatmul.bf16.gmra.mxu1 %v9097_v2  ;;  %v3275_v28 = vmax.f32 %v3205_v52, 0.0 }
 0x440   : > { %v3568_v45 = vadd.f32 %v3567_v24, %v3479_v41 }
 0x442   : > { %v3644_v20 = vmax.f32 %v3568_v45, 0.0 }
 0x443   : > { %v3117_v39 = vpop.f32.mrf.mxu0 }
 0x444   : > { %v3676_v25 = vpack.c.bf16 %v3644_v20, %v3644_v20  ;;  %v3118_v54 = vadd.f32 %v3117_v39, %v8476_v14  ;;  %v3206_v7 = vpop.f32.mrf.mxu1 }
 0x445   : > { %v3207_v18 = vadd.f32 %v3206_v7, %v8479_v51  ;;  %v3480_v23 = vpop.f32.mrf.mxu2 }
 0x446   : > { %3708 = vst [vmem:[#allocation2 + $0x28] sm:$0xf] %v3676_v25  ;;  %v3276_v35 = vmax.f32 %v3118_v54, 0.0  ;;  %v3481_v11 = vadd.f32 %v8594_v29, %v3480_v23  ;;  %v3569_v61 = vpop.f32.mrf.mxu3 }
 0x447   : > { %v3277_v22 = vmax.f32 %v3207_v18, 0.0 }
 0x448   : > { %v3570_v13 = vadd.f32 %v3569_v61, %v3481_v11  ;;  %v3318_v12 = vpack.c.bf16 %v3276_v35, %v3274_v1 }
 0x449   : > { %v3319_v15 = vpack.c.bf16 %v3277_v22, %v3275_v28 }
 0x44a   : > { %v3645_v50 = vmax.f32 %v3570_v13, 0.0  ;;  %3522 = vmatmul.bf16.gmra.mxu2 %v3318_v12 }
 0x44b   : > { %3611 = vmatmul.bf16.gmra.mxu3 %v3319_v15  ;;  %v3120_v19 = vpop.f32.mrf.mxu0 }
 0x44c   : > { %v3677_v48 = vpack.c.bf16 %v3645_v50, %v3645_v50  ;;  %v3209_v3 = vpop.f32.mrf.mxu1  ;;  %v3121_v32 = vadd.f32 %v3120_v19, %v8476_v14 }
 0x44d   : > { %v3483_v40 = vpop.f32.mrf.mxu2  ;;  %v3210_v26 = vadd.f32 %v3209_v3, %v8479_v51 }
 0x44e   : > { %3709 = vst [vmem:[#allocation2 + $0x38] sm:$0xf] %v3677_v48  ;;  %v3484_v44 = vadd.f32 %v8594_v29, %v3483_v40  ;;  %v3572_v27 = vpop.f32.mrf.mxu3  ;;  %3929 = vmatmul.bf16.gmra.mxu0 %v9098_v59  ;;  %v3278_v10 = vmax.f32 %v3121_v32, 0.0  ;;  %v9100_v40 = vld [vmem:[#allocation15_spill] sm:$0xff] }
 0x44f   : > { %4018 = vmatmul.bf16.gmra.mxu1 %v9098_v59  ;;  %v3279_v58 = vmax.f32 %v3210_v26, 0.0 }
 0x450   : > { %v3573_v8 = vadd.f32 %v3572_v27, %v3484_v44  ;;  %v6948_v44 = vld [vmem:[#allocation7 + $0x180] sm:$0xff] }
 0x451   : > { %v6956_v27 = vld [vmem:[#allocation7 + $0x1c0] sm:$0xff]  ;;  %4321 = vmatpush.bf16.msra.mxu2 %v6948_v44 }
 0x452   : > { %v3646_v49 = vmax.f32 %v3573_v8, 0.0  ;;  %4410 = vmatpush.bf16.msra.mxu3 %v6956_v27 }
 0x453   : > { %v3122_v30 = vpop.f32.mrf.mxu0 }
 0x454   : > { %v3678_v0 = vpack.c.bf16 %v3646_v49, %v3646_v49  ;;  %v3123_v9 = vadd.f32 %v3122_v30, %v8476_v14  ;;  %v3211_v56 = vpop.f32.mrf.mxu1 }
 0x455   : > { %v3212_v17 = vadd.f32 %v3211_v56, %v8479_v51  ;;  %v3485_v38 = vpop.f32.mrf.mxu2 }
 0x456   : > { %3710 = vst [vmem:[#allocation2 + $0x48] sm:$0xf] %v3678_v0  ;;  %v3280_v55 = vmax.f32 %v3123_v9, 0.0  ;;  %v3486_v36 = vadd.f32 %v8594_v29, %v3485_v38  ;;  %v3574_v5 = vpop.f32.mrf.mxu3 }
 0x457   : > { %v3281_v31 = vmax.f32 %v3212_v17, 0.0 }
 0x458   : > { %v3575_v6 = vadd.f32 %v3574_v5, %v3486_v36  ;;  %v3320_v63 = vpack.c.bf16 %v3280_v55, %v3278_v10 }
 0x459   : > { %v3321_v37 = vpack.c.bf16 %v3281_v31, %v3279_v58 }
 0x45a   : > { %v3647_v21 = vmax.f32 %v3575_v6, 0.0  ;;  %3527 = vmatmul.bf16.gmra.mxu2 %v3320_v63 }
 0x45b   : > { %3616 = vmatmul.bf16.gmra.mxu3 %v3321_v37  ;;  %v3125_v57 = vpop.f32.mrf.mxu0 }
 0x45c   : > { %v3679_v34 = vpack.c.bf16 %v3647_v21, %v3647_v21  ;;  %v3214_v60 = vpop.f32.mrf.mxu1  ;;  %v3126_v24 = vadd.f32 %v3125_v57, %v8476_v14 }
 0x45d   : > { %v3488_v62 = vpop.f32.mrf.mxu2  ;;  %v3215_v45 = vadd.f32 %v3214_v60, %v8479_v51 }
 0x45e   : > { %3711 = vst [vmem:[#allocation2 + $0x58] sm:$0xf] %v3679_v34  ;;  %v3489_v46 = vadd.f32 %v8594_v29, %v3488_v62  ;;  %v3577_v42 = vpop.f32.mrf.mxu3  ;;  %3934 = vmatmul.bf16.gmra.mxu0 %v9099_v43  ;;  %v3282_v7 = vmax.f32 %v3126_v24, 0.0  ;;  %v9101_v62 = vld [vmem:[#allocation16_spill] sm:$0xff] }
 0x45f   : > { %4023 = vmatmul.bf16.gmra.mxu1 %v9099_v43  ;;  %v3283_v35 = vmax.f32 %v3215_v45, 0.0 }
 0x460   : > { %v3578_v41 = vadd.f32 %v3577_v42, %v3489_v46 }
 0x462   : > { %v3648_v2 = vmax.f32 %v3578_v41, 0.0 }
 0x463   : > { %v3127_v16 = vpop.f32.mrf.mxu0 }
 0x464   : > { %v3680_v20 = vpack.c.bf16 %v3648_v2, %v3648_v2  ;;  %v3128_v52 = vadd.f32 %v3127_v16, %v8476_v14  ;;  %v3216_v39 = vpop.f32.mrf.mxu1 }
 0x465   : > { %v3217_v25 = vadd.f32 %v3216_v39, %v8479_v51  ;;  %v3490_v54 = vpop.f32.mrf.mxu2 }
 0x466   : > { %3712 = vst [vmem:[#allocation2 + $0x68] sm:$0xf] %v3680_v20  ;;  %v3284_v18 = vmax.f32 %v3128_v52, 0.0  ;;  %v3491_v23 = vadd.f32 %v8594_v29, %v3490_v54  ;;  %v3579_v1 = vpop.f32.mrf.mxu3 }
 0x467   : > { %v3285_v11 = vmax.f32 %v3217_v25, 0.0 }
 0x468   : > { %v3580_v61 = vadd.f32 %v3579_v1, %v3491_v23  ;;  %v3322_v28 = vpack.c.bf16 %v3284_v18, %v3282_v7 }
 0x469   : > { %v3323_v22 = vpack.c.bf16 %v3285_v11, %v3283_v35 }
 0x46a   : > { %v3649_v13 = vmax.f32 %v3580_v61, 0.0  ;;  %3532 = vmatmul.bf16.gmra.mxu2 %v3322_v28 }
 0x46b   : > { %3621 = vmatmul.bf16.gmra.mxu3 %v3323_v22  ;;  %v3130_v12 = vpop.f32.mrf.mxu0 }
 0x46c   : > { %v3681_v15 = vpack.c.bf16 %v3649_v13, %v3649_v13  ;;  %v3219_v50 = vpop.f32.mrf.mxu1  ;;  %v3131_v47 = vadd.f32 %v3130_v12, %v8476_v14 }
 0x46d   : > { %v3493_v19 = vpop.f32.mrf.mxu2  ;;  %v3220_v8 = vadd.f32 %v3219_v50, %v8479_v51 }
 0x46e   : > { %3713 = vst [vmem:[#allocation2 + $0x78] sm:$0xf] %v3681_v15  ;;  %v3494_v48 = vadd.f32 %v8594_v29, %v3493_v19  ;;  %v3582_v3 = vpop.f32.mrf.mxu3  ;;  %3939 = vmatmul.bf16.gmra.mxu0 %v9100_v40  ;;  %v3286_v56 = vmax.f32 %v3131_v47, 0.0  ;;  %v9102_v19 = vld [vmem:[#allocation17_spill] sm:$0xff] }
 0x46f   : > { %4028 = vmatmul.bf16.gmra.mxu1 %v9100_v40  ;;  %v3287_v55 = vmax.f32 %v3220_v8, 0.0  ;;  %v7059_v40 = vld [vmem:[%s9049_s7 + $0xf8] sm:$0xff] }
 0x470   : > { %v3583_v59 = vadd.f32 %v3582_v3, %v3494_v48  ;;  %v7051_v48 = vld [vmem:[%s9049_s7 + $0xb8] sm:$0xff]  ;;  %5499 = vmatpush.bf16.msrb.mxu3 %v7059_v40  ;;  %v7058_v40 = vld [vmem:[%s9049_s7 + $0xf0] sm:$0xff] }
 0x471   : > { %v7035_v3 = vld [vmem:[%s9049_s7 + $0x38] sm:$0xff]  ;;  %5410 = vmatpush.bf16.msrb.mxu2 %v7051_v48  ;;  %v7050_v48 = vld [vmem:[%s9049_s7 + $0xb0] sm:$0xff] }
 0x472   : > { %v3650_v33 = vmax.f32 %v3583_v59, 0.0  ;;  %5232 = vmatpush.bf16.msrb.mxu0 %v7035_v3  ;;  %v7034_v3 = vld [vmem:[%s9049_s7 + $0x30] sm:$0xff] }
 0x473   : > { %v3132_v32 = vpop.f32.mrf.mxu0 }
 0x474   : > { %v3682_v49 = vpack.c.bf16 %v3650_v33, %v3650_v33  ;;  %v3133_v26 = vadd.f32 %v3132_v32, %v8476_v14  ;;  %v3221_v30 = vpop.f32.mrf.mxu1  ;;  %5500 = vmatpush.bf16.msrb.mxu3 %v7058_v40 }
 0x475   : > { %v3222_v0 = vadd.f32 %v3221_v30, %v8479_v51  ;;  %v3495_v9 = vpop.f32.mrf.mxu2  ;;  %5411 = vmatpush.bf16.msrb.mxu2 %v7050_v48  ;;  %v7033_v48 = vld [vmem:[%s9049_s7 + $0x28] sm:$0xff] }
 0x476   : > { %3714 = vst [vmem:[#allocation2 + $0x88] sm:$0xf] %v3682_v49  ;;  %v3288_v17 = vmax.f32 %v3133_v26, 0.0  ;;  %v3496_v38 = vadd.f32 %v8594_v29, %v3495_v9  ;;  %v3584_v10 = vpop.f32.mrf.mxu3  ;;  %5233 = vmatpush.bf16.msrb.mxu0 %v7034_v3  ;;  %v7057_v3 = vld [vmem:[%s9049_s7 + $0xe8] sm:$0xff] }
 0x477   : > { %v3289_v36 = vmax.f32 %v3222_v0, 0.0 }
 0x478   : > { %v3585_v5 = vadd.f32 %v3584_v10, %v3496_v38  ;;  %v3324_v58 = vpack.c.bf16 %v3288_v17, %v3286_v56  ;;  %v7043_v38 = vld [vmem:[%s9049_s7 + $0x78] sm:$0xff]  ;;  %5501 = vmatpush.bf16.msrb.mxu3 %v7057_v3  ;;  %v7056_v3 = vld [vmem:[%s9049_s7 + $0xe0] sm:$0xff] }
 0x479   : > { %v3325_v31 = vpack.c.bf16 %v3289_v36, %v3287_v55  ;;  %5321 = vmatpush.bf16.msrb.mxu1 %v7043_v38  ;;  %v7042_v38 = vld [vmem:[%s9049_s7 + $0x70] sm:$0xff] }
 0x47a   : > { %v3651_v6 = vmax.f32 %v3585_v5, 0.0  ;;  %3537 = vmatmul.bf16.gmra.mxu2 %v3324_v58  ;;  %5234 = vmatpush.bf16.msrb.mxu0 %v7033_v48  ;;  %v7048_v48 = vld [vmem:[%s9049_s7 + $0xa0] sm:$0xff] }
 0x47b   : > { %3626 = vmatmul.bf16.gmra.mxu3 %v3325_v31  ;;  %v3135_v63 = vpop.f32.mrf.mxu0 }
 0x47c   : > { %v3683_v37 = vpack.c.bf16 %v3651_v6, %v3651_v6  ;;  %v3224_v21 = vpop.f32.mrf.mxu1  ;;  %v3136_v42 = vadd.f32 %v3135_v63, %v8476_v14  ;;  %5502 = vmatpush.bf16.msrb.mxu3 %v7056_v3 }
 0x47d   : > { %v3498_v57 = vpop.f32.mrf.mxu2  ;;  %v3225_v41 = vadd.f32 %v3224_v21, %v8479_v51  ;;  %5322 = vmatpush.bf16.msrb.mxu1 %v7042_v38 }
 0x47e   : > { %3715 = vst [vmem:[#allocation2 + $0x98] sm:$0xf] %v3683_v37  ;;  %v3499_v34 = vadd.f32 %v8594_v29, %v3498_v57  ;;  %v3587_v60 = vpop.f32.mrf.mxu3  ;;  %3944 = vmatmul.bf16.gmra.mxu0 %v9101_v62  ;;  %v3290_v39 = vmax.f32 %v3136_v42, 0.0 }
 0x47f   : > { %4033 = vmatmul.bf16.gmra.mxu1 %v9101_v62  ;;  %v3291_v18 = vmax.f32 %v3225_v41, 0.0 }
 0x480   : > { %v3588_v46 = vadd.f32 %v3587_v60, %v3499_v34  ;;  %v9103_v60 = vld [vmem:[#allocation18_spill] sm:$0xff] }
 0x482   : > { %v3652_v43 = vmax.f32 %v3588_v46, 0.0 }
 0x483   : > { %v3137_v24 = vpop.f32.mrf.mxu0 }
 0x484   : > { %v3684_v2 = vpack.c.bf16 %v3652_v43, %v3652_v43  ;;  %v3138_v45 = vadd.f32 %v3137_v24, %v8476_v14  ;;  %v3226_v16 = vpop.f32.mrf.mxu1 }
 0x485   : > { %v3227_v20 = vadd.f32 %v3226_v16, %v8479_v51  ;;  %v3500_v52 = vpop.f32.mrf.mxu2 }
 0x486   : > { %3716 = vst [vmem:[#allocation2 + $0xa8] sm:$0xf] %v3684_v2  ;;  %v3292_v25 = vmax.f32 %v3138_v45, 0.0  ;;  %v3501_v54 = vadd.f32 %v8594_v29, %v3500_v52  ;;  %v3589_v7 = vpop.f32.mrf.mxu3 }
 0x487   : > { %v3293_v23 = vmax.f32 %v3227_v20, 0.0 }
 0x488   : > { %v3590_v1 = vadd.f32 %v3589_v7, %v3501_v54  ;;  %v3326_v35 = vpack.c.bf16 %v3292_v25, %v3290_v39 }
 0x489   : > { %v3327_v11 = vpack.c.bf16 %v3293_v23, %v3291_v18 }
 0x48a   : > { %v3653_v61 = vmax.f32 %v3590_v1, 0.0  ;;  %3542 = vmatmul.bf16.gmra.mxu2 %v3326_v35 }
 0x48b   : > { %3631 = vmatmul.bf16.gmra.mxu3 %v3327_v11  ;;  %v3140_v28 = vpop.f32.mrf.mxu0 }
 0x48c   : > { %v3685_v22 = vpack.c.bf16 %v3653_v61, %v3653_v61  ;;  %v3229_v13 = vpop.f32.mrf.mxu1  ;;  %v3141_v27 = vadd.f32 %v3140_v28, %v8476_v14 }
 0x48d   : > { %v3503_v12 = vpop.f32.mrf.mxu2  ;;  %v3230_v47 = vadd.f32 %v3229_v13, %v8479_v51 }
 0x48e   : > { %3717 = vst [vmem:[#allocation2 + $0xb8] sm:$0xf] %v3685_v22  ;;  %v3504_v15 = vadd.f32 %v8594_v29, %v3503_v12  ;;  %v3592_v50 = vpop.f32.mrf.mxu3  ;;  %3949 = vmatmul.bf16.gmra.mxu0 %v9102_v19  ;;  %v3294_v0 = vmax.f32 %v3141_v27, 0.0 }
 0x48f   : > { %4038 = vmatmul.bf16.gmra.mxu1 %v9102_v19  ;;  %v3295_v10 = vmax.f32 %v3230_v47, 0.0  ;;  %v9104_v19 = vld [vmem:[#allocation19_spill] sm:$0xff] }
 0x490   : > { %v3593_v44 = vadd.f32 %v3592_v50, %v3504_v15 }
 0x492   : > { %v3654_v59 = vmax.f32 %v3593_v44, 0.0 }
 0x493   : > { %v3142_v33 = vpop.f32.mrf.mxu0 }
 0x494   : > { %v3686_v8 = vpack.c.bf16 %v3654_v59, %v3654_v59  ;;  %v3143_v32 = vadd.f32 %v3142_v33, %v8476_v14  ;;  %v3231_v49 = vpop.f32.mrf.mxu1 }
 0x495   : > { %v3232_v26 = vadd.f32 %v3231_v49, %v8479_v51  ;;  %v3505_v30 = vpop.f32.mrf.mxu2  ;;  %v3756_v51 = vld [vmem:[#allocation5 + $0x6] sm:$0x3] }
 0x496   : > { %3718 = vst [vmem:[#allocation2 + $0xc8] sm:$0xf] %v3686_v8  ;;  %v3296_v9 = vmax.f32 %v3143_v32, 0.0  ;;  %v3506_v56 = vadd.f32 %v8594_v29, %v3505_v30  ;;  %v3594_v17 = vpop.f32.mrf.mxu3  ;;  %v8664_v21 = vperm.slane %v3756_v51, 0  ;;  %v8668_v62 = vperm.slane %v3756_v51, 1 }
 0x497   : > { %v3297_v55 = vmax.f32 %v3232_v26, 0.0 }
 0x498   : > { %v3595_v36 = vadd.f32 %v3594_v17, %v3506_v56  ;;  %v3328_v5 = vpack.c.bf16 %v3296_v9, %v3294_v0 }
 0x499   : > { %v3329_v14 = vpack.c.bf16 %v3297_v55, %v3295_v10 }
 0x49a   : > { %v3655_v58 = vmax.f32 %v3595_v36, 0.0  ;;  %3547 = vmatmul.bf16.gmra.mxu2 %v3328_v5 }
 0x49b   : > { %3636 = vmatmul.bf16.gmra.mxu3 %v3329_v14  ;;  %v3915_v31 = vpop.f32.mrf.mxu0 }
 0x49c   : > { %v3687_v6 = vpack.c.bf16 %v3655_v58, %v3655_v58  ;;  %v4004_v63 = vpop.f32.mrf.mxu1  ;;  %v3916_v42 = vadd.f32 %v3915_v31, %v8664_v21 }
 0x49d   : > { %v3508_v37 = vpop.f32.mrf.mxu2  ;;  %v4005_v41 = vadd.f32 %v4004_v63, %v8668_v62 }
 0x49e   : > { %3719 = vst [vmem:[#allocation2 + $0xd8] sm:$0xf] %v3687_v6  ;;  %v3509_v57 = vadd.f32 %v8594_v29, %v3508_v37  ;;  %v3597_v34 = vpop.f32.mrf.mxu3  ;;  %3954 = vmatmul.bf16.gmra.mxu0 %v9103_v60  ;;  %v4084_v39 = vmax.f32 %v3916_v42, 0.0 }
 0x49f   : > { %4043 = vmatmul.bf16.gmra.mxu1 %v9103_v60  ;;  %v4085_v18 = vmax.f32 %v4005_v41, 0.0 }
 0x4a0   : > { %v3598_v46 = vadd.f32 %v3597_v34, %v3509_v57  ;;  %v9105_v34 = vld [vmem:[#allocation21_spill] sm:$0xff] }
 0x4a2   : > { %v3656_v43 = vmax.f32 %v3598_v46, 0.0 }
 0x4a3   : > { %v3917_v24 = vpop.f32.mrf.mxu0 }
 0x4a4   : > { %v3688_v2 = vpack.c.bf16 %v3656_v43, %v3656_v43  ;;  %v3918_v45 = vadd.f32 %v3917_v24, %v8664_v21  ;;  %v4006_v16 = vpop.f32.mrf.mxu1 }
 0x4a5   : > { %v4007_v20 = vadd.f32 %v4006_v16, %v8668_v62  ;;  %v3510_v52 = vpop.f32.mrf.mxu2 }
 0x4a6   : > { %3720 = vst [vmem:[#allocation2 + $0xe8] sm:$0xf] %v3688_v2  ;;  %v4086_v25 = vmax.f32 %v3918_v45, 0.0  ;;  %v3511_v54 = vadd.f32 %v8594_v29, %v3510_v52  ;;  %v3599_v7 = vpop.f32.mrf.mxu3 }
 0x4a7   : > { %v4087_v23 = vmax.f32 %v4007_v20, 0.0 }
 0x4a8   : > { %v4148_v1 = vpack.c.bf16 %v4086_v25, %v4084_v39  ;;  %v3600_v35 = vadd.f32 %v3599_v7, %v3511_v54 }
 0x4a9   : > { %v4149_v11 = vpack.c.bf16 %v4087_v23, %v4085_v18 }
 0x4aa   : > { %v3657_v61 = vmax.f32 %v3600_v35, 0.0  ;;  %4322 = vmatmul.bf16.vlgmr.msra.gmra.mxu2 %v4148_v1 }
 0x4ab   : > { %4411 = vmatmul.bf16.vlgmr.msra.gmra.mxu3 %v4149_v11  ;;  %v3920_v28 = vpop.f32.mrf.mxu0 }
 0x4ac   : > { %v3689_v22 = vpack.c.bf16 %v3657_v61, %v3657_v61  ;;  %v4009_v13 = vpop.f32.mrf.mxu1  ;;  %v3921_v27 = vadd.f32 %v3920_v28, %v8664_v21 }
 0x4ad   : > { %v3513_v12 = vpop.f32.mrf.mxu2  ;;  %v4010_v47 = vadd.f32 %v4009_v13, %v8668_v62 }
 0x4ae   : > { %3721 = vst [vmem:[#allocation2 + $0xf8] sm:$0xf] %v3689_v22  ;;  %v3514_v15 = vadd.f32 %v8594_v29, %v3513_v12  ;;  %v3602_v50 = vpop.f32.mrf.mxu3  ;;  %3959 = vmatmul.bf16.gmra.mxu0 %v9104_v19  ;;  %v4088_v0 = vmax.f32 %v3921_v27, 0.0 }
 0x4af   : > { %4048 = vmatmul.bf16.gmra.mxu1 %v9104_v19  ;;  %v4089_v10 = vmax.f32 %v4010_v47, 0.0  ;;  %v7049_v19 = vld [vmem:[%s9049_s7 + $0xa8] sm:$0xff] }
 0x4b0   : > { %v3603_v44 = vadd.f32 %v3602_v50, %v3514_v15  ;;  %v9106_v50 = vld [vmem:[#allocation23_spill] sm:$0xff]  ;;  %5412 = vmatpush.bf16.msrb.mxu2 %v7049_v19 }
 0x4b1   : > { %v9108_v19 = vld [vmem:[#allocation27_spill] sm:$0xff] }
 0x4b2   : > { %v3658_v59 = vmax.f32 %v3603_v44, 0.0 }
 0x4b3   : > { %v3922_v33 = vpop.f32.mrf.mxu0 }
 0x4b4   : > { %v3690_v8 = vpack.c.bf16 %v3658_v59, %v3658_v59  ;;  %v3923_v32 = vadd.f32 %v3922_v33, %v8664_v21  ;;  %v4011_v49 = vpop.f32.mrf.mxu1  ;;  %5413 = vmatpush.bf16.msrb.mxu2 %v7048_v48  ;;  %v7110_v48 = vld [vmem:[%s9048_s6 + $0x2] ss:$0 sm:$0xff] }
 0x4b5   : > { %v4012_v26 = vadd.f32 %v4011_v49, %v8668_v62  ;;  %v3515_v30 = vpop.f32.mrf.mxu2 }
 0x4b6   : > { %3722 = vst [vmem:[#allocation2 + $0x108] sm:$0xf] %v3690_v8  ;;  %v4090_v9 = vmax.f32 %v3923_v32, 0.0  ;;  %v3516_v56 = vadd.f32 %v8594_v29, %v3515_v30  ;;  %v3604_v17 = vpop.f32.mrf.mxu3 }
 0x4b7   : > { %v4091_v55 = vmax.f32 %v4012_v26, 0.0 }
 0x4b8   : > { %v3605_v36 = vadd.f32 %v3604_v17, %v3516_v56  ;;  %v4150_v5 = vpack.c.bf16 %v4090_v9, %v4088_v0  ;;  %v7041_v17 = vld [vmem:[%s9049_s7 + $0x68] sm:$0xff] }
 0x4b9   : > { %v4151_v14 = vpack.c.bf16 %v4091_v55, %v4089_v10  ;;  %5323 = vmatpush.bf16.msrb.mxu1 %v7041_v17 }
 0x4ba   : > { %v3659_v58 = vmax.f32 %v3605_v36, 0.0  ;;  %4327 = vmatmul.bf16.gmra.mxu2 %v4150_v5 }
 0x4bb   : > { %4416 = vmatmul.bf16.gmra.mxu3 %v4151_v14  ;;  %v3925_v51 = vpop.f32.mrf.mxu0 }
 0x4bc   : > { %v3691_v31 = vpack.c.bf16 %v3659_v58, %v3659_v58  ;;  %v4014_v6 = vpop.f32.mrf.mxu1  ;;  %v3926_v46 = vadd.f32 %v3925_v51, %v8664_v21 }
 0x4bd   : > { %v3518_v63 = vpop.f32.mrf.mxu2  ;;  %v4015_v43 = vadd.f32 %v4014_v6, %v8668_v62 }
 0x4be   : > { %3723 = vst [vmem:[#allocation2 + $0x118] sm:$0xf] %v3691_v31  ;;  %v3519_v37 = vadd.f32 %v8594_v29, %v3518_v63  ;;  %v3607_v57 = vpop.f32.mrf.mxu3  ;;  %3964 = vmatmul.bf16.gmra.mxu0 %v9105_v34  ;;  %v4092_v52 = vmax.f32 %v3926_v46, 0.0 }
 0x4bf   : > { %4053 = vmatmul.bf16.gmra.mxu1 %v9105_v34  ;;  %v4093_v7 = vmax.f32 %v4015_v43, 0.0 }
 0x4c0   : > { %v3608_v60 = vadd.f32 %v3607_v57, %v3519_v37  ;;  %v9107_v57 = vld [vmem:[#allocation25_spill] sm:$0xff] }
 0x4c2   : > { %v3660_v42 = vmax.f32 %v3608_v60, 0.0 }
 0x4c3   : > { %v3927_v41 = vpop.f32.mrf.mxu0 }
 0x4c4   : > { %v3692_v24 = vpack.c.bf16 %v3660_v42, %v3660_v42  ;;  %v3928_v2 = vadd.f32 %v3927_v41, %v8664_v21  ;;  %v4016_v45 = vpop.f32.mrf.mxu1 }
 0x4c5   : > { %v4017_v16 = vadd.f32 %v4016_v45, %v8668_v62  ;;  %v3520_v20 = vpop.f32.mrf.mxu2 }
 0x4c6   : > { %3724 = vst [vmem:[#allocation2 + $0x128] sm:$0xf] %v3692_v24  ;;  %v4094_v39 = vmax.f32 %v3928_v2, 0.0  ;;  %v3521_v25 = vadd.f32 %v8594_v29, %v3520_v20  ;;  %v3609_v54 = vpop.f32.mrf.mxu3 }
 0x4c7   : > { %v4095_v18 = vmax.f32 %v4017_v16, 0.0 }
 0x4c8   : > { %v3610_v23 = vadd.f32 %v3609_v54, %v3521_v25  ;;  %v4152_v1 = vpack.c.bf16 %v4094_v39, %v4092_v52 }
 0x4c9   : > { %v4153_v35 = vpack.c.bf16 %v4095_v18, %v4093_v7 }
 0x4ca   : > { %v3661_v11 = vmax.f32 %v3610_v23, 0.0  ;;  %4332 = vmatmul.bf16.gmra.mxu2 %v4152_v1 }
 0x4cb   : > { %4421 = vmatmul.bf16.gmra.mxu3 %v4153_v35  ;;  %v3930_v61 = vpop.f32.mrf.mxu0 }
 0x4cc   : > { %v3693_v28 = vpack.c.bf16 %v3661_v11, %v3661_v11  ;;  %v4019_v22 = vpop.f32.mrf.mxu1  ;;  %v3931_v44 = vadd.f32 %v3930_v61, %v8664_v21  ;;  %v7032_v61 = vld [vmem:[%s9049_s7 + $0x20] sm:$0xff] }
 0x4cd   : > { %v3523_v13 = vpop.f32.mrf.mxu2  ;;  %v4020_v59 = vadd.f32 %v4019_v22, %v8668_v62  ;;  %5235 = vmatpush.bf16.msrb.mxu0 %v7032_v61 }
 0x4ce   : > { %3725 = vst [vmem:[#allocation2 + $0x138] sm:$0xf] %v3693_v28  ;;  %v3524_v12 = vadd.f32 %v8594_v29, %v3523_v13  ;;  %v3612_v15 = vpop.f32.mrf.mxu3  ;;  %3969 = vmatmul.bf16.gmra.mxu0 %v9106_v50  ;;  %v4096_v30 = vmax.f32 %v3931_v44, 0.0  ;;  %v7040_v28 = vld [vmem:[%s9049_s7 + $0x60] sm:$0xff]  ;;  %v7039_v44 = vld [vmem:[%s9049_s7 + $0x58] sm:$0xff] }
 0x4cf   : > { %4058 = vmatmul.bf16.gmra.mxu1 %v9106_v50  ;;  %v4097_v38 = vmax.f32 %v4020_v59, 0.0 }
 0x4d0   : > { %v3613_v40 = vadd.f32 %v3612_v15, %v3524_v12  ;;  %5324 = vmatpush.bf16.msrb.mxu1 %v7040_v28 }
 0x4d2   : > { %v3662_v27 = vmax.f32 %v3613_v40, 0.0  ;;  %v7031_v40 = vld [vmem:[%s9049_s7 + $0x18] sm:$0xff] }
 0x4d3   : > { %v3932_v47 = vpop.f32.mrf.mxu0  ;;  %5236 = vmatpush.bf16.msrb.mxu0 %v7031_v40  ;;  %v7047_v40 = vld [vmem:[%s9049_s7 + $0x98] sm:$0xff] }
 0x4d4   : > { %v3694_v33 = vpack.c.bf16 %v3662_v27, %v3662_v27  ;;  %v3933_v8 = vadd.f32 %v3932_v47, %v8664_v21  ;;  %v4021_v32 = vpop.f32.mrf.mxu1  ;;  %5325 = vmatpush.bf16.msrb.mxu1 %v7039_v44  ;;  %v7055_v44 = vld [vmem:[%s9049_s7 + $0xd8] sm:$0xff]  ;;  %5414 = vmatpush.bf16.msrb.mxu2 %v7047_v40  ;;  %v6968_v40 = vld [vmem:[#allocation2 + $0x24] sm:$0xf] }
 0x4d5   : > { %v4022_v49 = vadd.f32 %v4021_v32, %v8668_v62  ;;  %v3525_v26 = vpop.f32.mrf.mxu2  ;;  %v7030_v32 = vld [vmem:[%s9049_s7 + $0x10] sm:$0xff]  ;;  %5503 = vmatpush.bf16.msrb.mxu3 %v7055_v44 }
 0x4d6   : > { %3726 = vst [vmem:[#allocation2 + $0x148] sm:$0xf] %v3694_v33  ;;  %v4098_v0 = vmax.f32 %v3933_v8, 0.0  ;;  %v3526_v9 = vadd.f32 %v8594_v29, %v3525_v26  ;;  %v3614_v56 = vpop.f32.mrf.mxu3 }
 0x4d7   : > { %v4099_v10 = vmax.f32 %v4022_v49, 0.0  ;;  %v7038_v49 = vld [vmem:[%s9049_s7 + $0x50] sm:$0xff]  ;;  %5237 = vmatpush.bf16.msrb.mxu0 %v7030_v32 }
 0x4d8   : > { %v3615_v55 = vadd.f32 %v3614_v56, %v3526_v9  ;;  %v4154_v36 = vpack.c.bf16 %v4098_v0, %v4096_v30  ;;  %5326 = vmatpush.bf16.msrb.mxu1 %v7038_v49 }
 0x4d9   : > { %v4155_v5 = vpack.c.bf16 %v4099_v10, %v4097_v38 }
 0x4da   : > { %v3663_v14 = vmax.f32 %v3615_v55, 0.0  ;;  %4337 = vmatmul.bf16.gmra.mxu2 %v4154_v36 }
 0x4db   : > { %4426 = vmatmul.bf16.gmra.mxu3 %v4155_v5  ;;  %v3935_v58 = vpop.f32.mrf.mxu0 }
 0x4dc   : > { %v3695_v51 = vpack.c.bf16 %v3663_v14, %v3663_v14  ;;  %v4024_v31 = vpop.f32.mrf.mxu1  ;;  %v3936_v60 = vadd.f32 %v3935_v58, %v8664_v21  ;;  %v7029_v14 = vld [vmem:[%s9049_s7 + $0x8] sm:$0xff] }
 0x4dd   : > { %v3528_v6 = vpop.f32.mrf.mxu2  ;;  %v4025_v42 = vadd.f32 %v4024_v31, %v8668_v62  ;;  %v7037_v58 = vld [vmem:[%s9049_s7 + $0x48] sm:$0xff]  ;;  %5238 = vmatpush.bf16.msrb.mxu0 %v7029_v14  ;;  %v6966_v14 = vld [vmem:[#allocation2 + $0xc] sm:$0xf0] }
 0x4de   : > { %3727 = vst [vmem:[#allocation2 + $0x158] sm:$0xf] %v3695_v51  ;;  %v3529_v63 = vadd.f32 %v8594_v29, %v3528_v6  ;;  %v3617_v37 = vpop.f32.mrf.mxu3  ;;  %3974 = vmatmul.bf16.gmra.mxu0 %v9107_v57  ;;  %v4100_v20 = vmax.f32 %v3936_v60, 0.0  ;;  %5327 = vmatpush.bf16.msrb.mxu1 %v7037_v58 }
 0x4df   : > { %4063 = vmatmul.bf16.gmra.mxu1 %v9107_v57  ;;  %v4101_v54 = vmax.f32 %v4025_v42, 0.0  ;;  %v7028_v57 = vld [vmem:[%s9049_s7] sm:$0xff] }
 0x4e0   : > { %v3618_v34 = vadd.f32 %v3617_v37, %v3529_v63 }
 0x4e1   : > { %5239 = vmatpush.bf16.msrb.mxu0 %v7028_v57 }
 0x4e2   : > { %v3664_v46 = vmax.f32 %v3618_v34, 0.0  ;;  %v7036_v34 = vld [vmem:[%s9049_s7 + $0x40] sm:$0xff] }
 0x4e3   : > { %v3937_v43 = vpop.f32.mrf.mxu0  ;;  %5328 = vmatpush.bf16.msrb.mxu1 %v7036_v34  ;;  %v6964_v34 = vld [vmem:[#allocation2 + $0x4] sm:$0xf] }
 0x4e4   : > { %v3696_v41 = vpack.c.bf16 %v3664_v46, %v3664_v46  ;;  %v3938_v24 = vadd.f32 %v3937_v43, %v8664_v21  ;;  %v4026_v2 = vpop.f32.mrf.mxu1 }
 0x4e5   : > { %v4027_v45 = vadd.f32 %v4026_v2, %v8668_v62  ;;  %v3530_v16 = vpop.f32.mrf.mxu2 }
 0x4e6   : > { %3728 = vst [vmem:[#allocation2 + $0x168] sm:$0xf] %v3696_v41  ;;  %v4102_v52 = vmax.f32 %v3938_v24, 0.0  ;;  %v3531_v39 = vadd.f32 %v8594_v29, %v3530_v16  ;;  %v3619_v25 = vpop.f32.mrf.mxu3 }
 0x4e7   : > { %v4103_v7 = vmax.f32 %v4027_v45, 0.0 }
 0x4e8   : > { %v3620_v18 = vadd.f32 %v3619_v25, %v3531_v39  ;;  %v4156_v23 = vpack.c.bf16 %v4102_v52, %v4100_v20 }
 0x4e9   : > { %v4157_v1 = vpack.c.bf16 %v4103_v7, %v4101_v54 }
 0x4ea   : > { %v3665_v35 = vmax.f32 %v3620_v18, 0.0  ;;  %4342 = vmatmul.bf16.gmra.mxu2 %v4156_v23 }
 0x4eb   : > { %4431 = vmatmul.bf16.gmra.mxu3 %v4157_v1  ;;  %v3940_v11 = vpop.f32.mrf.mxu0 }
 0x4ec   : > { %v3697_v22 = vpack.c.bf16 %v3665_v35, %v3665_v35  ;;  %v4029_v13 = vpop.f32.mrf.mxu1  ;;  %v3941_v59 = vadd.f32 %v3940_v11, %v8664_v21 }
 0x4ed   : > { %v3533_v12 = vpop.f32.mrf.mxu2  ;;  %v4030_v33 = vadd.f32 %v4029_v13, %v8668_v62 }
 0x4ee   : > { %3729 = vst [vmem:[#allocation2 + $0x178] sm:$0xf] %v3697_v22  ;;  %v3534_v15 = vadd.f32 %v8594_v29, %v3533_v12  ;;  %v3622_v50 = vpop.f32.mrf.mxu3  ;;  %3979 = vmatmul.bf16.gmra.mxu0 %v9108_v19  ;;  %v4104_v17 = vmax.f32 %v3941_v59, 0.0 }
 0x4ef   : > { %4068 = vmatmul.bf16.gmra.mxu1 %v9108_v19  ;;  %v4105_v36 = vmax.f32 %v4030_v33, 0.0 }
 0x4f0   : > { %v3623_v27 = vadd.f32 %v3622_v50, %v3534_v15 }
 0x4f2   : > { %v3666_v47 = vmax.f32 %v3623_v27, 0.0 }
 0x4f3   : > { %v3942_v8 = vpop.f32.mrf.mxu0 }
 0x4f4   : > { %v3698_v26 = vpack.c.bf16 %v3666_v47, %v3666_v47  ;;  %v3943_v30 = vadd.f32 %v3942_v8, %v8664_v21  ;;  %v4031_v0 = vpop.f32.mrf.mxu1 }
 0x4f5   : > { %v4032_v9 = vadd.f32 %v4031_v0, %v8668_v62  ;;  %v3535_v56 = vpop.f32.mrf.mxu2 }
 0x4f6   : > { %3730 = vst [vmem:[#allocation2 + $0x188] sm:$0xf] %v3698_v26  ;;  %v4106_v38 = vmax.f32 %v3943_v30, 0.0  ;;  %v3536_v10 = vadd.f32 %v8594_v29, %v3535_v56  ;;  %v3624_v55 = vpop.f32.mrf.mxu3 }
 0x4f7   : > { %v4107_v5 = vmax.f32 %v4032_v9, 0.0 }
 0x4f8   : > { %v3625_v51 = vadd.f32 %v3624_v55, %v3536_v10  ;;  %v4158_v31 = vpack.c.bf16 %v4106_v38, %v4104_v17 }
 0x4f9   : > { %v4159_v6 = vpack.c.bf16 %v4107_v5, %v4105_v36 }
 0x4fa   : > { %v3667_v63 = vmax.f32 %v3625_v51, 0.0  ;;  %4347 = vmatmul.bf16.gmra.mxu2 %v4158_v31  ;;  %v6434_v51 = vld [vmem:[#allocation2 + $0x10] sm:$0xf0] }
 0x4fb   : > { %4436 = vmatmul.bf16.gmra.mxu3 %v4159_v6  ;;  %v3945_v37 = vpop.f32.mrf.mxu0  ;;  %v6432_v6 = vld [vmem:[#allocation2] sm:$0xf] }
 0x4fc   : > { %v3699_v60 = vpack.c.bf16 %v3667_v63, %v3667_v63  ;;  %v4034_v46 = vpop.f32.mrf.mxu1  ;;  %v3946_v2 = vadd.f32 %v3945_v37, %v8664_v21  ;;  %v6433_v57 = vor.u32 %v6966_v14, %v6432_v6 }
 0x4fd   : > { %v3538_v42 = vpop.f32.mrf.mxu2  ;;  %v4035_v16 = vadd.f32 %v4034_v46, %v8668_v62  ;;  %v6437_v46 = vor.u32 %v6964_v34, %v6434_v51 }
 0x4fe   : > { %3731 = vst [vmem:[#allocation2 + $0x198] sm:$0xf] %v3699_v60  ;;  %v3539_v43 = vadd.f32 %v8594_v29, %v3538_v42  ;;  %v3627_v41 = vpop.f32.mrf.mxu3  ;;  %3984 = vmatmul.bf16.gmra.mxu0 %v8085_v53  ;;  %v4108_v18 = vmax.f32 %v3946_v2, 0.0 }
 0x4ff   : > { %4073 = vmatmul.bf16.gmra.mxu1 %v8085_v53  ;;  %v4109_v35 = vmax.f32 %v4035_v16, 0.0 }
 0x500   : > { %v3628_v24 = vadd.f32 %v3627_v41, %v3539_v43 }
 0x502   : > { %v3668_v45 = vmax.f32 %v3628_v24, 0.0 }
 0x503   : > { %v3947_v20 = vpop.f32.mrf.mxu0 }
 0x504   : > { %v3700_v52 = vpack.c.bf16 %v3668_v45, %v3668_v45  ;;  %v3948_v39 = vadd.f32 %v3947_v20, %v8664_v21  ;;  %v4036_v25 = vpop.f32.mrf.mxu1 }
 0x505   : > { %v4037_v54 = vadd.f32 %v4036_v25, %v8668_v62  ;;  %v3540_v7 = vpop.f32.mrf.mxu2 }
 0x506   : > { %3732 = vst [vmem:[#allocation2 + $0x1a8] sm:$0xf] %v3700_v52  ;;  %v4110_v23 = vmax.f32 %v3948_v39, 0.0  ;;  %v3541_v1 = vadd.f32 %v8594_v29, %v3540_v7  ;;  %v3629_v53 = vpop.f32.mrf.mxu3 }
 0x507   : > { %v4111_v11 = vmax.f32 %v4037_v54, 0.0 }
 0x508   : > { %v3630_v61 = vadd.f32 %v3629_v53, %v3541_v1  ;;  %v4160_v28 = vpack.c.bf16 %v4110_v23, %v4108_v18 }
 0x509   : > { %v4161_v22 = vpack.c.bf16 %v4111_v11, %v4109_v35 }
 0x50a   : > { %v3669_v13 = vmax.f32 %v3630_v61, 0.0  ;;  %4352 = vmatmul.bf16.gmra.mxu2 %v4160_v28 }
 0x50b   : > { %4441 = vmatmul.bf16.gmra.mxu3 %v4161_v22  ;;  %v3950_v12 = vpop.f32.mrf.mxu0  ;;  %v6970_v22 = vld [vmem:[#allocation2 + $0x2c] sm:$0xf0] }
 0x50c   : > { %v3701_v15 = vpack.c.bf16 %v3669_v13, %v3669_v13  ;;  %v4039_v50 = vpop.f32.mrf.mxu1  ;;  %v3951_v59 = vadd.f32 %v3950_v12, %v8664_v21  ;;  %v8806_v12 = vld [vmem:[%s9048_s6 + $0x3] ss:$0 sm:$0xff] }
 0x50d   : > { %v3543_v19 = vpop.f32.mrf.mxu2  ;;  %v4040_v33 = vadd.f32 %v4039_v50, %v8668_v62 }
 0x50e   : > { %3733 = vst [vmem:[#allocation2 + $0x1b8] sm:$0xf] %v3701_v15  ;;  %v3544_v3 = vadd.f32 %v7110_v48, %v3543_v19  ;;  %v3632_v29 = vpop.f32.mrf.mxu3  ;;  %3989 = vmatmul.bf16.gmra.mxu0 %v8113_v4  ;;  %v4112_v0 = vmax.f32 %v3951_v59, 0.0  ;;  %v6450_v15 = vld [vmem:[#allocation2 + $0x30] sm:$0xf0] }
 0x50f   : > { %4078 = vmatmul.bf16.gmra.mxu1 %v8113_v4  ;;  %v4113_v38 = vmax.f32 %v4040_v33, 0.0  ;;  %v6448_v19 = vld [vmem:[#allocation2 + $0x20] sm:$0xf]  ;;  %v7046_v33 = vld [vmem:[%s9049_s7 + $0x90] sm:$0xff] }
 0x510   : > { %v3633_v27 = vadd.f32 %v3632_v29, %v3544_v3  ;;  %v6449_v29 = vor.u32 %v6970_v22, %v6448_v19  ;;  %5415 = vmatpush.bf16.msrb.mxu2 %v7046_v33  ;;  %v6976_v33 = vld [vmem:[#allocation2 + $0x64] sm:$0xf] }
 0x512   : > { %v3670_v47 = vmax.f32 %v3633_v27, 0.0  ;;  %v6453_v27 = vor.u32 %v6968_v40, %v6450_v15 }
 0x513   : > { %v3952_v8 = vpop.f32.mrf.mxu0 }
 0x514   : > { %v3702_v32 = vpack.c.bf16 %v3670_v47, %v3670_v47  ;;  %v3953_v49 = vadd.f32 %v3952_v8, %v8664_v21  ;;  %v4041_v26 = vpop.f32.mrf.mxu1  ;;  %v7054_v8 = vld [vmem:[%s9049_s7 + $0xd0] sm:$0xff] }
 0x515   : > { %v4042_v30 = vadd.f32 %v4041_v26, %v8668_v62  ;;  %v3545_v4 = vpop.f32.mrf.mxu2  ;;  %5504 = vmatpush.bf16.msrb.mxu3 %v7054_v8 }
 0x516   : > { %3734 = vst [vmem:[#allocation2 + $0x1c8] sm:$0xf] %v3702_v32  ;;  %v4114_v9 = vmax.f32 %v3953_v49, 0.0  ;;  %v3546_v56 = vadd.f32 %v7110_v48, %v3545_v4  ;;  %v3634_v17 = vpop.f32.mrf.mxu3 }
 0x517   : > { %v4115_v10 = vmax.f32 %v4042_v30, 0.0 }
 0x518   : > { %v3635_v55 = vadd.f32 %v3634_v17, %v3546_v56  ;;  %v4162_v36 = vpack.c.bf16 %v4114_v9, %v4112_v0 }
 0x519   : > { %v4163_v5 = vpack.c.bf16 %v4115_v10, %v4113_v38 }
 0x51a   : > { %v3671_v58 = vmax.f32 %v3635_v55, 0.0  ;;  %4357 = vmatmul.bf16.gmra.mxu2 %v4162_v36 }
 0x51b   : > { %4446 = vmatmul.bf16.gmra.mxu3 %v4163_v5  ;;  %v3955_v31 = vpop.f32.mrf.mxu0 }
 0x51c   : > { %v3703_v63 = vpack.c.bf16 %v3671_v58, %v3671_v58  ;;  %v4044_v37 = vpop.f32.mrf.mxu1  ;;  %v3956_v24 = vadd.f32 %v3955_v31, %v8664_v21 }
 0x51d   : > { %v3548_v60 = vpop.f32.mrf.mxu2  ;;  %v4045_v45 = vadd.f32 %v4044_v37, %v8668_v62 }
 0x51e   : > { %3735 = vst [vmem:[#allocation2 + $0x1d8] sm:$0xf] %v3703_v63  ;;  %v3549_v42 = vadd.f32 %v7110_v48, %v3548_v60  ;;  %v3637_v43 = vpop.f32.mrf.mxu3  ;;  %5240 = vmatmul.bf16.vlgmr.msrb.gmra.mxu0 %v6433_v57  ;;  %v4116_v7 = vmax.f32 %v3956_v24, 0.0  ;;  %v6974_v63 = vld [vmem:[#allocation2 + $0x4c] sm:$0xf0] }
 0x51f   : > { %5329 = vmatmul.bf16.vlgmr.msrb.gmra.mxu1 %v6437_v46  ;;  %v4117_v53 = vmax.f32 %v4045_v45, 0.0  ;;  %v6466_v57 = vld [vmem:[#allocation2 + $0x50] sm:$0xf0]  ;;  %v6464_v60 = vld [vmem:[#allocation2 + $0x40] sm:$0xf] }
 0x520   : > { %v3638_v41 = vadd.f32 %v3637_v43, %v3549_v42  ;;  %v6465_v43 = vor.u32 %v6974_v63, %v6464_v60 }
 0x522   : > { %v3672_v2 = vmax.f32 %v3638_v41, 0.0  ;;  %v6972_v41 = vld [vmem:[#allocation2 + $0x44] sm:$0xf] }
 0x523   : > { %v3957_v16 = vpop.f32.mrf.mxu0 }
 0x524   : > { %v3704_v20 = vpack.c.bf16 %v3672_v2, %v3672_v2  ;;  %v3958_v52 = vadd.f32 %v3957_v16, %v8664_v21  ;;  %v4046_v39 = vpop.f32.mrf.mxu1  ;;  %v6469_v2 = vor.u32 %v6972_v41, %v6466_v57 }
 0x525   : > { %v4047_v25 = vadd.f32 %v4046_v39, %v8668_v62  ;;  %v3550_v54 = vpop.f32.mrf.mxu2 }
 0x526   : > { %3736 = vst [vmem:[#allocation2 + $0x1e8] sm:$0xf] %v3704_v20  ;;  %v4118_v18 = vmax.f32 %v3958_v52, 0.0  ;;  %v3551_v23 = vadd.f32 %v7110_v48, %v3550_v54  ;;  %v3639_v1 = vpop.f32.mrf.mxu3 }
 0x527   : > { %v4119_v35 = vmax.f32 %v4047_v25, 0.0 }
 0x528   : > { %v3640_v11 = vadd.f32 %v3639_v1, %v3551_v23  ;;  %v4164_v61 = vpack.c.bf16 %v4118_v18, %v4116_v7 }
 0x529   : > { %v4165_v28 = vpack.c.bf16 %v4119_v35, %v4117_v53 }
 0x52a   : > { %v3673_v13 = vmax.f32 %v3640_v11, 0.0  ;;  %4362 = vmatmul.bf16.gmra.mxu2 %v4164_v61 }
 0x52b   : > { %4451 = vmatmul.bf16.gmra.mxu3 %v4165_v28  ;;  %v3960_v50 = vpop.f32.mrf.mxu0 }
 0x52c   : > { %v3705_v3 = vpack.c.bf16 %v3673_v13, %v3673_v13  ;;  %v4049_v48 = vpop.f32.mrf.mxu1  ;;  %v3961_v49 = vadd.f32 %v3960_v50, %v8664_v21 }
 0x52d   : > { %v4323_v44 = vpop.f32.mrf.mxu2  ;;  %v4050_v30 = vadd.f32 %v4049_v48, %v8668_v62 }
 0x52e   : > { %3737 = vst [vmem:[#allocation2 + $0x1f8] sm:$0xf] %v3705_v3  ;;  %v4324_v59 = vadd.f32 %v8806_v12, %v4323_v44  ;;  %v4412_v47 = vpop.f32.mrf.mxu3  ;;  %5245 = vmatmul.bf16.gmra.mxu0 %v6449_v29  ;;  %v4120_v10 = vmax.f32 %v3961_v49, 0.0  ;;  %v6978_v3 = vld [vmem:[#allocation2 + $0x6c] sm:$0xf0] }
 0x52f   : > { %5334 = vmatmul.bf16.gmra.mxu1 %v6453_v27  ;;  %v4121_v14 = vmax.f32 %v4050_v30, 0.0  ;;  %v6482_v29 = vld [vmem:[#allocation2 + $0x70] sm:$0xf0]  ;;  %v6480_v44 = vld [vmem:[#allocation2 + $0x60] sm:$0xf]  ;;  %v7045_v30 = vld [vmem:[%s9049_s7 + $0x88] sm:$0xff] }
 0x530   : > { %v4413_v32 = vadd.f32 %v4412_v47, %v4324_v59  ;;  %v6481_v47 = vor.u32 %v6978_v3, %v6480_v44  ;;  %5416 = vmatpush.bf16.msrb.mxu2 %v7045_v30  ;;  %v6984_v30 = vld [vmem:[#allocation2 + $0xa4] sm:$0xf] }
 0x532   : > { %v4492_v26 = vmax.f32 %v4413_v32, 0.0  ;;  %v6485_v32 = vor.u32 %v6976_v33, %v6482_v29 }
 0x533   : > { %v3962_v4 = vpop.f32.mrf.mxu0 }
 0x534   : > { %v4524_v0 = vpack.c.bf16 %v4492_v26, %v4492_v26  ;;  %v3963_v9 = vadd.f32 %v3962_v4, %v8664_v21  ;;  %v4051_v56 = vpop.f32.mrf.mxu1  ;;  %v7053_v4 = vld [vmem:[%s9049_s7 + $0xc8] sm:$0xff] }
 0x535   : > { %v4052_v17 = vadd.f32 %v4051_v56, %v8668_v62  ;;  %v4325_v38 = vpop.f32.mrf.mxu2  ;;  %5505 = vmatpush.bf16.msrb.mxu3 %v7053_v4 }
 0x536   : > { %4556 = vst [vmem:[#allocation2 + $0xc] sm:$0xf] %v4524_v0  ;;  %v4122_v55 = vmax.f32 %v3963_v9, 0.0  ;;  %v4326_v36 = vadd.f32 %v8806_v12, %v4325_v38  ;;  %v4414_v5 = vpop.f32.mrf.mxu3 }
 0x537   : > { %v4123_v58 = vmax.f32 %v4052_v17, 0.0 }
 0x538   : > { %v4415_v51 = vadd.f32 %v4414_v5, %v4326_v36  ;;  %v4166_v31 = vpack.c.bf16 %v4122_v55, %v4120_v10 }
 0x539   : > { %v4167_v6 = vpack.c.bf16 %v4123_v58, %v4121_v14 }
 0x53a   : > { %v4493_v37 = vmax.f32 %v4415_v51, 0.0  ;;  %4367 = vmatmul.bf16.gmra.mxu2 %v4166_v31 }
 0x53b   : > { %4456 = vmatmul.bf16.gmra.mxu3 %v4167_v6  ;;  %v3965_v34 = vpop.f32.mrf.mxu0 }
 0x53c   : > { %v4525_v46 = vpack.c.bf16 %v4493_v37, %v4493_v37  ;;  %v4054_v42 = vpop.f32.mrf.mxu1  ;;  %v3966_v52 = vadd.f32 %v3965_v34, %v8664_v21 }
 0x53d   : > { %v4328_v24 = vpop.f32.mrf.mxu2  ;;  %v4055_v25 = vadd.f32 %v4054_v42, %v8668_v62 }
 0x53e   : > { %4557 = vst [vmem:[#allocation2 + $0x1c] sm:$0xf] %v4525_v46  ;;  %v4329_v45 = vadd.f32 %v8806_v12, %v4328_v24  ;;  %v4417_v16 = vpop.f32.mrf.mxu3  ;;  %5250 = vmatmul.bf16.gmra.mxu0 %v6465_v43  ;;  %v4124_v35 = vmax.f32 %v3966_v52, 0.0  ;;  %v6982_v46 = vld [vmem:[#allocation2 + $0x8c] sm:$0xf0] }
 0x53f   : > { %5339 = vmatmul.bf16.gmra.mxu1 %v6469_v2  ;;  %v4125_v22 = vmax.f32 %v4055_v25, 0.0  ;;  %v6498_v43 = vld [vmem:[#allocation2 + $0x90] sm:$0xf0]  ;;  %v6496_v24 = vld [vmem:[#allocation2 + $0x80] sm:$0xf] }
 0x540   : > { %v4418_v20 = vadd.f32 %v4417_v16, %v4329_v45  ;;  %v6497_v16 = vor.u32 %v6982_v46, %v6496_v24 }
 0x542   : > { %v4494_v39 = vmax.f32 %v4418_v20, 0.0  ;;  %v6980_v20 = vld [vmem:[#allocation2 + $0x84] sm:$0xf] }
 0x543   : > { %v3967_v54 = vpop.f32.mrf.mxu0 }
 0x544   : > { %v4526_v7 = vpack.c.bf16 %v4494_v39, %v4494_v39  ;;  %v3968_v18 = vadd.f32 %v3967_v54, %v8664_v21  ;;  %v4056_v23 = vpop.f32.mrf.mxu1  ;;  %v6501_v39 = vor.u32 %v6980_v20, %v6498_v43 }
 0x545   : > { %v4057_v1 = vadd.f32 %v4056_v23, %v8668_v62  ;;  %v4330_v53 = vpop.f32.mrf.mxu2 }
 0x546   : > { %4558 = vst [vmem:[#allocation2 + $0x2c] sm:$0xf] %v4526_v7  ;;  %v4126_v11 = vmax.f32 %v3968_v18, 0.0  ;;  %v4331_v61 = vadd.f32 %v8806_v12, %v4330_v53  ;;  %v4419_v28 = vpop.f32.mrf.mxu3 }
 0x547   : > { %v4127_v13 = vmax.f32 %v4057_v1, 0.0 }
 0x548   : > { %v4420_v15 = vadd.f32 %v4419_v28, %v4331_v61  ;;  %v4168_v50 = vpack.c.bf16 %v4126_v11, %v4124_v35 }
 0x549   : > { %v4169_v19 = vpack.c.bf16 %v4127_v13, %v4125_v22 }
 0x54a   : > { %v4495_v48 = vmax.f32 %v4420_v15, 0.0  ;;  %4372 = vmatmul.bf16.gmra.mxu2 %v4168_v50 }
 0x54b   : > { %4461 = vmatmul.bf16.gmra.mxu3 %v4169_v19  ;;  %v3970_v40 = vpop.f32.mrf.mxu0 }
 0x54c   : > { %v4527_v27 = vpack.c.bf16 %v4495_v48, %v4495_v48  ;;  %v4059_v59 = vpop.f32.mrf.mxu1  ;;  %v3971_v9 = vadd.f32 %v3970_v40, %v8664_v21 }
 0x54d   : > { %v4333_v8 = vpop.f32.mrf.mxu2  ;;  %v4060_v17 = vadd.f32 %v4059_v59, %v8668_v62 }
 0x54e   : > { %4559 = vst [vmem:[#allocation2 + $0x3c] sm:$0xf] %v4527_v27  ;;  %v4334_v49 = vadd.f32 %v8806_v12, %v4333_v8  ;;  %v4422_v26 = vpop.f32.mrf.mxu3  ;;  %5255 = vmatmul.bf16.gmra.mxu0 %v6481_v47  ;;  %v4128_v58 = vmax.f32 %v3971_v9, 0.0  ;;  %v6986_v27 = vld [vmem:[#allocation2 + $0xac] sm:$0xf0] }
 0x54f   : > { %5344 = vmatmul.bf16.gmra.mxu1 %v6485_v32  ;;  %v4129_v63 = vmax.f32 %v4060_v17, 0.0  ;;  %v6514_v47 = vld [vmem:[#allocation2 + $0xb0] sm:$0xf0]  ;;  %v6512_v8 = vld [vmem:[#allocation2 + $0xa0] sm:$0xf] }
 0x550   : > { %v4423_v0 = vadd.f32 %v4422_v26, %v4334_v49  ;;  %v6513_v26 = vor.u32 %v6986_v27, %v6512_v8  ;;  %v7044_v17 = vld [vmem:[%s9049_s7 + $0x80] sm:$0xff] }
 0x551   : > { %5417 = vmatpush.bf16.msrb.mxu2 %v7044_v17  ;;  %v6992_v17 = vld [vmem:[#allocation2 + $0xe4] sm:$0xf] }
 0x552   : > { %v4496_v56 = vmax.f32 %v4423_v0, 0.0  ;;  %v6517_v0 = vor.u32 %v6984_v30, %v6514_v47 }
 0x553   : > { %v3972_v38 = vpop.f32.mrf.mxu0 }
 0x554   : > { %v4528_v10 = vpack.c.bf16 %v4496_v56, %v4496_v56  ;;  %v3973_v55 = vadd.f32 %v3972_v38, %v8664_v21  ;;  %v4061_v36 = vpop.f32.mrf.mxu1  ;;  %v7052_v38 = vld [vmem:[%s9049_s7 + $0xc0] sm:$0xff] }
 0x555   : > { %v4062_v5 = vadd.f32 %v4061_v36, %v8668_v62  ;;  %v4335_v14 = vpop.f32.mrf.mxu2  ;;  %5506 = vmatpush.bf16.msrb.mxu3 %v7052_v38 }
 0x556   : > { %4560 = vst [vmem:[#allocation2 + $0x4c] sm:$0xf] %v4528_v10  ;;  %v4130_v51 = vmax.f32 %v3973_v55, 0.0  ;;  %v4336_v31 = vadd.f32 %v8806_v12, %v4335_v14  ;;  %v4424_v6 = vpop.f32.mrf.mxu3 }
 0x557   : > { %v4131_v37 = vmax.f32 %v4062_v5, 0.0 }
 0x558   : > { %v4425_v57 = vadd.f32 %v4424_v6, %v4336_v31  ;;  %v4170_v34 = vpack.c.bf16 %v4130_v51, %v4128_v58 }
 0x559   : > { %v4171_v60 = vpack.c.bf16 %v4131_v37, %v4129_v63 }
 0x55a   : > { %v4497_v42 = vmax.f32 %v4425_v57, 0.0  ;;  %4377 = vmatmul.bf16.gmra.mxu2 %v4170_v34 }
 0x55b   : > { %4466 = vmatmul.bf16.gmra.mxu3 %v4171_v60  ;;  %v3975_v41 = vpop.f32.mrf.mxu0 }
 0x55c   : > { %v4529_v2 = vpack.c.bf16 %v4497_v42, %v4497_v42  ;;  %v4064_v45 = vpop.f32.mrf.mxu1  ;;  %v3976_v18 = vadd.f32 %v3975_v41, %v8664_v21 }
 0x55d   : > { %v4338_v52 = vpop.f32.mrf.mxu2  ;;  %v4065_v1 = vadd.f32 %v4064_v45, %v8668_v62 }
 0x55e   : > { %4561 = vst [vmem:[#allocation2 + $0x5c] sm:$0xf] %v4529_v2  ;;  %v4339_v25 = vadd.f32 %v8806_v12, %v4338_v52  ;;  %v4427_v54 = vpop.f32.mrf.mxu3  ;;  %5260 = vmatmul.bf16.gmra.mxu0 %v6497_v16  ;;  %v4132_v13 = vmax.f32 %v3976_v18, 0.0  ;;  %v6990_v2 = vld [vmem:[#allocation2 + $0xcc] sm:$0xf0] }
 0x55f   : > { %5349 = vmatmul.bf16.gmra.mxu1 %v6501_v39  ;;  %v4133_v3 = vmax.f32 %v4065_v1, 0.0  ;;  %v6530_v16 = vld [vmem:[#allocation2 + $0xd0] sm:$0xf0]  ;;  %v6528_v52 = vld [vmem:[#allocation2 + $0xc0] sm:$0xf] }
 0x560   : > { %v4428_v7 = vadd.f32 %v4427_v54, %v4339_v25  ;;  %v6529_v54 = vor.u32 %v6990_v2, %v6528_v52 }
 0x562   : > { %v4498_v23 = vmax.f32 %v4428_v7, 0.0  ;;  %v6988_v7 = vld [vmem:[#allocation2 + $0xc4] sm:$0xf] }
 0x563   : > { %v3977_v53 = vpop.f32.mrf.mxu0 }
 0x564   : > { %v4530_v35 = vpack.c.bf16 %v4498_v23, %v4498_v23  ;;  %v3978_v11 = vadd.f32 %v3977_v53, %v8664_v21  ;;  %v4066_v61 = vpop.f32.mrf.mxu1  ;;  %v6533_v23 = vor.u32 %v6988_v7, %v6530_v16  ;;  %v8871_v16 = vld [vmem:[%s9050_s8] ss:$0 sm:$0xff] }
 0x565   : > { %v4067_v28 = vadd.f32 %v4066_v61, %v8668_v62  ;;  %v4340_v22 = vpop.f32.mrf.mxu2 }
 0x566   : > { %4562 = vst [vmem:[#allocation2 + $0x6c] sm:$0xf] %v4530_v35  ;;  %v4134_v15 = vmax.f32 %v3978_v11, 0.0  ;;  %v4341_v50 = vadd.f32 %v8806_v12, %v4340_v22  ;;  %v4429_v19 = vpop.f32.mrf.mxu3 }
 0x567   : > { %v4135_v48 = vmax.f32 %v4067_v28, 0.0 }
 0x568   : > { %v4430_v29 = vadd.f32 %v4429_v19, %v4341_v50  ;;  %v4172_v40 = vpack.c.bf16 %v4134_v15, %v4132_v13 }
 0x569   : > { %v4173_v44 = vpack.c.bf16 %v4135_v48, %v4133_v3 }
 0x56a   : > { %v4499_v59 = vmax.f32 %v4430_v29, 0.0  ;;  %4382 = vmatmul.bf16.gmra.mxu2 %v4172_v40 }
 0x56b   : > { %4471 = vmatmul.bf16.gmra.mxu3 %v4173_v44  ;;  %v3980_v33 = vpop.f32.mrf.mxu0 }
 0x56c   : > { %v4531_v32 = vpack.c.bf16 %v4499_v59, %v4499_v59  ;;  %v4069_v49 = vpop.f32.mrf.mxu1  ;;  %v3981_v55 = vadd.f32 %v3980_v33, %v8664_v21 }
 0x56d   : > { %v4343_v4 = vpop.f32.mrf.mxu2  ;;  %v4070_v5 = vadd.f32 %v4069_v49, %v8668_v62 }
 0x56e   : > { %4563 = vst [vmem:[#allocation2 + $0x7c] sm:$0xf] %v4531_v32  ;;  %v4344_v9 = vadd.f32 %v8806_v12, %v4343_v4  ;;  %v4432_v56 = vpop.f32.mrf.mxu3  ;;  %5265 = vmatmul.bf16.gmra.mxu0 %v6513_v26  ;;  %v4136_v37 = vmax.f32 %v3981_v55, 0.0  ;;  %v6994_v32 = vld [vmem:[#allocation2 + $0xec] sm:$0xf0] }
 0x56f   : > { %5354 = vmatmul.bf16.gmra.mxu1 %v6517_v0  ;;  %v4137_v46 = vmax.f32 %v4070_v5, 0.0  ;;  %v6546_v26 = vld [vmem:[#allocation2 + $0xf0] sm:$0xf0]  ;;  %v6544_v4 = vld [vmem:[#allocation2 + $0xe0] sm:$0xf] }
 0x570   : > { %v4433_v10 = vadd.f32 %v4432_v56, %v4344_v9  ;;  %v6545_v56 = vor.u32 %v6994_v32, %v6544_v4  ;;  %v6965_v32 = vld [vmem:[#allocation2 + $0xc] sm:$0xf]  ;;  %v6578_v4 = vld [vmem:[#allocation2 + $0x130] sm:$0xf0] }
 0x572   : > { %v4500_v36 = vmax.f32 %v4433_v10, 0.0  ;;  %v6549_v10 = vor.u32 %v6992_v17, %v6546_v26  ;;  %v7002_v26 = vld [vmem:[#allocation2 + $0x12c] sm:$0xf0] }
 0x573   : > { %v3982_v14 = vpop.f32.mrf.mxu0 }
 0x574   : > { %v4532_v58 = vpack.c.bf16 %v4500_v36, %v4500_v36  ;;  %v3983_v51 = vadd.f32 %v3982_v14, %v8664_v21  ;;  %v4071_v31 = vpop.f32.mrf.mxu1 }
 0x575   : > { %v4072_v6 = vadd.f32 %v4071_v31, %v8668_v62  ;;  %v4345_v63 = vpop.f32.mrf.mxu2 }
 0x576   : > { %4564 = vst [vmem:[#allocation2 + $0x8c] sm:$0xf] %v4532_v58  ;;  %v4138_v57 = vmax.f32 %v3983_v51, 0.0  ;;  %v4346_v34 = vadd.f32 %v8806_v12, %v4345_v63  ;;  %v4434_v60 = vpop.f32.mrf.mxu3 }
 0x577   : > { %v4139_v42 = vmax.f32 %v4072_v6, 0.0 }
 0x578   : > { %v4435_v43 = vadd.f32 %v4434_v60, %v4346_v34  ;;  %v4174_v41 = vpack.c.bf16 %v4138_v57, %v4136_v37 }
 0x579   : > { %v4175_v24 = vpack.c.bf16 %v4139_v42, %v4137_v46 }
 0x57a   : > { %v4501_v45 = vmax.f32 %v4435_v43, 0.0  ;;  %4387 = vmatmul.bf16.gmra.mxu2 %v4174_v41 }
 0x57b   : > { %4476 = vmatmul.bf16.gmra.mxu3 %v4175_v24  ;;  %v3985_v20 = vpop.f32.mrf.mxu0 }
 0x57c   : > { %v4533_v39 = vpack.c.bf16 %v4501_v45, %v4501_v45  ;;  %v4074_v25 = vpop.f32.mrf.mxu1  ;;  %v3986_v11 = vadd.f32 %v3985_v20, %v8664_v21  ;;  %v6998_v20 = vld [vmem:[#allocation2 + $0x10c] sm:$0xf0] }
 0x57d   : > { %v4348_v18 = vpop.f32.mrf.mxu2  ;;  %v4075_v28 = vadd.f32 %v4074_v25, %v8668_v62  ;;  %v6560_v25 = vld [vmem:[#allocation2 + $0x100] sm:$0xf] }
 0x57e   : > { %4565 = vst [vmem:[#allocation2 + $0x9c] sm:$0xf] %v4533_v39  ;;  %v4349_v1 = vadd.f32 %v8806_v12, %v4348_v18  ;;  %v4437_v53 = vpop.f32.mrf.mxu3  ;;  %5270 = vmatmul.bf16.gmra.mxu0 %v6529_v54  ;;  %v4140_v48 = vmax.f32 %v3986_v11, 0.0 }
 0x57f   : > { %5359 = vmatmul.bf16.gmra.mxu1 %v6533_v23  ;;  %v4141_v27 = vmax.f32 %v4075_v28, 0.0  ;;  %v6561_v23 = vor.u32 %v6998_v20, %v6560_v25  ;;  %v6969_v20 = vld [vmem:[#allocation2 + $0x2c] sm:$0xf]  ;;  %v6594_v25 = vld [vmem:[#allocation2 + $0x150] sm:$0xf0] }
 0x580   : > { %v4438_v35 = vadd.f32 %v4437_v53, %v4349_v1  ;;  %v6996_v1 = vld [vmem:[#allocation2 + $0x104] sm:$0xf] }
 0x582   : > { %v4502_v61 = vmax.f32 %v4438_v35, 0.0 }
 0x583   : > { %v3987_v22 = vpop.f32.mrf.mxu0 }
 0x584   : > { %v4534_v13 = vpack.c.bf16 %v4502_v61, %v4502_v61  ;;  %v3988_v15 = vadd.f32 %v3987_v22, %v8664_v21  ;;  %v4076_v50 = vpop.f32.mrf.mxu1 }
 0x585   : > { %v4077_v19 = vadd.f32 %v4076_v50, %v8668_v62  ;;  %v4350_v3 = vpop.f32.mrf.mxu2 }
 0x586   : > { %4566 = vst [vmem:[#allocation2 + $0xac] sm:$0xf] %v4534_v13  ;;  %v4142_v29 = vmax.f32 %v3988_v15, 0.0  ;;  %v4351_v40 = vadd.f32 %v8806_v12, %v4350_v3  ;;  %v4439_v44 = vpop.f32.mrf.mxu3 }
 0x587   : > { %v4143_v59 = vmax.f32 %v4077_v19, 0.0 }
 0x588   : > { %v4440_v47 = vadd.f32 %v4439_v44, %v4351_v40  ;;  %v4176_v33 = vpack.c.bf16 %v4142_v29, %v4140_v48  ;;  %v6967_v29 = vld [vmem:[#allocation2 + $0x14] sm:$0xf0] }
 0x589   : > { %v4177_v8 = vpack.c.bf16 %v4143_v59, %v4141_v27  ;;  %v6442_v59 = vld [vmem:[#allocation2 + $0x18] sm:$0xf0] }
 0x58a   : > { %v4503_v49 = vmax.f32 %v4440_v47, 0.0  ;;  %4392 = vmatmul.bf16.gmra.mxu2 %v4176_v33  ;;  %v6440_v47 = vld [vmem:[#allocation2 + $0x8] sm:$0xf] }
 0x58b   : > { %4481 = vmatmul.bf16.gmra.mxu3 %v4177_v8  ;;  %v3990_v30 = vpop.f32.mrf.mxu0  ;;  %v6441_v8 = vor.u32 %v6967_v29, %v6440_v47 }
 0x58c   : > { %v4535_v0 = vpack.c.bf16 %v4503_v49, %v4503_v49  ;;  %v4079_v9 = vpop.f32.mrf.mxu1  ;;  %v3991_v14 = vadd.f32 %v3990_v30, %v8664_v21  ;;  %v6445_v49 = vor.u32 %v6965_v32, %v6442_v59  ;;  %v6975_v59 = vld [vmem:[#allocation2 + $0x54] sm:$0xf0]  ;;  %v6474_v32 = vld [vmem:[#allocation2 + $0x58] sm:$0xf0] }
 0x58d   : > { %v4353_v38 = vpop.f32.mrf.mxu2  ;;  %v4080_v51 = vadd.f32 %v4079_v9, %v8668_v62  ;;  %v6576_v9 = vld [vmem:[#allocation2 + $0x120] sm:$0xf] }
 0x58e   : > { %4567 = vst [vmem:[#allocation2 + $0xbc] sm:$0xf] %v4535_v0  ;;  %v4354_v55 = vadd.f32 %v8806_v12, %v4353_v38  ;;  %v4442_v36 = vpop.f32.mrf.mxu3  ;;  %5275 = vmatmul.bf16.gmra.mxu0 %v6545_v56  ;;  %v4144_v60 = vmax.f32 %v3991_v14, 0.0 }
 0x58f   : > { %5364 = vmatmul.bf16.gmra.mxu1 %v6549_v10  ;;  %v4145_v41 = vmax.f32 %v4080_v51, 0.0  ;;  %v6577_v10 = vor.u32 %v7002_v26, %v6576_v9  ;;  %v7010_v9 = vld [vmem:[#allocation2 + $0x16c] sm:$0xf0] }
 0x590   : > { %v4443_v5 = vadd.f32 %v4442_v36, %v4354_v55  ;;  %v7000_v55 = vld [vmem:[#allocation2 + $0x124] sm:$0xf] }
 0x592   : > { %v4504_v58 = vmax.f32 %v4443_v5, 0.0  ;;  %v6581_v5 = vor.u32 %v7000_v55, %v6578_v4  ;;  %v6973_v4 = vld [vmem:[#allocation2 + $0x4c] sm:$0xf] }
 0x593   : > { %v3992_v31 = vpop.f32.mrf.mxu0 }
 0x594   : > { %v4536_v6 = vpack.c.bf16 %v4504_v58, %v4504_v58  ;;  %v3993_v63 = vadd.f32 %v3992_v31, %v8664_v21  ;;  %v4081_v37 = vpop.f32.mrf.mxu1 }
 0x595   : > { %v4082_v57 = vadd.f32 %v4081_v37, %v8668_v62  ;;  %v4355_v34 = vpop.f32.mrf.mxu2  ;;  %v6562_v62 = vld [vmem:[#allocation2 + $0x110] sm:$0xf0] }
 0x596   : > { %4568 = vst [vmem:[#allocation2 + $0xcc] sm:$0xf] %v4536_v6  ;;  %v4146_v46 = vmax.f32 %v3993_v63, 0.0  ;;  %v4356_v42 = vadd.f32 %v8806_v12, %v4355_v34  ;;  %v4444_v43 = vpop.f32.mrf.mxu3  ;;  %v6565_v35 = vor.u32 %v6996_v1, %v6562_v62  ;;  %v7006_v62 = vld [vmem:[#allocation2 + $0x14c] sm:$0xf0] }
 0x597   : > { %v4147_v24 = vmax.f32 %v4082_v57, 0.0 }
 0x598   : > { %v4445_v2 = vadd.f32 %v4444_v43, %v4356_v42  ;;  %v4178_v45 = vpack.c.bf16 %v4146_v46, %v4144_v60  ;;  %v6971_v46 = vld [vmem:[#allocation2 + $0x34] sm:$0xf0] }
 0x599   : > { %v4179_v21 = vpack.c.bf16 %v4147_v24, %v4145_v41  ;;  %v6458_v24 = vld [vmem:[#allocation2 + $0x38] sm:$0xf0] }
 0x59a   : > { %v4505_v52 = vmax.f32 %v4445_v2, 0.0  ;;  %4397 = vmatmul.bf16.gmra.mxu2 %v4178_v45  ;;  %v6456_v2 = vld [vmem:[#allocation2 + $0x28] sm:$0xf] }
 0x59b   : > { %4486 = vmatmul.bf16.gmra.mxu3 %v4179_v21  ;;  %v5241_v39 = vpop.f32.mrf.mxu0  ;;  %v6457_v21 = vor.u32 %v6971_v46, %v6456_v2 }
 0x59c   : > { %v4537_v54 = vpack.c.bf16 %v4505_v52, %v4505_v52  ;;  %v5242_v7 = vadd.f32 %v8871_v16, %v5241_v39  ;;  %v5330_v18 = vpop.f32.mrf.mxu1  ;;  %v6461_v52 = vor.u32 %v6969_v20, %v6458_v24 }
 0x59d   : > { %v4358_v53 = vpop.f32.mrf.mxu2 }
 0x59e   : > { %4569 = vst [vmem:[#allocation2 + $0xdc] sm:$0xf] %v4537_v54  ;;  %v8874_v11 = vadd.f32 %v5330_v18, %v5242_v7  ;;  %v4359_v61 = vadd.f32 %v8806_v12, %v4358_v53  ;;  %v4447_v28 = vpop.f32.mrf.mxu3  ;;  %5280 = vmatmul.bf16.gmra.mxu0 %v6561_v23  ;;  %v6592_v7 = vld [vmem:[#allocation2 + $0x140] sm:$0xf] }
 0x59f   : > { %5369 = vmatmul.bf16.gmra.mxu1 %v6565_v35  ;;  %v6593_v53 = vor.u32 %v7006_v62, %v6592_v7  ;;  %v7004_v35 = vld [vmem:[#allocation2 + $0x144] sm:$0xf]  ;;  %v6490_v62 = vld [vmem:[#allocation2 + $0x78] sm:$0xf0]  ;;  %v6977_v7 = vld [vmem:[#allocation2 + $0x6c] sm:$0xf] }
 0x5a0   : > { %v4448_v22 = vadd.f32 %v4447_v28, %v4359_v61  ;;  %v6597_v28 = vor.u32 %v7004_v35, %v6594_v25  ;;  %v6624_v35 = vld [vmem:[#allocation2 + $0x180] sm:$0xf] }
 0x5a2   : > { %v4506_v13 = vmax.f32 %v4448_v22, 0.0 }
 0x5a3   : > { %v5243_v15 = vpop.f32.mrf.mxu0 }
 0x5a4   : > { %v4538_v50 = vpack.c.bf16 %v4506_v13, %v4506_v13  ;;  %v5244_v19 = vadd.f32 %v8871_v16, %v5243_v15  ;;  %v5332_v3 = vpop.f32.mrf.mxu1 }
 0x5a5   : > { %v4360_v48 = vpop.f32.mrf.mxu2 }
 0x5a6   : > { %4570 = vst [vmem:[#allocation2 + $0xec] sm:$0xf] %v4538_v50  ;;  %v8878_v40 = vadd.f32 %v5332_v3, %v5244_v19  ;;  %v4361_v44 = vadd.f32 %v8806_v12, %v4360_v48  ;;  %v4449_v27 = vpop.f32.mrf.mxu3 }
 0x5a8   : > { %v4450_v33 = vadd.f32 %v4449_v27, %v4361_v44 }
 0x5aa   : > { %v4507_v30 = vmax.f32 %v4450_v33, 0.0  ;;  %5418 = vmatmul.bf16.vlgmr.msrb.gmra.mxu2 %v6441_v8 }
 0x5ab   : > { %5507 = vmatmul.bf16.vlgmr.msrb.gmra.mxu3 %v6445_v49  ;;  %v5246_v0 = vpop.f32.mrf.mxu0  ;;  %v6472_v49 = vld [vmem:[#allocation2 + $0x48] sm:$0xf] }
 0x5ac   : > { %v4539_v56 = vpack.c.bf16 %v4507_v30, %v4507_v30  ;;  %v5247_v17 = vadd.f32 %v8871_v16, %v5246_v0  ;;  %v5335_v38 = vpop.f32.mrf.mxu1  ;;  %v6473_v30 = vor.u32 %v6975_v59, %v6472_v49  ;;  %v6477_v0 = vor.u32 %v6973_v4, %v6474_v32  ;;  %v6983_v59 = vld [vmem:[#allocation2 + $0x94] sm:$0xf0]  ;;  %v6506_v32 = vld [vmem:[#allocation2 + $0x98] sm:$0xf0]  ;;  %v6504_v49 = vld [vmem:[#allocation2 + $0x88] sm:$0xf] }
 0x5ad   : > { %v4363_v36 = vpop.f32.mrf.mxu2  ;;  %v6981_v4 = vld [vmem:[#allocation2 + $0x8c] sm:$0xf] }
 0x5ae   : > { %4571 = vst [vmem:[#allocation2 + $0xfc] sm:$0xf] %v4539_v56  ;;  %v8882_v14 = vadd.f32 %v5335_v38, %v5247_v17  ;;  %v4364_v58 = vadd.f32 %v8806_v12, %v4363_v36  ;;  %v4452_v51 = vpop.f32.mrf.mxu3  ;;  %5285 = vmatmul.bf16.gmra.mxu0 %v6577_v10  ;;  %v6610_v17 = vld [vmem:[#allocation2 + $0x170] sm:$0xf0]  ;;  %v6608_v10 = vld [vmem:[#allocation2 + $0x160] sm:$0xf] }
 0x5af   : > { %5374 = vmatmul.bf16.gmra.mxu1 %v6581_v5 }
 0x5b0   : > { %v4453_v31 = vadd.f32 %v4452_v51, %v4364_v58  ;;  %v6609_v58 = vor.u32 %v7010_v9, %v6608_v10  ;;  %v7008_v51 = vld [vmem:[#allocation2 + $0x164] sm:$0xf]  ;;  %v7018_v9 = vld [vmem:[#allocation2 + $0x1ac] sm:$0xf0] }
 0x5b2   : > { %v4508_v6 = vmax.f32 %v4453_v31, 0.0 }
 0x5b3   : > { %v5248_v63 = vpop.f32.mrf.mxu0 }
 0x5b4   : > { %v4540_v37 = vpack.c.bf16 %v4508_v6, %v4508_v6  ;;  %v5249_v57 = vadd.f32 %v8871_v16, %v5248_v63  ;;  %v5337_v34 = vpop.f32.mrf.mxu1  ;;  %v6613_v6 = vor.u32 %v7008_v51, %v6610_v17  ;;  %v6642_v17 = vld [vmem:[#allocation2 + $0x1b0] sm:$0xf0] }
 0x5b5   : > { %v4365_v60 = vpop.f32.mrf.mxu2 }
 0x5b6   : > { %4572 = vst [vmem:[#allocation2 + $0x10c] sm:$0xf] %v4540_v37  ;;  %v8886_v42 = vadd.f32 %v5337_v34, %v5249_v57  ;;  %v4366_v43 = vadd.f32 %v8806_v12, %v4365_v60  ;;  %v4454_v41 = vpop.f32.mrf.mxu3 }
 0x5b8   : > { %v4455_v45 = vadd.f32 %v4454_v41, %v4366_v43 }
 0x5ba   : > { %v4509_v39 = vmax.f32 %v4455_v45, 0.0  ;;  %5423 = vmatmul.bf16.gmra.mxu2 %v6457_v21  ;;  %v6979_v45 = vld [vmem:[#allocation2 + $0x74] sm:$0xf0] }
 0x5bb   : > { %5512 = vmatmul.bf16.gmra.mxu3 %v6461_v52  ;;  %v5251_v54 = vpop.f32.mrf.mxu0 }
 0x5bc   : > { %v4541_v18 = vpack.c.bf16 %v4509_v39, %v4509_v39  ;;  %v5252_v23 = vadd.f32 %v8871_v16, %v5251_v54  ;;  %v5340_v1 = vpop.f32.mrf.mxu1  ;;  %v6488_v39 = vld [vmem:[#allocation2 + $0x68] sm:$0xf] }
 0x5bd   : > { %v4368_v61 = vpop.f32.mrf.mxu2  ;;  %v6489_v54 = vor.u32 %v6979_v45, %v6488_v39 }
 0x5be   : > { %4573 = vst [vmem:[#allocation2 + $0x11c] sm:$0xf] %v4541_v18  ;;  %v8890_v22 = vadd.f32 %v5340_v1, %v5252_v23  ;;  %v4369_v13 = vadd.f32 %v8806_v12, %v4368_v61  ;;  %v4457_v15 = vpop.f32.mrf.mxu3  ;;  %5290 = vmatmul.bf16.gmra.mxu0 %v6593_v53  ;;  %v6493_v18 = vor.u32 %v6977_v7, %v6490_v62  ;;  %v7014_v23 = vld [vmem:[#allocation2 + $0x18c] sm:$0xf0]  ;;  %v6626_v53 = vld [vmem:[#allocation2 + $0x190] sm:$0xf0] }
 0x5bf   : > { %5379 = vmatmul.bf16.gmra.mxu1 %v6597_v28  ;;  %v6625_v28 = vor.u32 %v7014_v23, %v6624_v35  ;;  %v7022_v62 = vld [vmem:[#allocation2 + $0x1cc] sm:$0xf0]  ;;  %v7020_v23 = vld [vmem:[#allocation2 + $0x1c4] sm:$0xf] }
 0x5c0   : > { %v4458_v50 = vadd.f32 %v4457_v15, %v4369_v13  ;;  %v7012_v13 = vld [vmem:[#allocation2 + $0x184] sm:$0xf] }
 0x5c2   : > { %v4510_v19 = vmax.f32 %v4458_v50, 0.0  ;;  %v6629_v50 = vor.u32 %v7012_v13, %v6626_v53 }
 0x5c3   : > { %v5253_v3 = vpop.f32.mrf.mxu0 }
 0x5c4   : > { %v4542_v48 = vpack.c.bf16 %v4510_v19, %v4510_v19  ;;  %v5254_v29 = vadd.f32 %v8871_v16, %v5253_v3  ;;  %v5342_v44 = vpop.f32.mrf.mxu1 }
 0x5c5   : > { %v4370_v27 = vpop.f32.mrf.mxu2 }
 0x5c6   : > { %4574 = vst [vmem:[#allocation2 + $0x12c] sm:$0xf] %v4542_v48  ;;  %v8894_v47 = vadd.f32 %v5342_v44, %v5254_v29  ;;  %v4371_v33 = vadd.f32 %v8806_v12, %v4370_v27  ;;  %v4459_v8 = vpop.f32.mrf.mxu3 }
 0x5c8   : > { %v4460_v26 = vadd.f32 %v4459_v8, %v4371_v33 }
 0x5ca   : > { %v4511_v56 = vmax.f32 %v4460_v26, 0.0  ;;  %5428 = vmatmul.bf16.gmra.mxu2 %v6473_v30  ;;  %v6505_v30 = vor.u32 %v6983_v59, %v6504_v49 }
 0x5cb   : > { %5517 = vmatmul.bf16.gmra.mxu3 %v6477_v0  ;;  %v5256_v38 = vpop.f32.mrf.mxu0  ;;  %v6509_v0 = vor.u32 %v6981_v4, %v6506_v32  ;;  %v7026_v32 = vld [vmem:[#allocation2 + $0x1ec] sm:$0xf0] }
 0x5cc   : > { %v4543_v55 = vpack.c.bf16 %v4511_v56, %v4511_v56  ;;  %v5257_v36 = vadd.f32 %v8871_v16, %v5256_v38  ;;  %v5345_v5 = vpop.f32.mrf.mxu1  ;;  %v6640_v38 = vld [vmem:[#allocation2 + $0x1a0] sm:$0xf] }
 0x5cd   : > { %v4373_v31 = vpop.f32.mrf.mxu2 }
 0x5ce   : > { %4575 = vst [vmem:[#allocation2 + $0x13c] sm:$0xf] %v4543_v55  ;;  %v8898_v63 = vadd.f32 %v5345_v5, %v5257_v36  ;;  %v4374_v37 = vadd.f32 %v8806_v12, %v4373_v31  ;;  %v4462_v57 = vpop.f32.mrf.mxu3  ;;  %5295 = vmatmul.bf16.gmra.mxu0 %v6609_v58  ;;  %v6641_v55 = vor.u32 %v7018_v9, %v6640_v38  ;;  %v7016_v36 = vld [vmem:[#allocation2 + $0x1a4] sm:$0xf] }
 0x5cf   : > { %5384 = vmatmul.bf16.gmra.mxu1 %v6613_v6  ;;  %v6645_v58 = vor.u32 %v7016_v36, %v6642_v17  ;;  %v7024_v9 = vld [vmem:[#allocation2 + $0x1e4] sm:$0xf] }
 0x5d0   : > { %v4463_v34 = vadd.f32 %v4462_v57, %v4374_v37 }
 0x5d2   : > { %v4512_v60 = vmax.f32 %v4463_v34, 0.0 }
 0x5d3   : > { %v5258_v46 = vpop.f32.mrf.mxu0 }
 0x5d4   : > { %v4544_v43 = vpack.c.bf16 %v4512_v60, %v4512_v60  ;;  %v5259_v41 = vadd.f32 %v8871_v16, %v5258_v46  ;;  %v5347_v24 = vpop.f32.mrf.mxu1  ;;  %v6987_v60 = vld [vmem:[#allocation2 + $0xb4] sm:$0xf0] }
 0x5d5   : > { %v4375_v2 = vpop.f32.mrf.mxu2 }
 0x5d6   : > { %4576 = vst [vmem:[#allocation2 + $0x14c] sm:$0xf] %v4544_v43  ;;  %v8902_v21 = vadd.f32 %v5347_v24, %v5259_v41  ;;  %v4376_v20 = vadd.f32 %v8806_v12, %v4375_v2  ;;  %v4464_v52 = vpop.f32.mrf.mxu3  ;;  %v6522_v41 = vld [vmem:[#allocation2 + $0xb8] sm:$0xf0]  ;;  %v6520_v24 = vld [vmem:[#allocation2 + $0xa8] sm:$0xf] }
 0x5d7   : > { %v6521_v45 = vor.u32 %v6987_v60, %v6520_v24 }
 0x5d8   : > { %v4465_v25 = vadd.f32 %v4464_v52, %v4376_v20  ;;  %v6985_v20 = vld [vmem:[#allocation2 + $0xac] sm:$0xf] }
 0x5d9   : > { %v6525_v52 = vor.u32 %v6985_v20, %v6522_v41 }
 0x5da   : > { %v4513_v1 = vmax.f32 %v4465_v25, 0.0  ;;  %5433 = vmatmul.bf16.gmra.mxu2 %v6489_v54  ;;  %v6658_v25 = vld [vmem:[#allocation2 + $0x1d0] sm:$0xf0]  ;;  %v6656_v54 = vld [vmem:[#allocation2 + $0x1c0] sm:$0xf] }
 0x5db   : > { %5522 = vmatmul.bf16.gmra.mxu3 %v6493_v18  ;;  %v6657_v18 = vor.u32 %v7022_v62, %v6656_v54  ;;  %v6661_v53 = vor.u32 %v7020_v23, %v6658_v25  ;;  %v6999_v54 = vld [vmem:[#allocation2 + $0x114] sm:$0xf0]  ;;  %v6570_v23 = vld [vmem:[#allocation2 + $0x118] sm:$0xf0] }
 0x5dc   : > { %v4545_v61 = vpack.c.bf16 %v4513_v1, %v4513_v1 }
 0x5dd   : > { %v4378_v15 = vpop.f32.mrf.mxu2 }
 0x5de   : > { %4577 = vst [vmem:[#allocation2 + $0x15c] sm:$0xf] %v4545_v61  ;;  %v4379_v19 = vadd.f32 %v8806_v12, %v4378_v15  ;;  %v4467_v3 = vpop.f32.mrf.mxu3  ;;  %5300 = vmatmul.bf16.gmra.mxu0 %v6625_v28 }
 0x5df   : > { %5389 = vmatmul.bf16.gmra.mxu1 %v6629_v50 }
 0x5e0   : > { %v4468_v48 = vadd.f32 %v4467_v3, %v4379_v19  ;;  %v6991_v19 = vld [vmem:[#allocation2 + $0xd4] sm:$0xf0] }
 0x5e2   : > { %v4514_v29 = vmax.f32 %v4468_v48, 0.0 }
 0x5e4   : > { %v4546_v44 = vpack.c.bf16 %v4514_v29, %v4514_v29  ;;  %v6538_v29 = vld [vmem:[#allocation2 + $0xd8] sm:$0xf0] }
 0x5e5   : > { %v4380_v27 = vpop.f32.mrf.mxu2 }
 0x5e6   : > { %4578 = vst [vmem:[#allocation2 + $0x16c] sm:$0xf] %v4546_v44  ;;  %v4381_v33 = vadd.f32 %v8806_v12, %v4380_v27  ;;  %v4469_v8 = vpop.f32.mrf.mxu3  ;;  %v6536_v44 = vld [vmem:[#allocation2 + $0xc8] sm:$0xf] }
 0x5e7   : > { %v6537_v59 = vor.u32 %v6991_v19, %v6536_v44  ;;  %v7003_v44 = vld [vmem:[#allocation2 + $0x134] sm:$0xf0] }
 0x5e8   : > { %v4470_v26 = vadd.f32 %v4469_v8, %v4381_v33  ;;  %v6989_v33 = vld [vmem:[#allocation2 + $0xcc] sm:$0xf] }
 0x5e9   : > { %v6541_v8 = vor.u32 %v6989_v33, %v6538_v29  ;;  %v6586_v33 = vld [vmem:[#allocation2 + $0x138] sm:$0xf0] }
 0x5ea   : > { %v4515_v56 = vmax.f32 %v4470_v26, 0.0  ;;  %5438 = vmatmul.bf16.gmra.mxu2 %v6505_v30  ;;  %v6674_v26 = vld [vmem:[#allocation2 + $0x1f0] sm:$0xf0]  ;;  %v6672_v30 = vld [vmem:[#allocation2 + $0x1e0] sm:$0xf] }
 0x5eb   : > { %5527 = vmatmul.bf16.gmra.mxu3 %v6509_v0  ;;  %v6673_v0 = vor.u32 %v7026_v32, %v6672_v30  ;;  %v6677_v17 = vor.u32 %v7024_v9, %v6674_v26  ;;  %v7001_v26 = vld [vmem:[#allocation2 + $0x12c] sm:$0xf] }
 0x5ec   : > { %v4547_v10 = vpack.c.bf16 %v4515_v56, %v4515_v56  ;;  %v6589_v30 = vor.u32 %v7001_v26, %v6586_v33 }
 0x5ed   : > { %v4383_v5 = vpop.f32.mrf.mxu2 }
 0x5ee   : > { %4579 = vst [vmem:[#allocation2 + $0x17c] sm:$0xf] %v4547_v10  ;;  %v4384_v51 = vadd.f32 %v8806_v12, %v4383_v5  ;;  %v4472_v31 = vpop.f32.mrf.mxu3  ;;  %5305 = vmatmul.bf16.gmra.mxu0 %v6641_v55 }
 0x5ef   : > { %5394 = vmatmul.bf16.gmra.mxu1 %v6645_v58 }
 0x5f0   : > { %v4473_v6 = vadd.f32 %v4472_v31, %v4384_v51  ;;  %v6995_v51 = vld [vmem:[#allocation2 + $0xf4] sm:$0xf0] }
 0x5f2   : > { %v4516_v37 = vmax.f32 %v4473_v6, 0.0 }
 0x5f4   : > { %v4548_v57 = vpack.c.bf16 %v4516_v37, %v4516_v37  ;;  %v6554_v37 = vld [vmem:[#allocation2 + $0xf8] sm:$0xf0] }
 0x5f5   : > { %v4385_v34 = vpop.f32.mrf.mxu2 }
 0x5f6   : > { %4580 = vst [vmem:[#allocation2 + $0x18c] sm:$0xf] %v4548_v57  ;;  %v4386_v46 = vadd.f32 %v8806_v12, %v4385_v34  ;;  %v4474_v43 = vpop.f32.mrf.mxu3  ;;  %v6552_v57 = vld [vmem:[#allocation2 + $0xe8] sm:$0xf] }
 0x5f7   : > { %v6553_v60 = vor.u32 %v6995_v51, %v6552_v57 }
 0x5f8   : > { %v4475_v2 = vadd.f32 %v4474_v43, %v4386_v46  ;;  %v6993_v46 = vld [vmem:[#allocation2 + $0xec] sm:$0xf] }
 0x5f9   : > { %v6557_v43 = vor.u32 %v6993_v46, %v6554_v37 }
 0x5fa   : > { %v4517_v39 = vmax.f32 %v4475_v2, 0.0  ;;  %5443 = vmatmul.bf16.gmra.mxu2 %v6521_v45 }
 0x5fb   : > { %5532 = vmatmul.bf16.gmra.mxu3 %v6525_v52 }
 0x5fc   : > { %v4549_v7 = vpack.c.bf16 %v4517_v39, %v4517_v39 }
 0x5fd   : > { %v4388_v1 = vpop.f32.mrf.mxu2 }
 0x5fe   : > { %4581 = vst [vmem:[#allocation2 + $0x19c] sm:$0xf] %v4549_v7  ;;  %v4389_v35 = vadd.f32 %v8806_v12, %v4388_v1  ;;  %v4477_v61 = vpop.f32.mrf.mxu3  ;;  %5310 = vmatmul.bf16.gmra.mxu0 %v6657_v18  ;;  %v6568_v1 = vld [vmem:[#allocation2 + $0x108] sm:$0xf] }
 0x5ff   : > { %5399 = vmatmul.bf16.gmra.mxu1 %v6661_v53 }
 0x600   : > { %v4478_v28 = vadd.f32 %v4477_v61, %v4389_v35  ;;  %v6569_v35 = vor.u32 %v6999_v54, %v6568_v1  ;;  %v6997_v61 = vld [vmem:[#allocation2 + $0x10c] sm:$0xf] }
 0x602   : > { %v4518_v13 = vmax.f32 %v4478_v28, 0.0  ;;  %v6573_v28 = vor.u32 %v6997_v61, %v6570_v23  ;;  %v7015_v61 = vld [vmem:[#allocation2 + $0x194] sm:$0xf0] }
 0x604   : > { %v4550_v15 = vpack.c.bf16 %v4518_v13, %v4518_v13 }
 0x605   : > { %v4390_v50 = vpop.f32.mrf.mxu2 }
 0x606   : > { %4582 = vst [vmem:[#allocation2 + $0x1ac] sm:$0xf] %v4550_v15  ;;  %v4391_v3 = vadd.f32 %v8806_v12, %v4390_v50  ;;  %v4479_v48 = vpop.f32.mrf.mxu3  ;;  %v7111_v12 = vld [vmem:[%s9048_s6 + $0x3] ss:$0 sm:$0xff] }
 0x608   : > { %v4480_v27 = vadd.f32 %v4479_v48, %v4391_v3 }
 0x60a   : > { %v4519_v49 = vmax.f32 %v4480_v27, 0.0  ;;  %5448 = vmatmul.bf16.gmra.mxu2 %v6537_v59 }
 0x60b   : > { %5537 = vmatmul.bf16.gmra.mxu3 %v6541_v8  ;;  %v6584_v8 = vld [vmem:[#allocation2 + $0x128] sm:$0xf] }
 0x60c   : > { %v4551_v4 = vpack.c.bf16 %v4519_v49, %v4519_v49  ;;  %v6585_v49 = vor.u32 %v7003_v44, %v6584_v8 }
 0x60d   : > { %v4393_v56 = vpop.f32.mrf.mxu2 }
 0x60e   : > { %4583 = vst [vmem:[#allocation2 + $0x1bc] sm:$0xf] %v4551_v4  ;;  %v4394_v38 = vadd.f32 %v7111_v12, %v4393_v56  ;;  %v4482_v10 = vpop.f32.mrf.mxu3  ;;  %5315 = vmatmul.bf16.gmra.mxu0 %v6673_v0  ;;  %v8928_v4 = vpop.f32.mrf.mxu1 }
 0x60f   : > { %5404 = vmatmul.bf16.gmra.mxu1 %v6677_v17 }
 0x610   : > { %v4483_v55 = vadd.f32 %v4482_v10, %v4394_v38  ;;  %v7007_v38 = vld [vmem:[#allocation2 + $0x154] sm:$0xf0] }
 0x612   : > { %v4520_v36 = vmax.f32 %v4483_v55, 0.0 }
 0x614   : > { %v4552_v5 = vpack.c.bf16 %v4520_v36, %v4520_v36  ;;  %v6602_v36 = vld [vmem:[#allocation2 + $0x158] sm:$0xf0] }
 0x615   : > { %v4395_v58 = vpop.f32.mrf.mxu2 }
 0x616   : > { %4584 = vst [vmem:[#allocation2 + $0x1cc] sm:$0xf] %v4552_v5  ;;  %v4396_v31 = vadd.f32 %v7111_v12, %v4395_v58  ;;  %v4484_v6 = vpop.f32.mrf.mxu3  ;;  %v5352_v5 = vpop.f32.mrf.mxu1  ;;  %v6600_v58 = vld [vmem:[#allocation2 + $0x148] sm:$0xf] }
 0x618   : > { %v4485_v34 = vadd.f32 %v4484_v6, %v4396_v31  ;;  %v6601_v31 = vor.u32 %v7007_v38, %v6600_v58  ;;  %v7005_v6 = vld [vmem:[#allocation2 + $0x14c] sm:$0xf] }
 0x61a   : > { %v4521_v41 = vmax.f32 %v4485_v34, 0.0  ;;  %5453 = vmatmul.bf16.gmra.mxu2 %v6553_v60 }
 0x61b   : > { %5542 = vmatmul.bf16.gmra.mxu3 %v6557_v43 }
 0x61c   : > { %v4553_v24 = vpack.c.bf16 %v4521_v41, %v4521_v41 }
 0x61d   : > { %v4398_v2 = vpop.f32.mrf.mxu2 }
 0x61e   : > { %4585 = vst [vmem:[#allocation2 + $0x1dc] sm:$0xf] %v4553_v24  ;;  %v4399_v45 = vadd.f32 %v7111_v12, %v4398_v2  ;;  %v4487_v20 = vpop.f32.mrf.mxu3  ;;  %v8939_v46 = vpop.f32.mrf.mxu1  ;;  %v7011_v24 = vld [vmem:[#allocation2 + $0x174] sm:$0xf0] }
 0x620   : > { %v4488_v52 = vadd.f32 %v4487_v20, %v4399_v45  ;;  %v6618_v20 = vld [vmem:[#allocation2 + $0x178] sm:$0xf0] }
 0x622   : > { %v4522_v62 = vmax.f32 %v4488_v52, 0.0  ;;  %v6616_v52 = vld [vmem:[#allocation2 + $0x168] sm:$0xf] }
 0x624   : > { %v4554_v39 = vpack.c.bf16 %v4522_v62, %v4522_v62 }
 0x625   : > { %v4400_v25 = vpop.f32.mrf.mxu2 }
 0x626   : > { %4586 = vst [vmem:[#allocation2 + $0x1ec] sm:$0xf] %v4554_v39  ;;  %v4401_v7 = vadd.f32 %v7111_v12, %v4400_v25  ;;  %v4489_v18 = vpop.f32.mrf.mxu3  ;;  %v6617_v39 = vor.u32 %v7011_v24, %v6616_v52  ;;  %v5357_v54 = vpop.f32.mrf.mxu1 }
 0x628   : > { %v4490_v53 = vadd.f32 %v4489_v18, %v4401_v7 }
 0x62a   : > { %v4523_v13 = vmax.f32 %v4490_v53, 0.0  ;;  %5458 = vmatmul.bf16.gmra.mxu2 %v6569_v35 }
 0x62b   : > { %5547 = vmatmul.bf16.gmra.mxu3 %v6573_v28 }
 0x62c   : > { %v4555_v15 = vpack.c.bf16 %v4523_v13, %v4523_v13 }
 0x62d   : > { %v5419_v50 = vpop.f32.mrf.mxu2 }
 0x62e   : > { %4587 = vst [vmem:[#allocation2 + $0x1fc] sm:$0xf] %v4555_v15  ;;  %v5420_v19 = vadd.f32 %v5419_v50, %v8874_v11  ;;  %v5508_v3 = vpop.f32.mrf.mxu3  ;;  %v8924_v11 = vpop.f32.mrf.mxu0  ;;  %v6634_v15 = vld [vmem:[#allocation2 + $0x198] sm:$0xf0]  ;;  %v6632_v50 = vld [vmem:[#allocation2 + $0x188] sm:$0xf] }
 0x62f   : > { %v8951_v53 = vpop.f32.mrf.mxu1 }
 0x630   : > { %v5509_v48 = vadd.f32 %v5508_v3, %v5420_v19  ;;  %v5262_v19 = vadd.f32 %v8871_v16, %v8924_v11  ;;  %v6633_v3 = vor.u32 %v7015_v61, %v6632_v50 }
 0x632   : > { %5589 = vst.msk [vmem:[%s8919_s20] sm:$0xff] %vm5588_vm1, %v5509_v48  ;;  %v7013_v48 = vld [vmem:[#allocation2 + $0x18c] sm:$0xf] }
 0x633   : > { %v6637_v44 = vor.u32 %v7013_v48, %v6634_v15 }
 0x635   : > { %v5421_v29 = vpop.f32.mrf.mxu2  ;;  %v6682_v50 = vld [vmem:[#allocation2 + $0x1f8] sm:$0xf0] }
 0x636   : > { %v5422_v27 = vadd.f32 %v5421_v29, %v8878_v40  ;;  %v5510_v59 = vpop.f32.mrf.mxu3  ;;  %v8931_v17 = vpop.f32.mrf.mxu0 }
 0x637   : > { %v5362_v8 = vpop.f32.mrf.mxu1 }
 0x638   : > { %v5511_v32 = vadd.f32 %v5510_v59, %v5422_v27  ;;  %v5351_v27 = vadd.f32 %v8928_v4, %v5262_v19 }
 0x63a   : > { %5590 = vst.msk [vmem:[%s8919_s20 + $0x8] sm:$0xff] %vm5588_vm1, %v5511_v32  ;;  %5463 = vmatmul.bf16.gmra.mxu2 %v6585_v49  ;;  %v5264_v32 = vadd.f32 %v8871_v16, %v8931_v17 }
 0x63b   : > { %5552 = vmatmul.bf16.gmra.mxu3 %v6589_v30 }
 0x63c   : > { %v5353_v26 = vadd.f32 %v5352_v5, %v5264_v32 }
 0x63d   : > { %v5424_v0 = vpop.f32.mrf.mxu2 }
 0x63e   : > { %v5425_v9 = vadd.f32 %v5424_v0, %v8882_v14  ;;  %v5513_v40 = vpop.f32.mrf.mxu3  ;;  %v6605_v14 = vor.u32 %v7005_v6, %v6602_v36  ;;  %v5266_v37 = vpop.f32.mrf.mxu0  ;;  %v7019_v0 = vld [vmem:[#allocation2 + $0x1b4] sm:$0xf0] }
 0x63f   : > { %v5267_v4 = vadd.f32 %v8871_v16, %v5266_v37  ;;  %v5365_v36 = vpop.f32.mrf.mxu1 }
 0x640   : > { %v5514_v56 = vadd.f32 %v5513_v40, %v5425_v9 }
 0x641   : > { %v5356_v5 = vadd.f32 %v8939_v46, %v5267_v4  ;;  %v6664_v46 = vld [vmem:[#allocation2 + $0x1c8] sm:$0xf] }
 0x642   : > { %5591 = vst.msk [vmem:[%s8919_s20 + $0x10] sm:$0xff] %vm5588_vm1, %v5514_v56  ;;  %v6650_v56 = vld [vmem:[#allocation2 + $0x1b8] sm:$0xf0] }
 0x645   : > { %v5426_v12 = vpop.f32.mrf.mxu2 }
 0x646   : > { %v5427_v10 = vadd.f32 %v5426_v12, %v8886_v42  ;;  %v5515_v55 = vpop.f32.mrf.mxu3  ;;  %v8943_v43 = vpop.f32.mrf.mxu0  ;;  %v6648_v12 = vld [vmem:[#allocation2 + $0x1a8] sm:$0xf] }
 0x648   : > { %v5516_v51 = vadd.f32 %v5515_v55, %v5427_v10  ;;  %v6649_v10 = vor.u32 %v7019_v0, %v6648_v12  ;;  %v7017_v55 = vld [vmem:[#allocation2 + $0x1ac] sm:$0xf] }
 0x649   : > { %v6653_v17 = vor.u32 %v7017_v55, %v6650_v56 }
 0x64a   : > { %5592 = vst.msk [vmem:[%s8919_s20 + $0x18] sm:$0xff] %vm5588_vm1, %v5516_v51  ;;  %5468 = vmatmul.bf16.gmra.mxu2 %v6601_v31 }
 0x64b   : > { %5557 = vmatmul.bf16.gmra.mxu3 %v6605_v14  ;;  %v5269_v14 = vadd.f32 %v8871_v16, %v8943_v43 }
 0x64d   : > { %v5429_v57 = vpop.f32.mrf.mxu2 }
 0x64e   : > { %v5430_v34 = vadd.f32 %v5429_v57, %v8890_v22  ;;  %v5518_v60 = vpop.f32.mrf.mxu3  ;;  %v7009_v22 = vld [vmem:[#allocation2 + $0x16c] sm:$0xf]  ;;  %v5271_v1 = vpop.f32.mrf.mxu0 }
 0x64f   : > { %v6621_v25 = vor.u32 %v7009_v22, %v6618_v20  ;;  %v5367_v57 = vpop.f32.mrf.mxu1  ;;  %v5272_v20 = vadd.f32 %v8871_v16, %v5271_v1 }
 0x650   : > { %v5519_v42 = vadd.f32 %v5518_v60, %v5430_v34  ;;  %v5358_v34 = vadd.f32 %v5357_v54, %v5269_v14 }
 0x651   : > { %v5361_v22 = vadd.f32 %v8951_v53, %v5272_v20 }
 0x652   : > { %5593 = vst.msk [vmem:[%s8919_s20 + $0x20] sm:$0xff] %vm5588_vm1, %v5519_v42  ;;  %v7023_v42 = vld [vmem:[#allocation2 + $0x1d4] sm:$0xf0] }
 0x655   : > { %v5431_v41 = vpop.f32.mrf.mxu2 }
 0x656   : > { %v5432_v2 = vadd.f32 %v5431_v41, %v8894_v47  ;;  %v5520_v45 = vpop.f32.mrf.mxu3  ;;  %v5273_v29 = vpop.f32.mrf.mxu0 }
 0x658   : > { %v5521_v62 = vadd.f32 %v5520_v45, %v5432_v2  ;;  %v6666_v2 = vld [vmem:[#allocation2 + $0x1d8] sm:$0xf0] }
 0x65a   : > { %5594 = vst.msk [vmem:[%s8919_s20 + $0x28] sm:$0xff] %vm5588_vm1, %v5521_v62  ;;  %5473 = vmatmul.bf16.gmra.mxu2 %v6617_v39  ;;  %v6665_v62 = vor.u32 %v7023_v42, %v6664_v46  ;;  %v7021_v39 = vld [vmem:[#allocation2 + $0x1cc] sm:$0xf] }
 0x65b   : > { %5562 = vmatmul.bf16.gmra.mxu3 %v6621_v25  ;;  %v6669_v43 = vor.u32 %v7021_v39, %v6666_v2  ;;  %v5370_v25 = vpop.f32.mrf.mxu1 }
 0x65d   : > { %v5434_v7 = vpop.f32.mrf.mxu2 }
 0x65e   : > { %v5435_v18 = vadd.f32 %v5434_v7, %v8898_v63  ;;  %v5523_v23 = vpop.f32.mrf.mxu3  ;;  %v5276_v49 = vpop.f32.mrf.mxu0 }
 0x65f   : > { %v5277_v53 = vadd.f32 %v8871_v16, %v5276_v49 }
 0x660   : > { %v5524_v47 = vadd.f32 %v5523_v23, %v5435_v18  ;;  %v5274_v23 = vadd.f32 %v8871_v16, %v5273_v29 }
 0x662   : > { %5595 = vst.msk [vmem:[%s8919_s20 + $0x30] sm:$0xff] %vm5588_vm1, %v5524_v47 }
 0x663   : > { %v5372_v19 = vpop.f32.mrf.mxu1 }
 0x665   : > { %v5436_v35 = vpop.f32.mrf.mxu2 }
 0x666   : > { %v5437_v28 = vadd.f32 %v5436_v35, %v8902_v21  ;;  %v5525_v13 = vpop.f32.mrf.mxu3  ;;  %v5278_v58 = vpop.f32.mrf.mxu0  ;;  %v5363_v35 = vadd.f32 %v5362_v8, %v5274_v23 }
 0x667   : > { %v5279_v32 = vadd.f32 %v8871_v16, %v5278_v58 }
 0x668   : > { %v5526_v63 = vadd.f32 %v5525_v13, %v5437_v28  ;;  %v7027_v28 = vld [vmem:[#allocation2 + $0x1f4] sm:$0xf0] }
 0x669   : > { %v5368_v49 = vadd.f32 %v5367_v57, %v5279_v32 }
 0x66a   : > { %5596 = vst.msk [vmem:[%s8919_s20 + $0x38] sm:$0xff] %vm5588_vm1, %v5526_v63  ;;  %5478 = vmatmul.bf16.gmra.mxu2 %v6633_v3  ;;  %v6680_v63 = vld [vmem:[#allocation2 + $0x1e8] sm:$0xf] }
 0x66b   : > { %5567 = vmatmul.bf16.gmra.mxu3 %v6637_v44  ;;  %v6681_v48 = vor.u32 %v7027_v28, %v6680_v63  ;;  %v7025_v44 = vld [vmem:[#allocation2 + $0x1ec] sm:$0xf] }
 0x66c   : > { %v6685_v29 = vor.u32 %v7025_v44, %v6682_v50 }
 0x66d   : > { %v5439_v59 = vpop.f32.mrf.mxu2 }
 0x66e   : > { %v5440_v21 = vadd.f32 %v5439_v59, %v5351_v27  ;;  %v5528_v33 = vpop.f32.mrf.mxu3  ;;  %v5281_v45 = vpop.f32.mrf.mxu0  ;;  %v5366_v59 = vadd.f32 %v5365_v36, %v5277_v53 }
 0x66f   : > { %v5282_v56 = vadd.f32 %v8871_v16, %v5281_v45 }
 0x670   : > { %v5529_v11 = vadd.f32 %v5528_v33, %v5440_v21 }
 0x672   : > { %5597 = vst.msk [vmem:[%s8919_s20 + $0x40] sm:$0xff] %vm5588_vm1, %v5529_v11 }
 0x675   : > { %v5441_v30 = vpop.f32.mrf.mxu2 }
 0x676   : > { %v5442_v9 = vadd.f32 %v5441_v30, %v5353_v26  ;;  %v5530_v40 = vpop.f32.mrf.mxu3  ;;  %v5283_v1 = vpop.f32.mrf.mxu0 }
 0x677   : > { %v5375_v26 = vpop.f32.mrf.mxu1 }
 0x678   : > { %v5531_v38 = vadd.f32 %v5530_v40, %v5442_v9 }
 0x67a   : > { %5598 = vst.msk [vmem:[%s8919_s20 + $0x48] sm:$0xff] %vm5588_vm1, %v5531_v38  ;;  %5483 = vmatmul.bf16.gmra.mxu2 %v6649_v10  ;;  %v5371_v38 = vadd.f32 %v5370_v25, %v5282_v56 }
 0x67b   : > { %5572 = vmatmul.bf16.gmra.mxu3 %v6653_v17 }
 0x67d   : > { %v5444_v51 = vpop.f32.mrf.mxu2 }
 0x67e   : > { %v5445_v31 = vadd.f32 %v5444_v51, %v5356_v5  ;;  %v5533_v6 = vpop.f32.mrf.mxu3  ;;  %v5286_v27 = vpop.f32.mrf.mxu0  ;;  %v5284_v5 = vadd.f32 %v8871_v16, %v5283_v1 }
 0x67f   : > { %v5377_v4 = vpop.f32.mrf.mxu1  ;;  %v5287_v57 = vadd.f32 %v8871_v16, %v5286_v27 }
 0x680   : > { %v5534_v37 = vadd.f32 %v5533_v6, %v5445_v31  ;;  %v5373_v51 = vadd.f32 %v5372_v19, %v5284_v5 }
 0x681   : > { %v5376_v42 = vadd.f32 %v5375_v26, %v5287_v57 }
 0x682   : > { %5599 = vst.msk [vmem:[%s8919_s20 + $0x50] sm:$0xff] %vm5588_vm1, %v5534_v37 }
 0x685   : > { %v5446_v60 = vpop.f32.mrf.mxu2 }
 0x686   : > { %v5447_v41 = vadd.f32 %v5446_v60, %v5358_v34  ;;  %v5535_v24 = vpop.f32.mrf.mxu3  ;;  %v5288_v30 = vpop.f32.mrf.mxu0 }
 0x687   : > { %v5380_v31 = vpop.f32.mrf.mxu1  ;;  %v5289_v46 = vadd.f32 %v8871_v16, %v5288_v30 }
 0x688   : > { %v5536_v52 = vadd.f32 %v5535_v24, %v5447_v41 }
 0x68a   : > { %5600 = vst.msk [vmem:[%s8919_s20 + $0x58] sm:$0xff] %vm5588_vm1, %v5536_v52  ;;  %5488 = vmatmul.bf16.gmra.mxu2 %v6665_v62  ;;  %v5378_v62 = vadd.f32 %v5377_v4, %v5289_v46 }
 0x68b   : > { %5577 = vmatmul.bf16.gmra.mxu3 %v6669_v43 }
 0x68d   : > { %v5449_v54 = vpop.f32.mrf.mxu2 }
 0x68e   : > { %v5450_v7 = vadd.f32 %v5449_v54, %v5361_v22  ;;  %v5538_v18 = vpop.f32.mrf.mxu3  ;;  %v5291_v17 = vpop.f32.mrf.mxu0 }
 0x68f   : > { %v5382_v45 = vpop.f32.mrf.mxu1  ;;  %v5292_v25 = vadd.f32 %v8871_v16, %v5291_v17 }
 0x690   : > { %v5539_v47 = vadd.f32 %v5538_v18, %v5450_v7 }
 0x691   : > { %v5381_v18 = vadd.f32 %v5380_v31, %v5292_v25 }
 0x692   : > { %5601 = vst.msk [vmem:[%s8919_s20 + $0x60] sm:$0xff] %vm5588_vm1, %v5539_v47 }
 0x695   : > { %v5451_v61 = vpop.f32.mrf.mxu2 }
 0x696   : > { %v5452_v13 = vadd.f32 %v5451_v61, %v5363_v35  ;;  %v5540_v15 = vpop.f32.mrf.mxu3  ;;  %v5293_v60 = vpop.f32.mrf.mxu0  ;;  %v9002_v61 = vld [vmem:[%s9050_s8] ss:$0 sm:$0xff] }
 0x697   : > { %v5385_v7 = vpop.f32.mrf.mxu1  ;;  %v5294_v28 = vadd.f32 %v9002_v61, %v5293_v60 }
 0x698   : > { %v5541_v3 = vadd.f32 %v5540_v15, %v5452_v13 }
 0x699   : > { %v5383_v15 = vadd.f32 %v5382_v45, %v5294_v28 }
 0x69a   : > { %5602 = vst.msk [vmem:[%s8919_s20 + $0x68] sm:$0xff] %vm5588_vm1, %v5541_v3  ;;  %5493 = vmatmul.bf16.gmra.mxu2 %v6681_v48 }
 0x69b   : > { %5582 = vmatmul.bf16.gmra.mxu3 %v6685_v29 }
 0x69d   : > { %v5454_v21 = vpop.f32.mrf.mxu2 }
 0x69e   : > { %v5455_v33 = vadd.f32 %v5454_v21, %v5366_v59  ;;  %v5543_v8 = vpop.f32.mrf.mxu3  ;;  %v5296_v52 = vpop.f32.mrf.mxu0 }
 0x69f   : > { %v5387_v16 = vpop.f32.mrf.mxu1  ;;  %v5297_v3 = vadd.f32 %v9002_v61, %v5296_v52 }
 0x6a0   : > { %v5544_v11 = vadd.f32 %v5543_v8, %v5455_v33 }
 0x6a1   : > { %v5386_v44 = vadd.f32 %v5385_v7, %v5297_v3 }
 0x6a2   : > { %5603 = vst.msk [vmem:[%s8919_s20 + $0x70] sm:$0xff] %vm5588_vm1, %v5544_v11 }
 0x6a5   : > { %v5456_v0 = vpop.f32.mrf.mxu2 }
 0x6a6   : > { %v5457_v9 = vadd.f32 %v5456_v0, %v5368_v49  ;;  %v5545_v40 = vpop.f32.mrf.mxu3  ;;  %v5298_v23 = vpop.f32.mrf.mxu0 }
 0x6a7   : > { %v5390_v29 = vpop.f32.mrf.mxu1  ;;  %v5299_v33 = vadd.f32 %v9002_v61, %v5298_v23 }
 0x6a8   : > { %v5546_v12 = vadd.f32 %v5545_v40, %v5457_v9 }
 0x6a9   : > { %v5388_v11 = vadd.f32 %v5387_v16, %v5299_v33 }
 0x6aa   : > { %5604 = vst.msk [vmem:[%s8919_s20 + $0x78] sm:$0xff] %vm5588_vm1, %v5546_v12 }
 0x6ad   : > { %v5459_v10 = vpop.f32.mrf.mxu2 }
 0x6ae   : > { %v5460_v55 = vadd.f32 %v5459_v10, %v5371_v38  ;;  %v5548_v36 = vpop.f32.mrf.mxu3  ;;  %v5301_v53 = vpop.f32.mrf.mxu0 }
 0x6af   : > { %v5392_v0 = vpop.f32.mrf.mxu1  ;;  %v5302_v9 = vadd.f32 %v9002_v61, %v5301_v53 }
 0x6b0   : > { %v5549_v58 = vadd.f32 %v5548_v36, %v5460_v55 }
 0x6b1   : > { %v5391_v12 = vadd.f32 %v5390_v29, %v5302_v9 }
 0x6b2   : > { %5605 = vst.msk [vmem:[%s8919_s20 + $0x80] sm:$0xff] %vm5588_vm1, %v5549_v58 }
 0x6b5   : > { %v5461_v6 = vpop.f32.mrf.mxu2 }
 0x6b6   : > { %v5462_v14 = vadd.f32 %v5461_v6, %v5373_v51  ;;  %v5550_v37 = vpop.f32.mrf.mxu3  ;;  %v5303_v32 = vpop.f32.mrf.mxu0 }
 0x6b7   : > { %v5304_v55 = vadd.f32 %v9002_v61, %v5303_v32  ;;  %v5395_v17 = vpop.f32.mrf.mxu1 }
 0x6b8   : > { %v5551_v34 = vadd.f32 %v5550_v37, %v5462_v14 }
 0x6b9   : > { %v5393_v5 = vadd.f32 %v5392_v0, %v5304_v55 }
 0x6ba   : > { %5606 = vst.msk [vmem:[%s8919_s20 + $0x88] sm:$0xff] %vm5588_vm1, %v5551_v34 }
 0x6bd   : > { %v5464_v41 = vpop.f32.mrf.mxu2 }
 0x6be   : > { %v5465_v24 = vadd.f32 %v5464_v41, %v5376_v42  ;;  %v5553_v2 = vpop.f32.mrf.mxu3  ;;  %v5306_v56 = vpop.f32.mrf.mxu0 }
 0x6bf   : > { %v5307_v14 = vadd.f32 %v9002_v61, %v5306_v56  ;;  %v5397_v57 = vpop.f32.mrf.mxu1 }
 0x6c0   : > { %v5554_v20 = vadd.f32 %v5553_v2, %v5465_v24 }
 0x6c1   : > { %v5396_v34 = vadd.f32 %v5395_v17, %v5307_v14 }
 0x6c2   : > { %5607 = vst.msk [vmem:[%s8919_s20 + $0x90] sm:$0xff] %vm5588_vm1, %v5554_v20 }
 0x6c5   : > { %v5466_v39 = vpop.f32.mrf.mxu2 }
 0x6c6   : > { %v5467_v43 = vadd.f32 %v5466_v39, %v5378_v62  ;;  %v5555_v22 = vpop.f32.mrf.mxu3  ;;  %v5308_v58 = vpop.f32.mrf.mxu0 }
 0x6c7   : > { %v5309_v2 = vadd.f32 %v9002_v61, %v5308_v58  ;;  %v5400_v20 = vpop.f32.mrf.mxu1 }
 0x6c8   : > { %v5556_v54 = vadd.f32 %v5555_v22, %v5467_v43 }
 0x6c9   : > { %v5398_v46 = vadd.f32 %v5397_v57, %v5309_v2 }
 0x6ca   : > { %5608 = vst.msk [vmem:[%s8919_s20 + $0x98] sm:$0xff] %vm5588_vm1, %v5556_v54 }
 0x6cd   : > { %v5469_v47 = vpop.f32.mrf.mxu2 }
 0x6ce   : > { %v5470_v1 = vadd.f32 %v5469_v47, %v5381_v18  ;;  %v5558_v35 = vpop.f32.mrf.mxu3  ;;  %v5311_v24 = vpop.f32.mrf.mxu0 }
 0x6cf   : > { %v5312_v43 = vadd.f32 %v9002_v61, %v5311_v24  ;;  %v5402_v47 = vpop.f32.mrf.mxu1 }
 0x6d0   : > { %v5559_v13 = vadd.f32 %v5558_v35, %v5470_v1 }
 0x6d1   : > { %v5401_v54 = vadd.f32 %v5400_v20, %v5312_v43 }
 0x6d2   : > { %5609 = vst.msk [vmem:[%s8919_s20 + $0xa0] sm:$0xff] %vm5588_vm1, %v5559_v13 }
 0x6d5   : > { %v5471_v50 = vpop.f32.mrf.mxu2 }
 0x6d6   : > { %v5472_v19 = vadd.f32 %v5471_v50, %v5383_v15  ;;  %v5560_v63 = vpop.f32.mrf.mxu3  ;;  %v5313_v25 = vpop.f32.mrf.mxu0 }
 0x6d7   : > { %v5314_v1 = vadd.f32 %v9002_v61, %v5313_v25  ;;  %v5405_v53 = vpop.f32.mrf.mxu1 }
 0x6d8   : > { %v5561_v48 = vadd.f32 %v5560_v63, %v5472_v19 }
 0x6d9   : > { %v5403_v13 = vadd.f32 %v5402_v47, %v5314_v1 }
 0x6da   : > { %5610 = vst.msk [vmem:[%s8919_s20 + $0xa8] sm:$0xff] %vm5588_vm1, %v5561_v48 }
 0x6dd   : > { %v5474_v27 = vpop.f32.mrf.mxu2 }
 0x6de   : > { %v5475_v59 = vadd.f32 %v5474_v27, %v5386_v44  ;;  %v5563_v21 = vpop.f32.mrf.mxu3  ;;  %v5316_v28 = vpop.f32.mrf.mxu0 }
 0x6df   : > { %v5317_v19 = vadd.f32 %v9002_v61, %v5316_v28  ;;  %v5407_v33 = vpop.f32.mrf.mxu1 }
 0x6e0   : > { %v5564_v8 = vadd.f32 %v5563_v21, %v5475_v59 }
 0x6e1   : > { %v5406_v3 = vadd.f32 %v5405_v53, %v5317_v19 }
 0x6e2   : > { %5611 = vst.msk [vmem:[%s8919_s20 + $0xb0] sm:$0xff] %vm5588_vm1, %v5564_v8 }
 0x6e5   : > { %v5476_v26 = vpop.f32.mrf.mxu2 }
 0x6e6   : > { %v5477_v49 = vadd.f32 %v5476_v26, %v5388_v11  ;;  %v5565_v30 = vpop.f32.mrf.mxu3  ;;  %v5318_v48 = vpop.f32.mrf.mxu0 }
 0x6e7   : > { %v5319_v59 = vadd.f32 %v9002_v61, %v5318_v48 }
 0x6e8   : > { %v5566_v40 = vadd.f32 %v5565_v30, %v5477_v49 }
 0x6e9   : > { %v5408_v8 = vadd.f32 %v5407_v33, %v5319_v59 }
 0x6ea   : > { %5612 = vst.msk [vmem:[%s8919_s20 + $0xb8] sm:$0xff] %vm5588_vm1, %v5566_v40 }
 0x6ed   : > { %v5479_v4 = vpop.f32.mrf.mxu2 }
 0x6ee   : > { %v5480_v38 = vadd.f32 %v5479_v4, %v5391_v12  ;;  %v5568_v10 = vpop.f32.mrf.mxu3 }
 0x6f0   : > { %v5569_v36 = vadd.f32 %v5568_v10, %v5480_v38 }
 0x6f2   : > { %5613 = vst.msk [vmem:[%s8919_s20 + $0xc0] sm:$0xff] %vm5588_vm1, %v5569_v36 }
 0x6f5   : > { %v5481_v51 = vpop.f32.mrf.mxu2 }
 0x6f6   : > { %v5482_v31 = vadd.f32 %v5481_v51, %v5393_v5  ;;  %v5570_v6 = vpop.f32.mrf.mxu3 }
 0x6f8   : > { %v5571_v37 = vadd.f32 %v5570_v6, %v5482_v31 }
 0x6fa   : > { %5614 = vst.msk [vmem:[%s8919_s20 + $0xc8] sm:$0xff] %vm5588_vm1, %v5571_v37 }
 0x6fd   : > { %v5484_v60 = vpop.f32.mrf.mxu2 }
 0x6fe   : > { %v5485_v42 = vadd.f32 %v5484_v60, %v5396_v34  ;;  %v5573_v41 = vpop.f32.mrf.mxu3 }
 0x700   : > { %v5574_v45 = vadd.f32 %v5573_v41, %v5485_v42 }
 0x702   : > { %5615 = vst.msk [vmem:[%s8919_s20 + $0xd0] sm:$0xff] %vm5588_vm1, %v5574_v45 }
 0x705   : > { %v5486_v52 = vpop.f32.mrf.mxu2 }
 0x706   : > { %v5487_v62 = vadd.f32 %v5486_v52, %v5398_v46  ;;  %v5575_v39 = vpop.f32.mrf.mxu3 }
 0x708   : > { %v5576_v22 = vadd.f32 %v5575_v39, %v5487_v62 }
 0x70a   : > { %5616 = vst.msk [vmem:[%s8919_s20 + $0xd8] sm:$0xff] %vm5588_vm1, %v5576_v22 }
 0x70d   : > { %v5489_v7 = vpop.f32.mrf.mxu2 }
 0x70e   : > { %v5490_v18 = vadd.f32 %v5489_v7, %v5401_v54  ;;  %v5578_v23 = vpop.f32.mrf.mxu3 }
 0x710   : > { %v5579_v35 = vadd.f32 %v5578_v23, %v5490_v18 }
 0x712   : > { %5617 = vst.msk [vmem:[%s8919_s20 + $0xe0] sm:$0xff] %vm5588_vm1, %v5579_v35 }
 0x715   : > { %v5491_v16 = vpop.f32.mrf.mxu2 }
 0x716   : > { %v5492_v15 = vadd.f32 %v5491_v16, %v5403_v13  ;;  %v5580_v50 = vpop.f32.mrf.mxu3 }
 0x718   : > { %v5581_v63 = vadd.f32 %v5580_v50, %v5492_v15 }
 0x71a   : > { %5618 = vst.msk [vmem:[%s8919_s20 + $0xe8] sm:$0xff] %vm5588_vm1, %v5581_v63 }
 0x71d   : > { %v5494_v44 = vpop.f32.mrf.mxu2 }
 0x71e   : > { %v5495_v29 = vadd.f32 %v5494_v44, %v5406_v3  ;;  %v5583_v27 = vpop.f32.mrf.mxu3 }
 0x720   : > { %v5584_v21 = vadd.f32 %v5583_v27, %v5495_v29 }
 0x722   : > { %5619 = vst.msk [vmem:[%s8919_s20 + $0xf0] sm:$0xff] %vm5588_vm1, %v5584_v21 }
 0x725   : > { %v5496_v32 = vpop.f32.mrf.mxu2 }
 0x726   : > { %v5497_v11 = vadd.f32 %v5496_v32, %v5408_v8  ;;  %v5585_v26 = vpop.f32.mrf.mxu3 }
 0x728   : > { %v5586_v49 = vadd.f32 %v5585_v26, %v5497_v11 }
 0x72a   : > { %5620 = vst.msk [vmem:[%s8919_s20 + $0xf8] sm:$0xff] %vm5588_vm1, %v5586_v49 }
 0x72b PF: > { %s21_s30 = sadd.s32 1, %s7217_s30  }
 0x72c   : > { %p18_p7 = scmp.ge.s32.totalorder %s21_s30, 4  }
 0x72e   :  { %20 = sbr.rel (!%p18_p7) target bundleno = 2 (0x2), region = 111 }
 0x733   :  { %5643 = vsyncpa [#allocation4], 1 }
 0x734   :  { %5645 = vsyncpa [#allocation4 + $0x1], 1 }
 0x735   :  { %5646 = vsyncpa [#allocation6], 1 }

</bundles_post_ra>
